<compile_context>
chip_gen: v6e
topology: v6e:2x2x1
jax: 0.10.0
libtpu: 0.0.40
codegen_flags: <defaults>
</compile_context>

<pallas_src>
import functools

import jax
import jax.numpy as jnp
from jax import lax
from jax.experimental import pallas as pl
from jax.experimental.pallas import tpu as pltpu

LANE = 128


def _rup(x, m):
    return (x + m - 1) // m * m


def _cpad(c):
    return _rup(max(int(c), 1), LANE)


def _vmem_limit(need_bytes):
    # >= default scoped limit everywhere, <= safe fraction of v7x's 64 MiB.
    return int(min(max(2 * need_bytes + (16 << 20), 32 << 20), 48 << 20))


# ----------------------------------------------------------------------------
# Pallas kernels
# ----------------------------------------------------------------------------
def _conv_kernel(x_ref, w_ref, b_ref, o_ref, *, kh, kw, wp_in, rows_out, activation):
    """One image: stride-1 conv as kh*kw shifted bf16 dots on VMEM-resident data.

    x_ref: (1, R_in, Cin_p) bf16   row-flattened, spatially padded NHWC input
           (row pitch wp_in is a multiple of 8 -> sublane-aligned row shifts).
    w_ref: (kh*kw, Cin_p, Cout_p) bf16,  b_ref: (1, Cout_p) f32
    o_ref: (1, rows_out, Cout_p) bf16 with rows_out = Ho*Wp8 (wrapped "garbage"
           columns are sliced off in the wrapper).
    """
    cout = w_ref.shape[2]
    acc = jnp.zeros((rows_out, cout), jnp.float32)
    for i in range(kh):
        for j in range(kw):
            s = i * wp_in + j
            patch = x_ref[0, s:s + rows_out, :]            # bf16, no recast
            acc = acc + jnp.dot(patch, w_ref[i * kw + j],
                                preferred_element_type=jnp.float32)
    acc = acc + b_ref[...]
    if activation == "swish":
        acc = acc * jax.nn.sigmoid(acc)
    o_ref[0] = acc.astype(o_ref.dtype)


def _codebook_kernel(z_ref, et_ref, e2_ref, epost_ref, zq_ref, idx_ref, sse_ref,
                     *, num_codes, rows_valid, tm):
    """Vector quantization for one M-tile, post_quant 1x1 conv pre-folded into e."""
    t = pl.program_id(0)
    z_bf = z_ref[...]                                      # (tm, Dp) bf16
    z = z_bf.astype(jnp.float32)
    z2 = jnp.sum(z * z, axis=-1, keepdims=True)            # (tm, 1)
    # codebook is pre-transposed + pre-cast at init -> single bf16 MXU dot
    cross = jnp.dot(z_bf, et_ref[...], preferred_element_type=jnp.float32)  # (tm, Kp)
    d = z2 - 2.0 * cross + e2_ref[...]                     # ||e||^2 precomputed
    iota_k = lax.broadcasted_iota(jnp.int32, d.shape, 1)
    d = jnp.where(iota_k < num_codes, d, jnp.inf)          # mask padded codes
    min_d = jnp.min(d, axis=-1, keepdims=True)             # (tm, 1)
    idx = jnp.min(jnp.where(d <= min_d, iota_k, num_codes), axis=-1)        # (tm,)

    # sse directly from the masked min distance (NOTE: inherits bf16 cross-term
    # rounding; exact-forward value would need an f32 diff path).
    row = lax.broadcasted_iota(jnp.int32, (tm, 1), 0) + t * tm
    mask = (row < rows_valid).astype(jnp.float32)
    sse = jnp.sum(jnp.maximum(min_d, 0.0) * mask)
    sse_ref[0] = jnp.zeros((1, LANE), jnp.float32) + sse
    idx_ref[0] = idx[None, :].astype(jnp.int32)

    # exact gather of the post_quant-folded codebook rows
    onehot = (iota_k == idx[:, None]).astype(jnp.float32)
    zq_ref[...] = jnp.dot(onehot, epost_ref[...],
                          preferred_element_type=jnp.float32).astype(zq_ref.dtype)


# ----------------------------------------------------------------------------
# Pallas wrappers
# ----------------------------------------------------------------------------
def pallas_conv(x, w, b, *, kh, kw, ho, wo, activation=None):
    """act(conv_{kh x kw, stride 1}(x) + b) on a spatially pre-padded bf16 input.

    x: (N, Hp, Wp, Cin_p) bf16, Hp = ho+kh-1, Wp = wo+kw-1, Cin_p multiple of 128.
    w: (kh*kw, Cin_p, Cout_p) bf16,  b: (1, Cout_p) f32 (pre-packed at init).
    Returns (N, ho, wo, Cout_p) bf16.
    """
    x = x.astype(jnp.bfloat16)
    n, hp, wp, cin = x.shape
    kk, cin_w, cout = w.shape
    assert kk == kh * kw and cin_w == cin
    assert hp == ho + kh - 1 and wp == wo + kw - 1

    wp8 = _rup(wp, 8)                       # sublane-aligned row pitch
    if wp8 > wp:
        x = jnp.pad(x, ((0, 0), (0, 0), (0, wp8 - wp), (0, 0)))
    rows_out = ho * wp8
    r_need = hp * wp8 + kw - 1
    r_in = _rup(r_need, 16)                 # bf16 sublane packing
    x_flat = x.reshape(n, hp * wp8, cin)
    if r_in > hp * wp8:
        x_flat = jnp.pad(x_flat, ((0, 0), (0, r_in - hp * wp8), (0, 0)))

    in_bytes = r_in * cin * 2
    out_bytes = rows_out * cout * 2
    w_bytes = kk * cin * cout * 2
    need = 2 * (in_bytes + out_bytes) + 2 * (w_bytes + cout * 4) + rows_out * cout * 4

    flops = 2 * n * rows_out * kk * cin * cout
    trans = n * rows_out * cout if activation == "swish" else 0
    bytes_accessed = n * (in_bytes + out_bytes) + w_bytes + cout * 4

    kern = functools.partial(_conv_kernel, kh=kh, kw=kw, wp_in=wp8,
                             rows_out=rows_out, activation=activation)
    out = pl.pallas_call(
        kern,
        out_shape=jax.ShapeDtypeStruct((n, rows_out, cout), jnp.bfloat16),
        grid=(n,),
        in_specs=[
            pl.BlockSpec((1, r_in, cin), lambda i: (i, 0, 0)),
            pl.BlockSpec((kk, cin, cout), lambda i: (0, 0, 0)),
            pl.BlockSpec((1, cout), lambda i: (0, 0)),
        ],
        out_specs=pl.BlockSpec((1, rows_out, cout), lambda i: (i, 0, 0)),
        compiler_params=pltpu.CompilerParams(
            dimension_semantics=("parallel",),
            vmem_limit_bytes=_vmem_limit(need)),
        cost_estimate=pl.CostEstimate(flops=int(flops), transcendentals=int(trans),
                                      bytes_accessed=int(bytes_accessed)),
    )(x_flat, w, b)
    # drop the (kw-1 + pitch padding) wrapped columns appended to each row
    return out.reshape(n, ho, wp8, cout)[:, :, :wo, :]


def pallas_codebook_postquant(z_flat, codebook, *, num_codes, latent_dim, beta):
    """Nearest-neighbour VQ (tiled over M); post_quant 1x1 conv folded into e."""
    e_t, e2, e_post = codebook          # (Dp, Kp) bf16, (1, Kp) f32, (Kp, Dp) f32
    m, dp = z_flat.shape
    kp = e_t.shape[1]

    # Large M tiles: on single-TC v5e/v6e the grid is a serial loop, so forcing
    # tiny tiles only adds per-step overhead.  (v7x megacore split: TODO(synk).)
    tm = min(512, _rup(m, 16))
    mp = _rup(m, tm)
    if mp > m:
        z_flat = jnp.pad(z_flat, ((0, mp - m), (0, 0)))
    nt = mp // tm

    need = (2 * (tm * dp * 2 + tm * dp * 2 + tm * 4 + LANE * 4)
            + 2 * (dp * kp * 2 + kp * 4 + kp * dp * 4))
    flops = 4 * mp * kp * dp
    bytes_accessed = mp * dp * 2 * 2 + dp * kp * 2 + kp * 4 + kp * dp * 4 \
        + nt * (tm * 4 + LANE * 4)

    kern = functools.partial(_codebook_kernel, num_codes=num_codes,
                             rows_valid=m, tm=tm)
    zq, idx, sse = pl.pallas_call(
        kern,
        out_shape=(
            jax.ShapeDtypeStruct((mp, dp), jnp.bfloat16),
            jax.ShapeDtypeStruct((nt, 1, tm), jnp.int32),
            jax.ShapeDtypeStruct((nt, 1, LANE), jnp.float32),
        ),
        grid=(nt,),
        in_specs=[
            pl.BlockSpec((tm, dp), lambda i: (i, 0)),
            pl.BlockSpec((dp, kp), lambda i: (0, 0)),
            pl.BlockSpec((1, kp), lambda i: (0, 0)),
            pl.BlockSpec((kp, dp), lambda i: (0, 0)),
        ],
        out_specs=(
            pl.BlockSpec((tm, dp), lambda i: (i, 0)),
            pl.BlockSpec((1, 1, tm), lambda i: (i, 0, 0)),
            pl.BlockSpec((1, 1, LANE), lambda i: (i, 0, 0)),
        ),
        compiler_params=pltpu.CompilerParams(
            dimension_semantics=("parallel",),
            vmem_limit_bytes=_vmem_limit(need)),
        cost_estimate=pl.CostEstimate(flops=int(flops), transcendentals=0,
                                      bytes_accessed=int(bytes_accessed)),
    )(z_flat, e_t, e2, e_post)

    indices = idx[:, 0, :].reshape(-1)[:m]
    sse_total = jnp.sum(sse[:, 0, 0])
    # ||sg(zq)-z||^2.mean() + beta*||zq-sg(z)||^2.mean()  (forward value)
    # TODO(synk): straight-through estimator / stop_gradient wiring is
    # forward-only (inference).
    q_loss = (1.0 + beta) * sse_total / (m * latent_dim)
    return zq[:m], indices, q_loss


# ----------------------------------------------------------------------------
# Wrapper-side layout prep (padding / space-to-depth / depth-to-space).
# ----------------------------------------------------------------------------
def _prep_s1(x):
    """Spatial pad=1 for a 3x3 stride-1 conv (channels already lane-padded)."""
    return jnp.pad(x, ((0, 0), (1, 1), (1, 1), (0, 0)))


def _prep_s2(x, c_real):
    """Spatial pad=1 + space-to-depth(2) on the RAW channels, then lane-pad.

    Turns a 3x3/stride-2/pad-1 conv into a 2x2/stride-1 conv whose contraction
    dim is _cpad(4*c_real) (128 here) instead of 4*_cpad(c_real) (512).
    Assumes even H/W (as does the stride-2 rewrite itself).
    """
    n, h, w, _ = x.shape
    x = x[..., :c_real]
    xp = jnp.pad(x, ((0, 0), (1, 1), (1, 1), (0, 0)))
    hs, ws = (h + 2) // 2, (w + 2) // 2
    y = xp.reshape(n, hs, 2, ws, 2, c_real).transpose(0, 1, 3, 2, 4, 5).reshape(
        n, hs, ws, 4 * c_real)
    cp = _cpad(4 * c_real)
    y = jnp.pad(y, ((0, 0), (0, 0), (0, 0), (0, cp - 4 * c_real)))
    return y.astype(jnp.bfloat16)


def _depth_to_space2x(y, c_real):
    """Unpack the 4 phase-channel groups of an upsample-folded conv output."""
    n, hl, wl, _ = y.shape
    y = y[..., :4 * c_real].reshape(n, hl, wl, 2, 2, c_real)
    return y.transpose(0, 1, 3, 2, 4, 5).reshape(n, 2 * hl, 2 * wl, c_real)


def _lane_pad(x):
    c = x.shape[-1]
    return jnp.pad(x, ((0, 0), (0, 0), (0, 0), (0, _cpad(c) - c)))


# ----------------------------------------------------------------------------
# Parameter construction: deterministic synthetic weights, pre-packed at init
# into the exact (bf16, lane-padded) layouts the kernels consume.
# ----------------------------------------------------------------------------
def _pack_conv_s1(w_oihw, b):
    cout, cin, kh, kw = w_oihw.shape
    cip, cop = _cpad(cin), _cpad(cout)
    wt = jnp.transpose(w_oihw, (2, 3, 1, 0)).reshape(kh * kw, cin, cout)
    wp = jnp.zeros((kh * kw, cip, cop), jnp.float32).at[:, :cin, :cout].set(wt)
    bp = jnp.zeros((1, cop), jnp.float32).at[0, :cout].set(b)
    return wp.astype(jnp.bfloat16), bp


def _pack_conv_s2(w_oihw, b):
    """3x3 stride-2 pad-1 conv == 2x2 stride-1 conv on the s2d (raw-channel) input."""
    cout, cin, kh, kw = w_oihw.shape
    assert kh == 3 and kw == 3
    cip, cop = _cpad(4 * cin), _cpad(cout)
    wp = jnp.zeros((2, 2, cip, cop), jnp.float32)
    for i in range(3):
        for j in range(3):
            di, pi = divmod(i, 2)
            dj, pj = divmod(j, 2)
            ph = pi * 2 + pj
            wp = wp.at[di, dj, ph * cin:(ph + 1) * cin, :cout].set(w_oihw[:, :, i, j].T)
    bp = jnp.zeros((1, cop), jnp.float32).at[0, :cout].set(b)
    return wp.reshape(4, cip, cop).astype(jnp.bfloat16), bp


def _pack_conv_up(w_oihw, b):
    """nearest-2x upsample + 3x3 pad-1 conv == 3x3 conv on the LOW-res (pad-1)
    input producing 4 phase-packed output-channel groups (exact fold)."""
    cout, cin, kh, kw = w_oihw.shape
    assert kh == 3 and kw == 3
    cip, cop = _cpad(cin), _cpad(4 * cout)
    # V[p, d, k]: which original vertical taps k land on low-res window row d
    # for output phase p (same matrix horizontally).
    V = jnp.array([[[1, 0, 0], [0, 1, 1], [0, 0, 0]],
                   [[0, 0, 0], [1, 1, 0], [0, 0, 1]]], jnp.float32)
    w_t = jnp.transpose(w_oihw, (2, 3, 1, 0))                    # (ki,kj,cin,cout)
    w_eff = jnp.einsum('pik,qjl,klcf->ijcpqf', V, V, w_t)        # (3,3,cin,2,2,cout)
    w_eff = w_eff.reshape(9, cin, 4 * cout)
    wp = jnp.zeros((9, cip, cop), jnp.float32).at[:, :cin, :4 * cout].set(w_eff)
    bp = jnp.zeros((1, cop), jnp.float32).at[0, :4 * cout].set(jnp.tile(b, 4))
    return wp.astype(jnp.bfloat16), bp


def _pack_codebook(e, e_post):
    k, d = e.shape
    kp, dp = _cpad(k), _cpad(d)
    ep = jnp.zeros((kp, dp), jnp.float32).at[:k, :d].set(e)
    e_t = ep.T.astype(jnp.bfloat16)                  # (Dp, Kp) pre-transposed bf16
    e2 = jnp.sum(ep * ep, axis=-1)[None, :]          # (1, Kp) hoisted out of kernel
    e_post_p = jnp.zeros((kp, dp), jnp.float32).at[:k, :d].set(e_post)
    return e_t, e2, e_post_p


def init_vqgan_params(configs, seed=42):
    dim = configs["latent_dim"]
    hid = configs["hidden_dim"]
    img_ch = configs["image_channels"]
    k = configs["num_codebook_vectors"]
    keys = jax.random.split(jax.random.PRNGKey(seed), 9)

    def conv(key, cin, cout, ksz):
        fan_in = cin * ksz * ksz
        w = jax.random.normal(key, (cout, cin, ksz, ksz), jnp.float32) / jnp.sqrt(
            float(fan_in))
        return w, jnp.zeros((cout,), jnp.float32)

    w_e1, b_e1 = conv(keys[0], img_ch, hid, 3)
    w_e2, b_e2 = conv(keys[1], hid, hid, 3)
    w_e3, b_e3 = conv(keys[2], hid, dim, 3)
    w_q, b_q = conv(keys[3], dim, dim, 1)
    w_pq, b_pq = conv(keys[4], dim, dim, 1)
    w_d1, b_d1 = conv(keys[5], dim, hid, 3)
    w_d2, b_d2 = conv(keys[6], hid, hid, 3)
    w_d3, b_d3 = conv(keys[7], hid, img_ch, 3)
    e = jax.random.uniform(keys[8], (k, dim), jnp.float32, minval=-1.0 / k,
                           maxval=1.0 / k)

    # Fold quant_conv (1x1) into enc3's weights (exact linear-into-linear).
    wq = w_q[:, :, 0, 0]
    w_e3f = jnp.einsum('oi,ickl->ockl', wq, w_e3)
    b_e3f = wq @ b_e3 + b_q

    # Fold post_quant_conv into the codebook rows (exact: one-hot gather).
    wpq = w_pq[:, :, 0, 0]
    e_post = e @ wpq.T + b_pq[None, :]

    return {
        "enc1": _pack_conv_s2(w_e1, b_e1),
        "enc2": _pack_conv_s2(w_e2, b_e2),
        "enc3q": _pack_conv_s1(w_e3f, b_e3f),
        "dec1": _pack_conv_s1(w_d1, b_d1),
        "dec2up": _pack_conv_up(w_d2, b_d2),
        "dec3up": _pack_conv_up(w_d3, b_d3),
        "codebook": _pack_codebook(e, e_post),
    }


# ----------------------------------------------------------------------------
# VQGAN forward
# ----------------------------------------------------------------------------
def vqgan_forward(params, imgs_nchw, configs):
    beta = configs["beta"]
    dim = configs["latent_dim"]
    hid = configs["hidden_dim"]
    img_ch = configs["image_channels"]
    k = configs["num_codebook_vectors"]

    x = jnp.transpose(imgs_nchw, (0, 2, 3, 1))                 # NCHW -> NHWC
    n, h, w, _ = x.shape
    hl, wl = h // 4, w // 4

    # ---- Encoder (stride-2 3x3 convs run as 2x2 stride-1 on s2d inputs) ----
    h1 = pallas_conv(_prep_s2(x, img_ch), *params["enc1"], kh=2, kw=2,
                     ho=h // 2, wo=w // 2, activation="swish")
    h2 = pallas_conv(_prep_s2(h1, hid), *params["enc2"], kh=2, kw=2,
                     ho=hl, wo=wl, activation="swish")
    # last encoder conv with the quant_conv already folded into its weights
    z = pallas_conv(_prep_s1(h2), *params["enc3q"], kh=3, kw=3,
                    ho=hl, wo=wl, activation=None)

    # ---- Codebook (VQ); post_quant 1x1 conv folded into the codebook rows ----
    dp = z.shape[-1]
    z_flat = z.reshape(n * hl * wl, dp)
    zq_post, indices, q_loss = pallas_codebook_postquant(
        z_flat, params["codebook"], num_codes=k, latent_dim=dim, beta=beta)
    p = zq_post.reshape(n, hl, wl, dp)

    # ---- Decoder (upsample+conv pairs folded into phase-packed convs) ----
    d1 = pallas_conv(_prep_s1(p), *params["dec1"], kh=3, kw=3,
                     ho=hl, wo=wl, activation="swish")
    d2 = pallas_conv(_prep_s1(d1), *params["dec2up"], kh=3, kw=3,
                     ho=hl, wo=wl, activation="swish")
    d2 = _lane_pad(_depth_to_space2x(d2, hid))                  # (n, 2hl, 2wl, 128)
    d3 = pallas_conv(_prep_s1(d2), *params["dec3up"], kh=3, kw=3,
                     ho=2 * hl, wo=2 * wl, activation=None)
    dec = _depth_to_space2x(d3, img_ch)                         # (n, 4hl, 4wl, C)

    decoded = jnp.transpose(dec, (0, 3, 1, 2)).astype(jnp.float32)  # NHWC -> NCHW
    return decoded, indices, q_loss


# ----------------------------------------------------------------------------
# Main
# ----------------------------------------------------------------------------
if __name__ == "__main__":
    configs = {
        "latent_dim": 8,
        "hidden_dim": 16,
        "image_channels": 3,
        "num_codebook_vectors": 32,
        "beta": 0.25,
    }
    params = init_vqgan_params(configs, seed=42)
    imgs = jax.random.normal(jax.random.PRNGKey(0), (2, 3, 16, 16), jnp.float32)

    fwd = jax.jit(functools.partial(vqgan_forward, configs=configs))
    decoded, indices, q_loss = fwd(params, imgs)
    decoded = jax.block_until_ready(decoded)
    indices = jax.block_until_ready(indices)
    q_loss = jax.block_until_ready(q_loss)

    assert decoded.shape == (2, 3, 16, 16)
    assert indices.shape == (2 * 4 * 4,)
    assert indices.dtype == jnp.int32
    assert q_loss.shape == ()

    print("KERNEL_OK")
</pallas_src>

<mosaic_0001>
module attributes {stable_mosaic.version = 11 : i64} {
  func.func @_conv_kernel(%arg0: i32, %arg1: memref<1x160x128xbf16, #tpu.memory_space<vmem>>, %arg2: memref<4x128x128xbf16, #tpu.memory_space<vmem>>, %arg3: memref<1x128xf32, #tpu.memory_space<vmem>>, %arg4: memref<1x128x128xbf16, #tpu.memory_space<vmem>>) attributes {dimension_semantics = [#tpu.dimension_semantics<parallel>], iteration_bounds = array<i64: 2>, scalar_prefetch = 0 : i64, scratch_operands = 0 : i64, tpu.core_type = #tpu.core_type<tc>, window_params = [{transform_indices = @transform_0, window_bounds = array<i64: 1, 160, 128>}, {pipeline_mode = #tpu.pipeline_mode<synchronous>, transform_indices = @transform_1, window_bounds = array<i64: 4, 128, 128>}, {pipeline_mode = #tpu.pipeline_mode<synchronous>, transform_indices = @transform_2, window_bounds = array<i64: 1, 128>}, {transform_indices = @transform_3, window_bounds = array<i64: 1, 128, 128>}]} {
    %cst = arith.constant 0.000000e+00 : f32
    %0 = vector.broadcast %cst : f32 to vector<128x128xf32>
    %c0 = arith.constant 0 : index
    %c0_0 = arith.constant 0 : index
    %c0_1 = arith.constant 0 : index
    %1 = vector.load %arg1[%c0, %c0_0, %c0_1] : memref<1x160x128xbf16, #tpu.memory_space<vmem>>, vector<1x128x128xbf16>
    %2 = vector.shape_cast %1 : vector<1x128x128xbf16> to vector<128x128xbf16>
    %c0_2 = arith.constant 0 : index
    %c0_3 = arith.constant 0 : index
    %c0_4 = arith.constant 0 : index
    %3 = vector.load %arg2[%c0_2, %c0_3, %c0_4] : memref<4x128x128xbf16, #tpu.memory_space<vmem>>, vector<1x128x128xbf16>
    %4 = vector.shape_cast %3 : vector<1x128x128xbf16> to vector<128x128xbf16>
    %cst_5 = arith.constant dense<0.000000e+00> : vector<128x128xf32>
    %5 = tpu.matmul %2, %4, %cst_5 {dimension_numbers = #tpu.dot_dimension_numbers<[1], [0], [0], [1], [0, 0, 1, 1], [], []>} : vector<128x128xbf16>, vector<128x128xbf16>, vector<128x128xf32> -> vector<128x128xf32>
    %6 = arith.addf %0, %5 : vector<128x128xf32>
    %c0_6 = arith.constant 0 : index
    %c1 = arith.constant 1 : index
    %c0_7 = arith.constant 0 : index
    %7 = vector.load %arg1[%c0_6, %c1, %c0_7] : memref<1x160x128xbf16, #tpu.memory_space<vmem>>, vector<1x128x128xbf16>
    %8 = vector.shape_cast %7 : vector<1x128x128xbf16> to vector<128x128xbf16>
    %c1_8 = arith.constant 1 : index
    %c0_9 = arith.constant 0 : index
    %c0_10 = arith.constant 0 : index
    %9 = vector.load %arg2[%c1_8, %c0_9, %c0_10] : memref<4x128x128xbf16, #tpu.memory_space<vmem>>, vector<1x128x128xbf16>
    %10 = vector.shape_cast %9 : vector<1x128x128xbf16> to vector<128x128xbf16>
    %cst_11 = arith.constant dense<0.000000e+00> : vector<128x128xf32>
    %11 = tpu.matmul %8, %10, %cst_11 {dimension_numbers = #tpu.dot_dimension_numbers<[1], [0], [0], [1], [0, 0, 1, 1], [], []>} : vector<128x128xbf16>, vector<128x128xbf16>, vector<128x128xf32> -> vector<128x128xf32>
    %12 = arith.addf %6, %11 : vector<128x128xf32>
    %c0_12 = arith.constant 0 : index
    %c16 = arith.constant 16 : index
    %c0_13 = arith.constant 0 : index
    %13 = vector.load %arg1[%c0_12, %c16, %c0_13] : memref<1x160x128xbf16, #tpu.memory_space<vmem>>, vector<1x128x128xbf16>
    %14 = vector.shape_cast %13 : vector<1x128x128xbf16> to vector<128x128xbf16>
    %c2 = arith.constant 2 : index
    %c0_14 = arith.constant 0 : index
    %c0_15 = arith.constant 0 : index
    %15 = vector.load %arg2[%c2, %c0_14, %c0_15] : memref<4x128x128xbf16, #tpu.memory_space<vmem>>, vector<1x128x128xbf16>
    %16 = vector.shape_cast %15 : vector<1x128x128xbf16> to vector<128x128xbf16>
    %cst_16 = arith.constant dense<0.000000e+00> : vector<128x128xf32>
    %17 = tpu.matmul %14, %16, %cst_16 {dimension_numbers = #tpu.dot_dimension_numbers<[1], [0], [0], [1], [0, 0, 1, 1], [], []>} : vector<128x128xbf16>, vector<128x128xbf16>, vector<128x128xf32> -> vector<128x128xf32>
    %18 = arith.addf %12, %17 : vector<128x128xf32>
    %c0_17 = arith.constant 0 : index
    %c17 = arith.constant 17 : index
    %c0_18 = arith.constant 0 : index
    %19 = vector.load %arg1[%c0_17, %c17, %c0_18] : memref<1x160x128xbf16, #tpu.memory_space<vmem>>, vector<1x128x128xbf16>
    %20 = vector.shape_cast %19 : vector<1x128x128xbf16> to vector<128x128xbf16>
    %c3 = arith.constant 3 : index
    %c0_19 = arith.constant 0 : index
    %c0_20 = arith.constant 0 : index
    %21 = vector.load %arg2[%c3, %c0_19, %c0_20] : memref<4x128x128xbf16, #tpu.memory_space<vmem>>, vector<1x128x128xbf16>
    %22 = vector.shape_cast %21 : vector<1x128x128xbf16> to vector<128x128xbf16>
    %cst_21 = arith.constant dense<0.000000e+00> : vector<128x128xf32>
    %23 = tpu.matmul %20, %22, %cst_21 {dimension_numbers = #tpu.dot_dimension_numbers<[1], [0], [0], [1], [0, 0, 1, 1], [], []>} : vector<128x128xbf16>, vector<128x128xbf16>, vector<128x128xf32> -> vector<128x128xf32>
    %24 = arith.addf %18, %23 : vector<128x128xf32>
    %c0_22 = arith.constant 0 : index
    %c0_23 = arith.constant 0 : index
    %25 = vector.load %arg3[%c0_22, %c0_23] : memref<1x128xf32, #tpu.memory_space<vmem>>, vector<1x128xf32>
    %26 = vector.broadcast %25 : vector<1x128xf32> to vector<128x128xf32>
    %27 = arith.addf %24, %26 : vector<128x128xf32>
    %28 = arith.negf %27 : vector<128x128xf32>
    %29 = math.exp %28 : vector<128x128xf32>
    %cst_24 = arith.constant 1.000000e+00 : f32
    %30 = vector.broadcast %cst_24 : f32 to vector<128x128xf32>
    %31 = arith.addf %30, %29 : vector<128x128xf32>
    %32 = arith.divf %30, %31 : vector<128x128xf32>
    %33 = arith.mulf %27, %32 : vector<128x128xf32>
    %34 = arith.truncf %33 : vector<128x128xf32> to vector<128x128xbf16>
    %c0_25 = arith.constant 0 : index
    %c0_26 = arith.constant 0 : index
    %c0_27 = arith.constant 0 : index
    %35 = vector.load %arg4[%c0_25, %c0_26, %c0_27] : memref<1x128x128xbf16, #tpu.memory_space<vmem>>, vector<1x128x128xbf16>
    %36 = vector.shape_cast %35 : vector<1x128x128xbf16> to vector<128x128xbf16>
    %37 = vector.shape_cast %34 : vector<128x128xbf16> to vector<1x128x128xbf16>
    tpu.vector_store %arg4[%c0_25, %c0_26, %c0_27], %37 {strides = array<i32>} : memref<1x128x128xbf16, #tpu.memory_space<vmem>>, vector<1x128x128xbf16>,
    return
  }
  func.func @transform_0(%arg0: i32) -> (i32, i32, i32) {
    %c0_i32 = arith.constant 0 : i32
    %c0_i32_0 = arith.constant 0 : i32
    %c0_i32_1 = arith.constant 0 : i32
    return %arg0, %c0_i32, %c0_i32_0 : i32, i32, i32
  }
  func.func @transform_1(%arg0: i32) -> (i32, i32, i32) {
    %c0_i32 = arith.constant 0 : i32
    %c0_i32_0 = arith.constant 0 : i32
    %c0_i32_1 = arith.constant 0 : i32
    %c0_i32_2 = arith.constant 0 : i32
    return %c0_i32, %c0_i32_0, %c0_i32_1 : i32, i32, i32
  }
  func.func @transform_2(%arg0: i32) -> (i32, i32) {
    %c0_i32 = arith.constant 0 : i32
    %c0_i32_0 = arith.constant 0 : i32
    %c0_i32_1 = arith.constant 0 : i32
    return %c0_i32, %c0_i32_0 : i32, i32
  }
  func.func @transform_3(%arg0: i32) -> (i32, i32, i32) {
    %c0_i32 = arith.constant 0 : i32
    %c0_i32_0 = arith.constant 0 : i32
    %c0_i32_1 = arith.constant 0 : i32
    return %arg0, %c0_i32, %c0_i32_0 : i32, i32, i32
  }
}

module attributes {stable_mosaic.version = 11 : i64} {
  func.func @_conv_kernel(%arg0: i32, %arg1: memref<1x48x128xbf16, #tpu.memory_space<vmem>>, %arg2: memref<4x128x128xbf16, #tpu.memory_space<vmem>>, %arg3: memref<1x128xf32, #tpu.memory_space<vmem>>, %arg4: memref<1x32x128xbf16, #tpu.memory_space<vmem>>) attributes {dimension_semantics = [#tpu.dimension_semantics<parallel>], iteration_bounds = array<i64: 2>, scalar_prefetch = 0 : i64, scratch_operands = 0 : i64, tpu.core_type = #tpu.core_type<tc>, window_params = [{transform_indices = @transform_0, window_bounds = array<i64: 1, 48, 128>}, {pipeline_mode = #tpu.pipeline_mode<synchronous>, transform_indices = @transform_1, window_bounds = array<i64: 4, 128, 128>}, {pipeline_mode = #tpu.pipeline_mode<synchronous>, transform_indices = @transform_2, window_bounds = array<i64: 1, 128>}, {transform_indices = @transform_3, window_bounds = array<i64: 1, 32, 128>}]} {
    %cst = arith.constant 0.000000e+00 : f32
    %0 = vector.broadcast %cst : f32 to vector<32x128xf32>
    %c0 = arith.constant 0 : index
    %c0_0 = arith.constant 0 : index
    %c0_1 = arith.constant 0 : index
    %1 = vector.load %arg1[%c0, %c0_0, %c0_1] : memref<1x48x128xbf16, #tpu.memory_space<vmem>>, vector<1x32x128xbf16>
    %2 = vector.shape_cast %1 : vector<1x32x128xbf16> to vector<32x128xbf16>
    %c0_2 = arith.constant 0 : index
    %c0_3 = arith.constant 0 : index
    %c0_4 = arith.constant 0 : index
    %3 = vector.load %arg2[%c0_2, %c0_3, %c0_4] : memref<4x128x128xbf16, #tpu.memory_space<vmem>>, vector<1x128x128xbf16>
    %4 = vector.shape_cast %3 : vector<1x128x128xbf16> to vector<128x128xbf16>
    %cst_5 = arith.constant dense<0.000000e+00> : vector<32x128xf32>
    %5 = tpu.matmul %2, %4, %cst_5 {dimension_numbers = #tpu.dot_dimension_numbers<[1], [0], [0], [1], [0, 0, 1, 1], [], []>} : vector<32x128xbf16>, vector<128x128xbf16>, vector<32x128xf32> -> vector<32x128xf32>
    %6 = arith.addf %0, %5 : vector<32x128xf32>
    %c0_6 = arith.constant 0 : index
    %c1 = arith.constant 1 : index
    %c0_7 = arith.constant 0 : index
    %7 = vector.load %arg1[%c0_6, %c1, %c0_7] : memref<1x48x128xbf16, #tpu.memory_space<vmem>>, vector<1x32x128xbf16>
    %8 = vector.shape_cast %7 : vector<1x32x128xbf16> to vector<32x128xbf16>
    %c1_8 = arith.constant 1 : index
    %c0_9 = arith.constant 0 : index
    %c0_10 = arith.constant 0 : index
    %9 = vector.load %arg2[%c1_8, %c0_9, %c0_10] : memref<4x128x128xbf16, #tpu.memory_space<vmem>>, vector<1x128x128xbf16>
    %10 = vector.shape_cast %9 : vector<1x128x128xbf16> to vector<128x128xbf16>
    %cst_11 = arith.constant dense<0.000000e+00> : vector<32x128xf32>
    %11 = tpu.matmul %8, %10, %cst_11 {dimension_numbers = #tpu.dot_dimension_numbers<[1], [0], [0], [1], [0, 0, 1, 1], [], []>} : vector<32x128xbf16>, vector<128x128xbf16>, vector<32x128xf32> -> vector<32x128xf32>
    %12 = arith.addf %6, %11 : vector<32x128xf32>
    %c0_12 = arith.constant 0 : index
    %c8 = arith.constant 8 : index
    %c0_13 = arith.constant 0 : index
    %13 = vector.load %arg1[%c0_12, %c8, %c0_13] : memref<1x48x128xbf16, #tpu.memory_space<vmem>>, vector<1x32x128xbf16>
    %14 = vector.shape_cast %13 : vector<1x32x128xbf16> to vector<32x128xbf16>
    %c2 = arith.constant 2 : index
    %c0_14 = arith.constant 0 : index
    %c0_15 = arith.constant 0 : index
    %15 = vector.load %arg2[%c2, %c0_14, %c0_15] : memref<4x128x128xbf16, #tpu.memory_space<vmem>>, vector<1x128x128xbf16>
    %16 = vector.shape_cast %15 : vector<1x128x128xbf16> to vector<128x128xbf16>
    %cst_16 = arith.constant dense<0.000000e+00> : vector<32x128xf32>
    %17 = tpu.matmul %14, %16, %cst_16 {dimension_numbers = #tpu.dot_dimension_numbers<[1], [0], [0], [1], [0, 0, 1, 1], [], []>} : vector<32x128xbf16>, vector<128x128xbf16>, vector<32x128xf32> -> vector<32x128xf32>
    %18 = arith.addf %12, %17 : vector<32x128xf32>
    %c0_17 = arith.constant 0 : index
    %c9 = arith.constant 9 : index
    %c0_18 = arith.constant 0 : index
    %19 = vector.load %arg1[%c0_17, %c9, %c0_18] : memref<1x48x128xbf16, #tpu.memory_space<vmem>>, vector<1x32x128xbf16>
    %20 = vector.shape_cast %19 : vector<1x32x128xbf16> to vector<32x128xbf16>
    %c3 = arith.constant 3 : index
    %c0_19 = arith.constant 0 : index
    %c0_20 = arith.constant 0 : index
    %21 = vector.load %arg2[%c3, %c0_19, %c0_20] : memref<4x128x128xbf16, #tpu.memory_space<vmem>>, vector<1x128x128xbf16>
    %22 = vector.shape_cast %21 : vector<1x128x128xbf16> to vector<128x128xbf16>
    %cst_21 = arith.constant dense<0.000000e+00> : vector<32x128xf32>
    %23 = tpu.matmul %20, %22, %cst_21 {dimension_numbers = #tpu.dot_dimension_numbers<[1], [0], [0], [1], [0, 0, 1, 1], [], []>} : vector<32x128xbf16>, vector<128x128xbf16>, vector<32x128xf32> -> vector<32x128xf32>
    %24 = arith.addf %18, %23 : vector<32x128xf32>
    %c0_22 = arith.constant 0 : index
    %c0_23 = arith.constant 0 : index
    %25 = vector.load %arg3[%c0_22, %c0_23] : memref<1x128xf32, #tpu.memory_space<vmem>>, vector<1x128xf32>
    %26 = vector.broadcast %25 : vector<1x128xf32> to vector<32x128xf32>
    %27 = arith.addf %24, %26 : vector<32x128xf32>
    %28 = arith.negf %27 : vector<32x128xf32>
    %29 = math.exp %28 : vector<32x128xf32>
    %cst_24 = arith.constant 1.000000e+00 : f32
    %30 = vector.broadcast %cst_24 : f32 to vector<32x128xf32>
    %31 = arith.addf %30, %29 : vector<32x128xf32>
    %32 = arith.divf %30, %31 : vector<32x128xf32>
    %33 = arith.mulf %27, %32 : vector<32x128xf32>
    %34 = arith.truncf %33 : vector<32x128xf32> to vector<32x128xbf16>
    %c0_25 = arith.constant 0 : index
    %c0_26 = arith.constant 0 : index
    %c0_27 = arith.constant 0 : index
    %35 = vector.load %arg4[%c0_25, %c0_26, %c0_27] : memref<1x32x128xbf16, #tpu.memory_space<vmem>>, vector<1x32x128xbf16>
    %36 = vector.shape_cast %35 : vector<1x32x128xbf16> to vector<32x128xbf16>
    %37 = vector.shape_cast %34 : vector<32x128xbf16> to vector<1x32x128xbf16>
    tpu.vector_store %arg4[%c0_25, %c0_26, %c0_27], %37 {strides = array<i32>} : memref<1x32x128xbf16, #tpu.memory_space<vmem>>, vector<1x32x128xbf16>,
    return
  }
  func.func @transform_0(%arg0: i32) -> (i32, i32, i32) {
    %c0_i32 = arith.constant 0 : i32
    %c0_i32_0 = arith.constant 0 : i32
    %c0_i32_1 = arith.constant 0 : i32
    return %arg0, %c0_i32, %c0_i32_0 : i32, i32, i32
  }
  func.func @transform_1(%arg0: i32) -> (i32, i32, i32) {
    %c0_i32 = arith.constant 0 : i32
    %c0_i32_0 = arith.constant 0 : i32
    %c0_i32_1 = arith.constant 0 : i32
    %c0_i32_2 = arith.constant 0 : i32
    return %c0_i32, %c0_i32_0, %c0_i32_1 : i32, i32, i32
  }
  func.func @transform_2(%arg0: i32) -> (i32, i32) {
    %c0_i32 = arith.constant 0 : i32
    %c0_i32_0 = arith.constant 0 : i32
    %c0_i32_1 = arith.constant 0 : i32
    return %c0_i32, %c0_i32_0 : i32, i32
  }
  func.func @transform_3(%arg0: i32) -> (i32, i32, i32) {
    %c0_i32 = arith.constant 0 : i32
    %c0_i32_0 = arith.constant 0 : i32
    %c0_i32_1 = arith.constant 0 : i32
    return %arg0, %c0_i32, %c0_i32_0 : i32, i32, i32
  }
}

module attributes {stable_mosaic.version = 11 : i64} {
  func.func @_codebook_kernel(%arg0: i32, %arg1: memref<32x128xbf16, #tpu.memory_space<vmem>>, %arg2: memref<128x128xbf16, #tpu.memory_space<vmem>>, %arg3: memref<1x128xf32, #tpu.memory_space<vmem>>, %arg4: memref<128x128xf32, #tpu.memory_space<vmem>>, %arg5: memref<32x128xbf16, #tpu.memory_space<vmem>>, %arg6: memref<1x1x32xi32, #tpu.memory_space<vmem>>, %arg7: memref<1x1x128xf32, #tpu.memory_space<vmem>>) attributes {dimension_semantics = [#tpu.dimension_semantics<parallel>], iteration_bounds = array<i64: 1>, scalar_prefetch = 0 : i64, scratch_operands = 0 : i64, tpu.core_type = #tpu.core_type<tc>, window_params = [{transform_indices = @transform_0, window_bounds = array<i64: 32, 128>}, {pipeline_mode = #tpu.pipeline_mode<synchronous>, transform_indices = @transform_1, window_bounds = array<i64: 128, 128>}, {pipeline_mode = #tpu.pipeline_mode<synchronous>, transform_indices = @transform_2, window_bounds = array<i64: 1, 128>}, {pipeline_mode = #tpu.pipeline_mode<synchronous>, transform_indices = @transform_3, window_bounds = array<i64: 128, 128>}, {transform_indices = @transform_4, window_bounds = array<i64: 32, 128>}, {transform_indices = @transform_5, window_bounds = array<i64: 1, 1, 32>}, {transform_indices = @transform_6, window_bounds = array<i64: 1, 1, 128>}]} {
    %c0 = arith.constant 0 : index
    %c0_0 = arith.constant 0 : index
    %0 = vector.load %arg1[%c0, %c0_0] : memref<32x128xbf16, #tpu.memory_space<vmem>>, vector<32x128xbf16>
    %1 = arith.extf %0 : vector<32x128xbf16> to vector<32x128xf32>
    %2 = arith.mulf %1, %1 : vector<32x128xf32>
    %cst = arith.constant dense<0.000000e+00> : vector<32xf32>
    %3 = vector.multi_reduction <add>, %2, %cst [1] : vector<32x128xf32> to vector<32xf32>
    %4 = vector.shape_cast %3 : vector<32xf32> to vector<32x1xf32>
    %c0_1 = arith.constant 0 : index
    %c0_2 = arith.constant 0 : index
    %5 = vector.load %arg2[%c0_1, %c0_2] : memref<128x128xbf16, #tpu.memory_space<vmem>>, vector<128x128xbf16>
    %cst_3 = arith.constant dense<0.000000e+00> : vector<32x128xf32>
    %6 = tpu.matmul %0, %5, %cst_3 {dimension_numbers = #tpu.dot_dimension_numbers<[1], [0], [0], [1], [0, 0, 1, 1], [], []>} : vector<32x128xbf16>, vector<128x128xbf16>, vector<32x128xf32> -> vector<32x128xf32>
    %cst_4 = arith.constant 2.000000e+00 : f32
    %7 = vector.broadcast %cst_4 : f32 to vector<32x128xf32>
    %8 = arith.mulf %7, %6 : vector<32x128xf32>
    %9 = vector.broadcast %4 : vector<32x1xf32> to vector<32x128xf32>
    %10 = arith.subf %9, %8 : vector<32x128xf32>
    %c0_5 = arith.constant 0 : index
    %c0_6 = arith.constant 0 : index
    %11 = vector.load %arg3[%c0_5, %c0_6] : memref<1x128xf32, #tpu.memory_space<vmem>>, vector<1x128xf32>
    %12 = vector.broadcast %11 : vector<1x128xf32> to vector<32x128xf32>
    %13 = arith.addf %10, %12 : vector<32x128xf32>
    %14 = tpu.iota {dimensions = array<i32: 1>} : vector<32x128xi32>
    %c32_i32 = arith.constant 32 : i32
    %15 = vector.broadcast %c32_i32 : i32 to vector<32x128xi32>
    %16 = arith.cmpi slt, %14, %15 : vector<32x128xi32>
    %cst_7 = arith.constant 0x7F800000 : f32
    %17 = vector.broadcast %cst_7 : f32 to vector<32x128xf32>
    %18 = arith.select %16, %13, %17 : vector<32x128xi1>, vector<32x128xf32>
    %cst_8 = arith.constant dense<0x7F800000> : vector<32xf32>
    %19 = vector.multi_reduction <minimumf>, %18, %cst_8 [1] : vector<32x128xf32> to vector<32xf32>
    %20 = vector.shape_cast %19 : vector<32xf32> to vector<32x1xf32>
    %21 = vector.broadcast %20 : vector<32x1xf32> to vector<32x128xf32>
    %22 = arith.cmpf ole, %18, %21 : vector<32x128xf32>
    %c32_i32_9 = arith.constant 32 : i32
    %23 = vector.broadcast %c32_i32_9 : i32 to vector<32x128xi32>
    %24 = arith.select %22, %14, %23 : vector<32x128xi1>, vector<32x128xi32>
    %cst_10 = arith.constant dense<2147483647> : vector<32xi32>
    %25 = vector.multi_reduction <minsi>, %24, %cst_10 [1] : vector<32x128xi32> to vector<32xi32>
    %26 = tpu.iota {dimensions = array<i32: 0>} : vector<32x1xi32>
    %c32_i32_11 = arith.constant 32 : i32
    %27 = arith.muli %arg0, %c32_i32_11 : i32
    %28 = vector.broadcast %27 : i32 to vector<32x1xi32>
    %29 = arith.addi %26, %28 : vector<32x1xi32>
    %c32_i32_12 = arith.constant 32 : i32
    %30 = vector.broadcast %c32_i32_12 : i32 to vector<32x1xi32>
    %31 = arith.cmpi slt, %29, %30 : vector<32x1xi32>
    %32 = arith.extui %31 : vector<32x1xi1> to vector<32x1xi32>
    %33 = arith.sitofp %32 : vector<32x1xi32> to vector<32x1xf32>
    %cst_13 = arith.constant 0.000000e+00 : f32
    %34 = vector.broadcast %cst_13 : f32 to vector<32x1xf32>
    %35 = arith.maximumf %20, %34 : vector<32x1xf32>
    %36 = arith.mulf %35, %33 : vector<32x1xf32>
    %37 = vector.shape_cast %36 : vector<32x1xf32> to vector<1x32x1xf32>
    %cst_14 = arith.constant dense<0.000000e+00> : vector<1xf32>
    %38 = vector.multi_reduction <add>, %37, %cst_14 [1, 2] : vector<1x32x1xf32> to vector<1xf32>
    %39 = vector.shape_cast %38 : vector<1xf32> to vector<1x1x1xf32>
    %40 = vector.extract %39[0, 0, 0] : f32 from vector<1x1x1xf32>
    %cst_15 = arith.constant 0.000000e+00 : f32
    %41 = vector.broadcast %cst_15 : f32 to vector<1x128xf32>
    %42 = vector.broadcast %40 : f32 to vector<1x128xf32>
    %43 = arith.addf %41, %42 : vector<1x128xf32>
    %c0_16 = arith.constant 0 : index
    %c0_17 = arith.constant 0 : index
    %c0_18 = arith.constant 0 : index
    %44 = vector.load %arg7[%c0_16, %c0_17, %c0_18] : memref<1x1x128xf32, #tpu.memory_space<vmem>>, vector<1x1x128xf32>
    %45 = vector.shape_cast %44 : vector<1x1x128xf32> to vector<1x128xf32>
    %46 = vector.shape_cast %43 : vector<1x128xf32> to vector<1x1x128xf32>
    tpu.vector_store %arg7[%c0_16, %c0_17, %c0_18], %46 {strides = array<i32>} : memref<1x1x128xf32, #tpu.memory_space<vmem>>, vector<1x1x128xf32>,
    %47 = vector.shape_cast %25 : vector<32xi32> to vector<1x32xi32>
    %c0_19 = arith.constant 0 : index
    %c0_20 = arith.constant 0 : index
    %c0_21 = arith.constant 0 : index
    %48 = vector.load %arg6[%c0_19, %c0_20, %c0_21] : memref<1x1x32xi32, #tpu.memory_space<vmem>>, vector<1x1x32xi32>
    %49 = vector.shape_cast %48 : vector<1x1x32xi32> to vector<1x32xi32>
    %50 = vector.shape_cast %47 : vector<1x32xi32> to vector<1x1x32xi32>
    tpu.vector_store %arg6[%c0_19, %c0_20, %c0_21], %50 {strides = array<i32>} : memref<1x1x32xi32, #tpu.memory_space<vmem>>, vector<1x1x32xi32>,
    %51 = vector.shape_cast %25 : vector<32xi32> to vector<32x1xi32>
    %52 = vector.broadcast %51 : vector<32x1xi32> to vector<32x128xi32>
    %53 = arith.cmpi eq, %14, %52 : vector<32x128xi32>
    %54 = arith.extui %53 : vector<32x128xi1> to vector<32x128xi32>
    %55 = arith.sitofp %54 : vector<32x128xi32> to vector<32x128xf32>
    %c0_22 = arith.constant 0 : index
    %c0_23 = arith.constant 0 : index
    %56 = vector.load %arg4[%c0_22, %c0_23] : memref<128x128xf32, #tpu.memory_space<vmem>>, vector<128x128xf32>
    %cst_24 = arith.constant dense<0.000000e+00> : vector<32x128xf32>
    %57 = tpu.matmul %55, %56, %cst_24 {dimension_numbers = #tpu.dot_dimension_numbers<[1], [0], [0], [1], [0, 0, 1, 1], [], []>} : vector<32x128xf32>, vector<128x128xf32>, vector<32x128xf32> -> vector<32x128xf32>
    %58 = arith.truncf %57 : vector<32x128xf32> to vector<32x128xbf16>
    %c0_25 = arith.constant 0 : index
    %c0_26 = arith.constant 0 : index
    %59 = vector.load %arg5[%c0_25, %c0_26] : memref<32x128xbf16, #tpu.memory_space<vmem>>, vector<32x128xbf16>
    tpu.vector_store %arg5[%c0_25, %c0_26], %58 {strides = array<i32>} : memref<32x128xbf16, #tpu.memory_space<vmem>>, vector<32x128xbf16>,
    return
  }
  func.func @transform_0(%arg0: i32) -> (i32, i32) {
    %c0_i32 = arith.constant 0 : i32
    %c0_i32_0 = arith.constant 0 : i32
    return %arg0, %c0_i32 : i32, i32
  }
  func.func @transform_1(%arg0: i32) -> (i32, i32) {
    %c0_i32 = arith.constant 0 : i32
    %c0_i32_0 = arith.constant 0 : i32
    %c0_i32_1 = arith.constant 0 : i32
    return %c0_i32, %c0_i32_0 : i32, i32
  }
  func.func @transform_2(%arg0: i32) -> (i32, i32) {
    %c0_i32 = arith.constant 0 : i32
    %c0_i32_0 = arith.constant 0 : i32
    %c0_i32_1 = arith.constant 0 : i32
    return %c0_i32, %c0_i32_0 : i32, i32
  }
  func.func @transform_3(%arg0: i32) -> (i32, i32) {
    %c0_i32 = arith.constant 0 : i32
    %c0_i32_0 = arith.constant 0 : i32
    %c0_i32_1 = arith.constant 0 : i32
    return %c0_i32, %c0_i32_0 : i32, i32
  }
  func.func @transform_4(%arg0: i32) -> (i32, i32) {
    %c0_i32 = arith.constant 0 : i32
    %c0_i32_0 = arith.constant 0 : i32
    return %arg0, %c0_i32 : i32, i32
  }
  func.func @transform_5(%arg0: i32) -> (i32, i32, i32) {
    %c0_i32 = arith.constant 0 : i32
    %c0_i32_0 = arith.constant 0 : i32
    %c0_i32_1 = arith.constant 0 : i32
    return %arg0, %c0_i32, %c0_i32_0 : i32, i32, i32
  }
  func.func @transform_6(%arg0: i32) -> (i32, i32, i32) {
    %c0_i32 = arith.constant 0 : i32
    %c0_i32_0 = arith.constant 0 : i32
    %c0_i32_1 = arith.constant 0 : i32
    return %arg0, %c0_i32, %c0_i32_0 : i32, i32, i32
  }
}

module attributes {stable_mosaic.version = 11 : i64} {
  func.func @_conv_kernel(%arg0: i32, %arg1: memref<1x64x128xbf16, #tpu.memory_space<vmem>>, %arg2: memref<9x128x128xbf16, #tpu.memory_space<vmem>>, %arg3: memref<1x128xf32, #tpu.memory_space<vmem>>, %arg4: memref<1x32x128xbf16, #tpu.memory_space<vmem>>) attributes {dimension_semantics = [#tpu.dimension_semantics<parallel>], iteration_bounds = array<i64: 2>, scalar_prefetch = 0 : i64, scratch_operands = 0 : i64, tpu.core_type = #tpu.core_type<tc>, window_params = [{transform_indices = @transform_0, window_bounds = array<i64: 1, 64, 128>}, {pipeline_mode = #tpu.pipeline_mode<synchronous>, transform_indices = @transform_1, window_bounds = array<i64: 9, 128, 128>}, {pipeline_mode = #tpu.pipeline_mode<synchronous>, transform_indices = @transform_2, window_bounds = array<i64: 1, 128>}, {transform_indices = @transform_3, window_bounds = array<i64: 1, 32, 128>}]} {
    %cst = arith.constant 0.000000e+00 : f32
    %0 = vector.broadcast %cst : f32 to vector<32x128xf32>
    %c0 = arith.constant 0 : index
    %c0_0 = arith.constant 0 : index
    %c0_1 = arith.constant 0 : index
    %1 = vector.load %arg1[%c0, %c0_0, %c0_1] : memref<1x64x128xbf16, #tpu.memory_space<vmem>>, vector<1x32x128xbf16>
    %2 = vector.shape_cast %1 : vector<1x32x128xbf16> to vector<32x128xbf16>
    %c0_2 = arith.constant 0 : index
    %c0_3 = arith.constant 0 : index
    %c0_4 = arith.constant 0 : index
    %3 = vector.load %arg2[%c0_2, %c0_3, %c0_4] : memref<9x128x128xbf16, #tpu.memory_space<vmem>>, vector<1x128x128xbf16>
    %4 = vector.shape_cast %3 : vector<1x128x128xbf16> to vector<128x128xbf16>
    %cst_5 = arith.constant dense<0.000000e+00> : vector<32x128xf32>
    %5 = tpu.matmul %2, %4, %cst_5 {dimension_numbers = #tpu.dot_dimension_numbers<[1], [0], [0], [1], [0, 0, 1, 1], [], []>} : vector<32x128xbf16>, vector<128x128xbf16>, vector<32x128xf32> -> vector<32x128xf32>
    %6 = arith.addf %0, %5 : vector<32x128xf32>
    %c0_6 = arith.constant 0 : index
    %c1 = arith.constant 1 : index
    %c0_7 = arith.constant 0 : index
    %7 = vector.load %arg1[%c0_6, %c1, %c0_7] : memref<1x64x128xbf16, #tpu.memory_space<vmem>>, vector<1x32x128xbf16>
    %8 = vector.shape_cast %7 : vector<1x32x128xbf16> to vector<32x128xbf16>
    %c1_8 = arith.constant 1 : index
    %c0_9 = arith.constant 0 : index
    %c0_10 = arith.constant 0 : index
    %9 = vector.load %arg2[%c1_8, %c0_9, %c0_10] : memref<9x128x128xbf16, #tpu.memory_space<vmem>>, vector<1x128x128xbf16>
    %10 = vector.shape_cast %9 : vector<1x128x128xbf16> to vector<128x128xbf16>
    %cst_11 = arith.constant dense<0.000000e+00> : vector<32x128xf32>
    %11 = tpu.matmul %8, %10, %cst_11 {dimension_numbers = #tpu.dot_dimension_numbers<[1], [0], [0], [1], [0, 0, 1, 1], [], []>} : vector<32x128xbf16>, vector<128x128xbf16>, vector<32x128xf32> -> vector<32x128xf32>
    %12 = arith.addf %6, %11 : vector<32x128xf32>
    %c0_12 = arith.constant 0 : index
    %c2 = arith.constant 2 : index
    %c0_13 = arith.constant 0 : index
    %13 = vector.load %arg1[%c0_12, %c2, %c0_13] : memref<1x64x128xbf16, #tpu.memory_space<vmem>>, vector<1x32x128xbf16>
    %14 = vector.shape_cast %13 : vector<1x32x128xbf16> to vector<32x128xbf16>
    %c2_14 = arith.constant 2 : index
    %c0_15 = arith.constant 0 : index
    %c0_16 = arith.constant 0 : index
    %15 = vector.load %arg2[%c2_14, %c0_15, %c0_16] : memref<9x128x128xbf16, #tpu.memory_space<vmem>>, vector<1x128x128xbf16>
    %16 = vector.shape_cast %15 : vector<1x128x128xbf16> to vector<128x128xbf16>
    %cst_17 = arith.constant dense<0.000000e+00> : vector<32x128xf32>
    %17 = tpu.matmul %14, %16, %cst_17 {dimension_numbers = #tpu.dot_dimension_numbers<[1], [0], [0], [1], [0, 0, 1, 1], [], []>} : vector<32x128xbf16>, vector<128x128xbf16>, vector<32x128xf32> -> vector<32x128xf32>
    %18 = arith.addf %12, %17 : vector<32x128xf32>
    %c0_18 = arith.constant 0 : index
    %c8 = arith.constant 8 : index
    %c0_19 = arith.constant 0 : index
    %19 = vector.load %arg1[%c0_18, %c8, %c0_19] : memref<1x64x128xbf16, #tpu.memory_space<vmem>>, vector<1x32x128xbf16>
    %20 = vector.shape_cast %19 : vector<1x32x128xbf16> to vector<32x128xbf16>
    %c3 = arith.constant 3 : index
    %c0_20 = arith.constant 0 : index
    %c0_21 = arith.constant 0 : index
    %21 = vector.load %arg2[%c3, %c0_20, %c0_21] : memref<9x128x128xbf16, #tpu.memory_space<vmem>>, vector<1x128x128xbf16>
    %22 = vector.shape_cast %21 : vector<1x128x128xbf16> to vector<128x128xbf16>
    %cst_22 = arith.constant dense<0.000000e+00> : vector<32x128xf32>
    %23 = tpu.matmul %20, %22, %cst_22 {dimension_numbers = #tpu.dot_dimension_numbers<[1], [0], [0], [1], [0, 0, 1, 1], [], []>} : vector<32x128xbf16>, vector<128x128xbf16>, vector<32x128xf32> -> vector<32x128xf32>
    %24 = arith.addf %18, %23 : vector<32x128xf32>
    %c0_23 = arith.constant 0 : index
    %c9 = arith.constant 9 : index
    %c0_24 = arith.constant 0 : index
    %25 = vector.load %arg1[%c0_23, %c9, %c0_24] : memref<1x64x128xbf16, #tpu.memory_space<vmem>>, vector<1x32x128xbf16>
    %26 = vector.shape_cast %25 : vector<1x32x128xbf16> to vector<32x128xbf16>
    %c4 = arith.constant 4 : index
    %c0_25 = arith.constant 0 : index
    %c0_26 = arith.constant 0 : index
    %27 = vector.load %arg2[%c4, %c0_25, %c0_26] : memref<9x128x128xbf16, #tpu.memory_space<vmem>>, vector<1x128x128xbf16>
    %28 = vector.shape_cast %27 : vector<1x128x128xbf16> to vector<128x128xbf16>
    %cst_27 = arith.constant dense<0.000000e+00> : vector<32x128xf32>
    %29 = tpu.matmul %26, %28, %cst_27 {dimension_numbers = #tpu.dot_dimension_numbers<[1], [0], [0], [1], [0, 0, 1, 1], [], []>} : vector<32x128xbf16>, vector<128x128xbf16>, vector<32x128xf32> -> vector<32x128xf32>
    %30 = arith.addf %24, %29 : vector<32x128xf32>
    %c0_28 = arith.constant 0 : index
    %c10 = arith.constant 10 : index
    %c0_29 = arith.constant 0 : index
    %31 = vector.load %arg1[%c0_28, %c10, %c0_29] : memref<1x64x128xbf16, #tpu.memory_space<vmem>>, vector<1x32x128xbf16>
    %32 = vector.shape_cast %31 : vector<1x32x128xbf16> to vector<32x128xbf16>
    %c5 = arith.constant 5 : index
    %c0_30 = arith.constant 0 : index
    %c0_31 = arith.constant 0 : index
    %33 = vector.load %arg2[%c5, %c0_30, %c0_31] : memref<9x128x128xbf16, #tpu.memory_space<vmem>>, vector<1x128x128xbf16>
    %34 = vector.shape_cast %33 : vector<1x128x128xbf16> to vector<128x128xbf16>
    %cst_32 = arith.constant dense<0.000000e+00> : vector<32x128xf32>
    %35 = tpu.matmul %32, %34, %cst_32 {dimension_numbers = #tpu.dot_dimension_numbers<[1], [0], [0], [1], [0, 0, 1, 1], [], []>} : vector<32x128xbf16>, vector<128x128xbf16>, vector<32x128xf32> -> vector<32x128xf32>
    %36 = arith.addf %30, %35 : vector<32x128xf32>
    %c0_33 = arith.constant 0 : index
    %c16 = arith.constant 16 : index
    %c0_34 = arith.constant 0 : index
    %37 = vector.load %arg1[%c0_33, %c16, %c0_34] : memref<1x64x128xbf16, #tpu.memory_space<vmem>>, vector<1x32x128xbf16>
    %38 = vector.shape_cast %37 : vector<1x32x128xbf16> to vector<32x128xbf16>
    %c6 = arith.constant 6 : index
    %c0_35 = arith.constant 0 : index
    %c0_36 = arith.constant 0 : index
    %39 = vector.load %arg2[%c6, %c0_35, %c0_36] : memref<9x128x128xbf16, #tpu.memory_space<vmem>>, vector<1x128x128xbf16>
    %40 = vector.shape_cast %39 : vector<1x128x128xbf16> to vector<128x128xbf16>
    %cst_37 = arith.constant dense<0.000000e+00> : vector<32x128xf32>
    %41 = tpu.matmul %38, %40, %cst_37 {dimension_numbers = #tpu.dot_dimension_numbers<[1], [0], [0], [1], [0, 0, 1, 1], [], []>} : vector<32x128xbf16>, vector<128x128xbf16>, vector<32x128xf32> -> vector<32x128xf32>
    %42 = arith.addf %36, %41 : vector<32x128xf32>
    %c0_38 = arith.constant 0 : index
    %c17 = arith.constant 17 : index
    %c0_39 = arith.constant 0 : index
    %43 = vector.load %arg1[%c0_38, %c17, %c0_39] : memref<1x64x128xbf16, #tpu.memory_space<vmem>>, vector<1x32x128xbf16>
    %44 = vector.shape_cast %43 : vector<1x32x128xbf16> to vector<32x128xbf16>
    %c7 = arith.constant 7 : index
    %c0_40 = arith.constant 0 : index
    %c0_41 = arith.constant 0 : index
    %45 = vector.load %arg2[%c7, %c0_40, %c0_41] : memref<9x128x128xbf16, #tpu.memory_space<vmem>>, vector<1x128x128xbf16>
    %46 = vector.shape_cast %45 : vector<1x128x128xbf16> to vector<128x128xbf16>
    %cst_42 = arith.constant dense<0.000000e+00> : vector<32x128xf32>
    %47 = tpu.matmul %44, %46, %cst_42 {dimension_numbers = #tpu.dot_dimension_numbers<[1], [0], [0], [1], [0, 0, 1, 1], [], []>} : vector<32x128xbf16>, vector<128x128xbf16>, vector<32x128xf32> -> vector<32x128xf32>
    %48 = arith.addf %42, %47 : vector<32x128xf32>
    %c0_43 = arith.constant 0 : index
    %c18 = arith.constant 18 : index
    %c0_44 = arith.constant 0 : index
    %49 = vector.load %arg1[%c0_43, %c18, %c0_44] : memref<1x64x128xbf16, #tpu.memory_space<vmem>>, vector<1x32x128xbf16>
    %50 = vector.shape_cast %49 : vector<1x32x128xbf16> to vector<32x128xbf16>
    %c8_45 = arith.constant 8 : index
    %c0_46 = arith.constant 0 : index
    %c0_47 = arith.constant 0 : index
    %51 = vector.load %arg2[%c8_45, %c0_46, %c0_47] : memref<9x128x128xbf16, #tpu.memory_space<vmem>>, vector<1x128x128xbf16>
    %52 = vector.shape_cast %51 : vector<1x128x128xbf16> to vector<128x128xbf16>
    %cst_48 = arith.constant dense<0.000000e+00> : vector<32x128xf32>
    %53 = tpu.matmul %50, %52, %cst_48 {dimension_numbers = #tpu.dot_dimension_numbers<[1], [0], [0], [1], [0, 0, 1, 1], [], []>} : vector<32x128xbf16>, vector<128x128xbf16>, vector<32x128xf32> -> vector<32x128xf32>
    %54 = arith.addf %48, %53 : vector<32x128xf32>
    %c0_49 = arith.constant 0 : index
    %c0_50 = arith.constant 0 : index
    %55 = vector.load %arg3[%c0_49, %c0_50] : memref<1x128xf32, #tpu.memory_space<vmem>>, vector<1x128xf32>
    %56 = vector.broadcast %55 : vector<1x128xf32> to vector<32x128xf32>
    %57 = arith.addf %54, %56 : vector<32x128xf32>
    %58 = arith.truncf %57 : vector<32x128xf32> to vector<32x128xbf16>
    %c0_51 = arith.constant 0 : index
    %c0_52 = arith.constant 0 : index
    %c0_53 = arith.constant 0 : index
    %59 = vector.load %arg4[%c0_51, %c0_52, %c0_53] : memref<1x32x128xbf16, #tpu.memory_space<vmem>>, vector<1x32x128xbf16>
    %60 = vector.shape_cast %59 : vector<1x32x128xbf16> to vector<32x128xbf16>
    %61 = vector.shape_cast %58 : vector<32x128xbf16> to vector<1x32x128xbf16>
    tpu.vector_store %arg4[%c0_51, %c0_52, %c0_53], %61 {strides = array<i32>} : memref<1x32x128xbf16, #tpu.memory_space<vmem>>, vector<1x32x128xbf16>,
    return
  }
  func.func @transform_0(%arg0: i32) -> (i32, i32, i32) {
    %c0_i32 = arith.constant 0 : i32
    %c0_i32_0 = arith.constant 0 : i32
    %c0_i32_1 = arith.constant 0 : i32
    return %arg0, %c0_i32, %c0_i32_0 : i32, i32, i32
  }
  func.func @transform_1(%arg0: i32) -> (i32, i32, i32) {
    %c0_i32 = arith.constant 0 : i32
    %c0_i32_0 = arith.constant 0 : i32
    %c0_i32_1 = arith.constant 0 : i32
    %c0_i32_2 = arith.constant 0 : i32
    return %c0_i32, %c0_i32_0, %c0_i32_1 : i32, i32, i32
  }
  func.func @transform_2(%arg0: i32) -> (i32, i32) {
    %c0_i32 = arith.constant 0 : i32
    %c0_i32_0 = arith.constant 0 : i32
    %c0_i32_1 = arith.constant 0 : i32
    return %c0_i32, %c0_i32_0 : i32, i32
  }
  func.func @transform_3(%arg0: i32) -> (i32, i32, i32) {
    %c0_i32 = arith.constant 0 : i32
    %c0_i32_0 = arith.constant 0 : i32
    %c0_i32_1 = arith.constant 0 : i32
    return %arg0, %c0_i32, %c0_i32_0 : i32, i32, i32
  }
}

module attributes {stable_mosaic.version = 11 : i64} {
  func.func @_conv_kernel(%arg0: i32, %arg1: memref<1x64x128xbf16, #tpu.memory_space<vmem>>, %arg2: memref<9x128x128xbf16, #tpu.memory_space<vmem>>, %arg3: memref<1x128xf32, #tpu.memory_space<vmem>>, %arg4: memref<1x32x128xbf16, #tpu.memory_space<vmem>>) attributes {dimension_semantics = [#tpu.dimension_semantics<parallel>], iteration_bounds = array<i64: 2>, scalar_prefetch = 0 : i64, scratch_operands = 0 : i64, tpu.core_type = #tpu.core_type<tc>, window_params = [{transform_indices = @transform_0, window_bounds = array<i64: 1, 64, 128>}, {pipeline_mode = #tpu.pipeline_mode<synchronous>, transform_indices = @transform_1, window_bounds = array<i64: 9, 128, 128>}, {pipeline_mode = #tpu.pipeline_mode<synchronous>, transform_indices = @transform_2, window_bounds = array<i64: 1, 128>}, {transform_indices = @transform_3, window_bounds = array<i64: 1, 32, 128>}]} {
    %cst = arith.constant 0.000000e+00 : f32
    %0 = vector.broadcast %cst : f32 to vector<32x128xf32>
    %c0 = arith.constant 0 : index
    %c0_0 = arith.constant 0 : index
    %c0_1 = arith.constant 0 : index
    %1 = vector.load %arg1[%c0, %c0_0, %c0_1] : memref<1x64x128xbf16, #tpu.memory_space<vmem>>, vector<1x32x128xbf16>
    %2 = vector.shape_cast %1 : vector<1x32x128xbf16> to vector<32x128xbf16>
    %c0_2 = arith.constant 0 : index
    %c0_3 = arith.constant 0 : index
    %c0_4 = arith.constant 0 : index
    %3 = vector.load %arg2[%c0_2, %c0_3, %c0_4] : memref<9x128x128xbf16, #tpu.memory_space<vmem>>, vector<1x128x128xbf16>
    %4 = vector.shape_cast %3 : vector<1x128x128xbf16> to vector<128x128xbf16>
    %cst_5 = arith.constant dense<0.000000e+00> : vector<32x128xf32>
    %5 = tpu.matmul %2, %4, %cst_5 {dimension_numbers = #tpu.dot_dimension_numbers<[1], [0], [0], [1], [0, 0, 1, 1], [], []>} : vector<32x128xbf16>, vector<128x128xbf16>, vector<32x128xf32> -> vector<32x128xf32>
    %6 = arith.addf %0, %5 : vector<32x128xf32>
    %c0_6 = arith.constant 0 : index
    %c1 = arith.constant 1 : index
    %c0_7 = arith.constant 0 : index
    %7 = vector.load %arg1[%c0_6, %c1, %c0_7] : memref<1x64x128xbf16, #tpu.memory_space<vmem>>, vector<1x32x128xbf16>
    %8 = vector.shape_cast %7 : vector<1x32x128xbf16> to vector<32x128xbf16>
    %c1_8 = arith.constant 1 : index
    %c0_9 = arith.constant 0 : index
    %c0_10 = arith.constant 0 : index
    %9 = vector.load %arg2[%c1_8, %c0_9, %c0_10] : memref<9x128x128xbf16, #tpu.memory_space<vmem>>, vector<1x128x128xbf16>
    %10 = vector.shape_cast %9 : vector<1x128x128xbf16> to vector<128x128xbf16>
    %cst_11 = arith.constant dense<0.000000e+00> : vector<32x128xf32>
    %11 = tpu.matmul %8, %10, %cst_11 {dimension_numbers = #tpu.dot_dimension_numbers<[1], [0], [0], [1], [0, 0, 1, 1], [], []>} : vector<32x128xbf16>, vector<128x128xbf16>, vector<32x128xf32> -> vector<32x128xf32>
    %12 = arith.addf %6, %11 : vector<32x128xf32>
    %c0_12 = arith.constant 0 : index
    %c2 = arith.constant 2 : index
    %c0_13 = arith.constant 0 : index
    %13 = vector.load %arg1[%c0_12, %c2, %c0_13] : memref<1x64x128xbf16, #tpu.memory_space<vmem>>, vector<1x32x128xbf16>
    %14 = vector.shape_cast %13 : vector<1x32x128xbf16> to vector<32x128xbf16>
    %c2_14 = arith.constant 2 : index
    %c0_15 = arith.constant 0 : index
    %c0_16 = arith.constant 0 : index
    %15 = vector.load %arg2[%c2_14, %c0_15, %c0_16] : memref<9x128x128xbf16, #tpu.memory_space<vmem>>, vector<1x128x128xbf16>
    %16 = vector.shape_cast %15 : vector<1x128x128xbf16> to vector<128x128xbf16>
    %cst_17 = arith.constant dense<0.000000e+00> : vector<32x128xf32>
    %17 = tpu.matmul %14, %16, %cst_17 {dimension_numbers = #tpu.dot_dimension_numbers<[1], [0], [0], [1], [0, 0, 1, 1], [], []>} : vector<32x128xbf16>, vector<128x128xbf16>, vector<32x128xf32> -> vector<32x128xf32>
    %18 = arith.addf %12, %17 : vector<32x128xf32>
    %c0_18 = arith.constant 0 : index
    %c8 = arith.constant 8 : index
    %c0_19 = arith.constant 0 : index
    %19 = vector.load %arg1[%c0_18, %c8, %c0_19] : memref<1x64x128xbf16, #tpu.memory_space<vmem>>, vector<1x32x128xbf16>
    %20 = vector.shape_cast %19 : vector<1x32x128xbf16> to vector<32x128xbf16>
    %c3 = arith.constant 3 : index
    %c0_20 = arith.constant 0 : index
    %c0_21 = arith.constant 0 : index
    %21 = vector.load %arg2[%c3, %c0_20, %c0_21] : memref<9x128x128xbf16, #tpu.memory_space<vmem>>, vector<1x128x128xbf16>
    %22 = vector.shape_cast %21 : vector<1x128x128xbf16> to vector<128x128xbf16>
    %cst_22 = arith.constant dense<0.000000e+00> : vector<32x128xf32>
    %23 = tpu.matmul %20, %22, %cst_22 {dimension_numbers = #tpu.dot_dimension_numbers<[1], [0], [0], [1], [0, 0, 1, 1], [], []>} : vector<32x128xbf16>, vector<128x128xbf16>, vector<32x128xf32> -> vector<32x128xf32>
    %24 = arith.addf %18, %23 : vector<32x128xf32>
    %c0_23 = arith.constant 0 : index
    %c9 = arith.constant 9 : index
    %c0_24 = arith.constant 0 : index
    %25 = vector.load %arg1[%c0_23, %c9, %c0_24] : memref<1x64x128xbf16, #tpu.memory_space<vmem>>, vector<1x32x128xbf16>
    %26 = vector.shape_cast %25 : vector<1x32x128xbf16> to vector<32x128xbf16>
    %c4 = arith.constant 4 : index
    %c0_25 = arith.constant 0 : index
    %c0_26 = arith.constant 0 : index
    %27 = vector.load %arg2[%c4, %c0_25, %c0_26] : memref<9x128x128xbf16, #tpu.memory_space<vmem>>, vector<1x128x128xbf16>
    %28 = vector.shape_cast %27 : vector<1x128x128xbf16> to vector<128x128xbf16>
    %cst_27 = arith.constant dense<0.000000e+00> : vector<32x128xf32>
    %29 = tpu.matmul %26, %28, %cst_27 {dimension_numbers = #tpu.dot_dimension_numbers<[1], [0], [0], [1], [0, 0, 1, 1], [], []>} : vector<32x128xbf16>, vector<128x128xbf16>, vector<32x128xf32> -> vector<32x128xf32>
    %30 = arith.addf %24, %29 : vector<32x128xf32>
    %c0_28 = arith.constant 0 : index
    %c10 = arith.constant 10 : index
    %c0_29 = arith.constant 0 : index
    %31 = vector.load %arg1[%c0_28, %c10, %c0_29] : memref<1x64x128xbf16, #tpu.memory_space<vmem>>, vector<1x32x128xbf16>
    %32 = vector.shape_cast %31 : vector<1x32x128xbf16> to vector<32x128xbf16>
    %c5 = arith.constant 5 : index
    %c0_30 = arith.constant 0 : index
    %c0_31 = arith.constant 0 : index
    %33 = vector.load %arg2[%c5, %c0_30, %c0_31] : memref<9x128x128xbf16, #tpu.memory_space<vmem>>, vector<1x128x128xbf16>
    %34 = vector.shape_cast %33 : vector<1x128x128xbf16> to vector<128x128xbf16>
    %cst_32 = arith.constant dense<0.000000e+00> : vector<32x128xf32>
    %35 = tpu.matmul %32, %34, %cst_32 {dimension_numbers = #tpu.dot_dimension_numbers<[1], [0], [0], [1], [0, 0, 1, 1], [], []>} : vector<32x128xbf16>, vector<128x128xbf16>, vector<32x128xf32> -> vector<32x128xf32>
    %36 = arith.addf %30, %35 : vector<32x128xf32>
    %c0_33 = arith.constant 0 : index
    %c16 = arith.constant 16 : index
    %c0_34 = arith.constant 0 : index
    %37 = vector.load %arg1[%c0_33, %c16, %c0_34] : memref<1x64x128xbf16, #tpu.memory_space<vmem>>, vector<1x32x128xbf16>
    %38 = vector.shape_cast %37 : vector<1x32x128xbf16> to vector<32x128xbf16>
    %c6 = arith.constant 6 : index
    %c0_35 = arith.constant 0 : index
    %c0_36 = arith.constant 0 : index
    %39 = vector.load %arg2[%c6, %c0_35, %c0_36] : memref<9x128x128xbf16, #tpu.memory_space<vmem>>, vector<1x128x128xbf16>
    %40 = vector.shape_cast %39 : vector<1x128x128xbf16> to vector<128x128xbf16>
    %cst_37 = arith.constant dense<0.000000e+00> : vector<32x128xf32>
    %41 = tpu.matmul %38, %40, %cst_37 {dimension_numbers = #tpu.dot_dimension_numbers<[1], [0], [0], [1], [0, 0, 1, 1], [], []>} : vector<32x128xbf16>, vector<128x128xbf16>, vector<32x128xf32> -> vector<32x128xf32>
    %42 = arith.addf %36, %41 : vector<32x128xf32>
    %c0_38 = arith.constant 0 : index
    %c17 = arith.constant 17 : index
    %c0_39 = arith.constant 0 : index
    %43 = vector.load %arg1[%c0_38, %c17, %c0_39] : memref<1x64x128xbf16, #tpu.memory_space<vmem>>, vector<1x32x128xbf16>
    %44 = vector.shape_cast %43 : vector<1x32x128xbf16> to vector<32x128xbf16>
    %c7 = arith.constant 7 : index
    %c0_40 = arith.constant 0 : index
    %c0_41 = arith.constant 0 : index
    %45 = vector.load %arg2[%c7, %c0_40, %c0_41] : memref<9x128x128xbf16, #tpu.memory_space<vmem>>, vector<1x128x128xbf16>
    %46 = vector.shape_cast %45 : vector<1x128x128xbf16> to vector<128x128xbf16>
    %cst_42 = arith.constant dense<0.000000e+00> : vector<32x128xf32>
    %47 = tpu.matmul %44, %46, %cst_42 {dimension_numbers = #tpu.dot_dimension_numbers<[1], [0], [0], [1], [0, 0, 1, 1], [], []>} : vector<32x128xbf16>, vector<128x128xbf16>, vector<32x128xf32> -> vector<32x128xf32>
    %48 = arith.addf %42, %47 : vector<32x128xf32>
    %c0_43 = arith.constant 0 : index
    %c18 = arith.constant 18 : index
    %c0_44 = arith.constant 0 : index
    %49 = vector.load %arg1[%c0_43, %c18, %c0_44] : memref<1x64x128xbf16, #tpu.memory_space<vmem>>, vector<1x32x128xbf16>
    %50 = vector.shape_cast %49 : vector<1x32x128xbf16> to vector<32x128xbf16>
    %c8_45 = arith.constant 8 : index
    %c0_46 = arith.constant 0 : index
    %c0_47 = arith.constant 0 : index
    %51 = vector.load %arg2[%c8_45, %c0_46, %c0_47] : memref<9x128x128xbf16, #tpu.memory_space<vmem>>, vector<1x128x128xbf16>
    %52 = vector.shape_cast %51 : vector<1x128x128xbf16> to vector<128x128xbf16>
    %cst_48 = arith.constant dense<0.000000e+00> : vector<32x128xf32>
    %53 = tpu.matmul %50, %52, %cst_48 {dimension_numbers = #tpu.dot_dimension_numbers<[1], [0], [0], [1], [0, 0, 1, 1], [], []>} : vector<32x128xbf16>, vector<128x128xbf16>, vector<32x128xf32> -> vector<32x128xf32>
    %54 = arith.addf %48, %53 : vector<32x128xf32>
    %c0_49 = arith.constant 0 : index
    %c0_50 = arith.constant 0 : index
    %55 = vector.load %arg3[%c0_49, %c0_50] : memref<1x128xf32, #tpu.memory_space<vmem>>, vector<1x128xf32>
    %56 = vector.broadcast %55 : vector<1x128xf32> to vector<32x128xf32>
    %57 = arith.addf %54, %56 : vector<32x128xf32>
    %58 = arith.negf %57 : vector<32x128xf32>
    %59 = math.exp %58 : vector<32x128xf32>
    %cst_51 = arith.constant 1.000000e+00 : f32
    %60 = vector.broadcast %cst_51 : f32 to vector<32x128xf32>
    %61 = arith.addf %60, %59 : vector<32x128xf32>
    %62 = arith.divf %60, %61 : vector<32x128xf32>
    %63 = arith.mulf %57, %62 : vector<32x128xf32>
    %64 = arith.truncf %63 : vector<32x128xf32> to vector<32x128xbf16>
    %c0_52 = arith.constant 0 : index
    %c0_53 = arith.constant 0 : index
    %c0_54 = arith.constant 0 : index
    %65 = vector.load %arg4[%c0_52, %c0_53, %c0_54] : memref<1x32x128xbf16, #tpu.memory_space<vmem>>, vector<1x32x128xbf16>
    %66 = vector.shape_cast %65 : vector<1x32x128xbf16> to vector<32x128xbf16>
    %67 = vector.shape_cast %64 : vector<32x128xbf16> to vector<1x32x128xbf16>
    tpu.vector_store %arg4[%c0_52, %c0_53, %c0_54], %67 {strides = array<i32>} : memref<1x32x128xbf16, #tpu.memory_space<vmem>>, vector<1x32x128xbf16>,
    return
  }
  func.func @transform_0(%arg0: i32) -> (i32, i32, i32) {
    %c0_i32 = arith.constant 0 : i32
    %c0_i32_0 = arith.constant 0 : i32
    %c0_i32_1 = arith.constant 0 : i32
    return %arg0, %c0_i32, %c0_i32_0 : i32, i32, i32
  }
  func.func @transform_1(%arg0: i32) -> (i32, i32, i32) {
    %c0_i32 = arith.constant 0 : i32
    %c0_i32_0 = arith.constant 0 : i32
    %c0_i32_1 = arith.constant 0 : i32
    %c0_i32_2 = arith.constant 0 : i32
    return %c0_i32, %c0_i32_0, %c0_i32_1 : i32, i32, i32
  }
  func.func @transform_2(%arg0: i32) -> (i32, i32) {
    %c0_i32 = arith.constant 0 : i32
    %c0_i32_0 = arith.constant 0 : i32
    %c0_i32_1 = arith.constant 0 : i32
    return %c0_i32, %c0_i32_0 : i32, i32
  }
  func.func @transform_3(%arg0: i32) -> (i32, i32, i32) {
    %c0_i32 = arith.constant 0 : i32
    %c0_i32_0 = arith.constant 0 : i32
    %c0_i32_1 = arith.constant 0 : i32
    return %arg0, %c0_i32, %c0_i32_0 : i32, i32, i32
  }
}

module attributes {stable_mosaic.version = 11 : i64} {
  func.func @_conv_kernel(%arg0: i32, %arg1: memref<1x176x128xbf16, #tpu.memory_space<vmem>>, %arg2: memref<9x128x128xbf16, #tpu.memory_space<vmem>>, %arg3: memref<1x128xf32, #tpu.memory_space<vmem>>, %arg4: memref<1x128x128xbf16, #tpu.memory_space<vmem>>) attributes {dimension_semantics = [#tpu.dimension_semantics<parallel>], iteration_bounds = array<i64: 2>, scalar_prefetch = 0 : i64, scratch_operands = 0 : i64, tpu.core_type = #tpu.core_type<tc>, window_params = [{transform_indices = @transform_0, window_bounds = array<i64: 1, 176, 128>}, {pipeline_mode = #tpu.pipeline_mode<synchronous>, transform_indices = @transform_1, window_bounds = array<i64: 9, 128, 128>}, {pipeline_mode = #tpu.pipeline_mode<synchronous>, transform_indices = @transform_2, window_bounds = array<i64: 1, 128>}, {transform_indices = @transform_3, window_bounds = array<i64: 1, 128, 128>}]} {
    %cst = arith.constant 0.000000e+00 : f32
    %0 = vector.broadcast %cst : f32 to vector<128x128xf32>
    %c0 = arith.constant 0 : index
    %c0_0 = arith.constant 0 : index
    %c0_1 = arith.constant 0 : index
    %1 = vector.load %arg1[%c0, %c0_0, %c0_1] : memref<1x176x128xbf16, #tpu.memory_space<vmem>>, vector<1x128x128xbf16>
    %2 = vector.shape_cast %1 : vector<1x128x128xbf16> to vector<128x128xbf16>
    %c0_2 = arith.constant 0 : index
    %c0_3 = arith.constant 0 : index
    %c0_4 = arith.constant 0 : index
    %3 = vector.load %arg2[%c0_2, %c0_3, %c0_4] : memref<9x128x128xbf16, #tpu.memory_space<vmem>>, vector<1x128x128xbf16>
    %4 = vector.shape_cast %3 : vector<1x128x128xbf16> to vector<128x128xbf16>
    %cst_5 = arith.constant dense<0.000000e+00> : vector<128x128xf32>
    %5 = tpu.matmul %2, %4, %cst_5 {dimension_numbers = #tpu.dot_dimension_numbers<[1], [0], [0], [1], [0, 0, 1, 1], [], []>} : vector<128x128xbf16>, vector<128x128xbf16>, vector<128x128xf32> -> vector<128x128xf32>
    %6 = arith.addf %0, %5 : vector<128x128xf32>
    %c0_6 = arith.constant 0 : index
    %c1 = arith.constant 1 : index
    %c0_7 = arith.constant 0 : index
    %7 = vector.load %arg1[%c0_6, %c1, %c0_7] : memref<1x176x128xbf16, #tpu.memory_space<vmem>>, vector<1x128x128xbf16>
    %8 = vector.shape_cast %7 : vector<1x128x128xbf16> to vector<128x128xbf16>
    %c1_8 = arith.constant 1 : index
    %c0_9 = arith.constant 0 : index
    %c0_10 = arith.constant 0 : index
    %9 = vector.load %arg2[%c1_8, %c0_9, %c0_10] : memref<9x128x128xbf16, #tpu.memory_space<vmem>>, vector<1x128x128xbf16>
    %10 = vector.shape_cast %9 : vector<1x128x128xbf16> to vector<128x128xbf16>
    %cst_11 = arith.constant dense<0.000000e+00> : vector<128x128xf32>
    %11 = tpu.matmul %8, %10, %cst_11 {dimension_numbers = #tpu.dot_dimension_numbers<[1], [0], [0], [1], [0, 0, 1, 1], [], []>} : vector<128x128xbf16>, vector<128x128xbf16>, vector<128x128xf32> -> vector<128x128xf32>
    %12 = arith.addf %6, %11 : vector<128x128xf32>
    %c0_12 = arith.constant 0 : index
    %c2 = arith.constant 2 : index
    %c0_13 = arith.constant 0 : index
    %13 = vector.load %arg1[%c0_12, %c2, %c0_13] : memref<1x176x128xbf16, #tpu.memory_space<vmem>>, vector<1x128x128xbf16>
    %14 = vector.shape_cast %13 : vector<1x128x128xbf16> to vector<128x128xbf16>
    %c2_14 = arith.constant 2 : index
    %c0_15 = arith.constant 0 : index
    %c0_16 = arith.constant 0 : index
    %15 = vector.load %arg2[%c2_14, %c0_15, %c0_16] : memref<9x128x128xbf16, #tpu.memory_space<vmem>>, vector<1x128x128xbf16>
    %16 = vector.shape_cast %15 : vector<1x128x128xbf16> to vector<128x128xbf16>
    %cst_17 = arith.constant dense<0.000000e+00> : vector<128x128xf32>
    %17 = tpu.matmul %14, %16, %cst_17 {dimension_numbers = #tpu.dot_dimension_numbers<[1], [0], [0], [1], [0, 0, 1, 1], [], []>} : vector<128x128xbf16>, vector<128x128xbf16>, vector<128x128xf32> -> vector<128x128xf32>
    %18 = arith.addf %12, %17 : vector<128x128xf32>
    %c0_18 = arith.constant 0 : index
    %c16 = arith.constant 16 : index
    %c0_19 = arith.constant 0 : index
    %19 = vector.load %arg1[%c0_18, %c16, %c0_19] : memref<1x176x128xbf16, #tpu.memory_space<vmem>>, vector<1x128x128xbf16>
    %20 = vector.shape_cast %19 : vector<1x128x128xbf16> to vector<128x128xbf16>
    %c3 = arith.constant 3 : index
    %c0_20 = arith.constant 0 : index
    %c0_21 = arith.constant 0 : index
    %21 = vector.load %arg2[%c3, %c0_20, %c0_21] : memref<9x128x128xbf16, #tpu.memory_space<vmem>>, vector<1x128x128xbf16>
    %22 = vector.shape_cast %21 : vector<1x128x128xbf16> to vector<128x128xbf16>
    %cst_22 = arith.constant dense<0.000000e+00> : vector<128x128xf32>
    %23 = tpu.matmul %20, %22, %cst_22 {dimension_numbers = #tpu.dot_dimension_numbers<[1], [0], [0], [1], [0, 0, 1, 1], [], []>} : vector<128x128xbf16>, vector<128x128xbf16>, vector<128x128xf32> -> vector<128x128xf32>
    %24 = arith.addf %18, %23 : vector<128x128xf32>
    %c0_23 = arith.constant 0 : index
    %c17 = arith.constant 17 : index
    %c0_24 = arith.constant 0 : index
    %25 = vector.load %arg1[%c0_23, %c17, %c0_24] : memref<1x176x128xbf16, #tpu.memory_space<vmem>>, vector<1x128x128xbf16>
    %26 = vector.shape_cast %25 : vector<1x128x128xbf16> to vector<128x128xbf16>
    %c4 = arith.constant 4 : index
    %c0_25 = arith.constant 0 : index
    %c0_26 = arith.constant 0 : index
    %27 = vector.load %arg2[%c4, %c0_25, %c0_26] : memref<9x128x128xbf16, #tpu.memory_space<vmem>>, vector<1x128x128xbf16>
    %28 = vector.shape_cast %27 : vector<1x128x128xbf16> to vector<128x128xbf16>
    %cst_27 = arith.constant dense<0.000000e+00> : vector<128x128xf32>
    %29 = tpu.matmul %26, %28, %cst_27 {dimension_numbers = #tpu.dot_dimension_numbers<[1], [0], [0], [1], [0, 0, 1, 1], [], []>} : vector<128x128xbf16>, vector<128x128xbf16>, vector<128x128xf32> -> vector<128x128xf32>
    %30 = arith.addf %24, %29 : vector<128x128xf32>
    %c0_28 = arith.constant 0 : index
    %c18 = arith.constant 18 : index
    %c0_29 = arith.constant 0 : index
    %31 = vector.load %arg1[%c0_28, %c18, %c0_29] : memref<1x176x128xbf16, #tpu.memory_space<vmem>>, vector<1x128x128xbf16>
    %32 = vector.shape_cast %31 : vector<1x128x128xbf16> to vector<128x128xbf16>
    %c5 = arith.constant 5 : index
    %c0_30 = arith.constant 0 : index
    %c0_31 = arith.constant 0 : index
    %33 = vector.load %arg2[%c5, %c0_30, %c0_31] : memref<9x128x128xbf16, #tpu.memory_space<vmem>>, vector<1x128x128xbf16>
    %34 = vector.shape_cast %33 : vector<1x128x128xbf16> to vector<128x128xbf16>
    %cst_32 = arith.constant dense<0.000000e+00> : vector<128x128xf32>
    %35 = tpu.matmul %32, %34, %cst_32 {dimension_numbers = #tpu.dot_dimension_numbers<[1], [0], [0], [1], [0, 0, 1, 1], [], []>} : vector<128x128xbf16>, vector<128x128xbf16>, vector<128x128xf32> -> vector<128x128xf32>
    %36 = arith.addf %30, %35 : vector<128x128xf32>
    %c0_33 = arith.constant 0 : index
    %c32 = arith.constant 32 : index
    %c0_34 = arith.constant 0 : index
    %37 = vector.load %arg1[%c0_33, %c32, %c0_34] : memref<1x176x128xbf16, #tpu.memory_space<vmem>>, vector<1x128x128xbf16>
    %38 = vector.shape_cast %37 : vector<1x128x128xbf16> to vector<128x128xbf16>
    %c6 = arith.constant 6 : index
    %c0_35 = arith.constant 0 : index
    %c0_36 = arith.constant 0 : index
    %39 = vector.load %arg2[%c6, %c0_35, %c0_36] : memref<9x128x128xbf16, #tpu.memory_space<vmem>>, vector<1x128x128xbf16>
    %40 = vector.shape_cast %39 : vector<1x128x128xbf16> to vector<128x128xbf16>
    %cst_37 = arith.constant dense<0.000000e+00> : vector<128x128xf32>
    %41 = tpu.matmul %38, %40, %cst_37 {dimension_numbers = #tpu.dot_dimension_numbers<[1], [0], [0], [1], [0, 0, 1, 1], [], []>} : vector<128x128xbf16>, vector<128x128xbf16>, vector<128x128xf32> -> vector<128x128xf32>
    %42 = arith.addf %36, %41 : vector<128x128xf32>
    %c0_38 = arith.constant 0 : index
    %c33 = arith.constant 33 : index
    %c0_39 = arith.constant 0 : index
    %43 = vector.load %arg1[%c0_38, %c33, %c0_39] : memref<1x176x128xbf16, #tpu.memory_space<vmem>>, vector<1x128x128xbf16>
    %44 = vector.shape_cast %43 : vector<1x128x128xbf16> to vector<128x128xbf16>
    %c7 = arith.constant 7 : index
    %c0_40 = arith.constant 0 : index
    %c0_41 = arith.constant 0 : index
    %45 = vector.load %arg2[%c7, %c0_40, %c0_41] : memref<9x128x128xbf16, #tpu.memory_space<vmem>>, vector<1x128x128xbf16>
    %46 = vector.shape_cast %45 : vector<1x128x128xbf16> to vector<128x128xbf16>
    %cst_42 = arith.constant dense<0.000000e+00> : vector<128x128xf32>
    %47 = tpu.matmul %44, %46, %cst_42 {dimension_numbers = #tpu.dot_dimension_numbers<[1], [0], [0], [1], [0, 0, 1, 1], [], []>} : vector<128x128xbf16>, vector<128x128xbf16>, vector<128x128xf32> -> vector<128x128xf32>
    %48 = arith.addf %42, %47 : vector<128x128xf32>
    %c0_43 = arith.constant 0 : index
    %c34 = arith.constant 34 : index
    %c0_44 = arith.constant 0 : index
    %49 = vector.load %arg1[%c0_43, %c34, %c0_44] : memref<1x176x128xbf16, #tpu.memory_space<vmem>>, vector<1x128x128xbf16>
    %50 = vector.shape_cast %49 : vector<1x128x128xbf16> to vector<128x128xbf16>
    %c8 = arith.constant 8 : index
    %c0_45 = arith.constant 0 : index
    %c0_46 = arith.constant 0 : index
    %51 = vector.load %arg2[%c8, %c0_45, %c0_46] : memref<9x128x128xbf16, #tpu.memory_space<vmem>>, vector<1x128x128xbf16>
    %52 = vector.shape_cast %51 : vector<1x128x128xbf16> to vector<128x128xbf16>
    %cst_47 = arith.constant dense<0.000000e+00> : vector<128x128xf32>
    %53 = tpu.matmul %50, %52, %cst_47 {dimension_numbers = #tpu.dot_dimension_numbers<[1], [0], [0], [1], [0, 0, 1, 1], [], []>} : vector<128x128xbf16>, vector<128x128xbf16>, vector<128x128xf32> -> vector<128x128xf32>
    %54 = arith.addf %48, %53 : vector<128x128xf32>
    %c0_48 = arith.constant 0 : index
    %c0_49 = arith.constant 0 : index
    %55 = vector.load %arg3[%c0_48, %c0_49] : memref<1x128xf32, #tpu.memory_space<vmem>>, vector<1x128xf32>
    %56 = vector.broadcast %55 : vector<1x128xf32> to vector<128x128xf32>
    %57 = arith.addf %54, %56 : vector<128x128xf32>
    %58 = arith.truncf %57 : vector<128x128xf32> to vector<128x128xbf16>
    %c0_50 = arith.constant 0 : index
    %c0_51 = arith.constant 0 : index
    %c0_52 = arith.constant 0 : index
    %59 = vector.load %arg4[%c0_50, %c0_51, %c0_52] : memref<1x128x128xbf16, #tpu.memory_space<vmem>>, vector<1x128x128xbf16>
    %60 = vector.shape_cast %59 : vector<1x128x128xbf16> to vector<128x128xbf16>
    %61 = vector.shape_cast %58 : vector<128x128xbf16> to vector<1x128x128xbf16>
    tpu.vector_store %arg4[%c0_50, %c0_51, %c0_52], %61 {strides = array<i32>} : memref<1x128x128xbf16, #tpu.memory_space<vmem>>, vector<1x128x128xbf16>,
    return
  }
  func.func @transform_0(%arg0: i32) -> (i32, i32, i32) {
    %c0_i32 = arith.constant 0 : i32
    %c0_i32_0 = arith.constant 0 : i32
    %c0_i32_1 = arith.constant 0 : i32
    return %arg0, %c0_i32, %c0_i32_0 : i32, i32, i32
  }
  func.func @transform_1(%arg0: i32) -> (i32, i32, i32) {
    %c0_i32 = arith.constant 0 : i32
    %c0_i32_0 = arith.constant 0 : i32
    %c0_i32_1 = arith.constant 0 : i32
    %c0_i32_2 = arith.constant 0 : i32
    return %c0_i32, %c0_i32_0, %c0_i32_1 : i32, i32, i32
  }
  func.func @transform_2(%arg0: i32) -> (i32, i32) {
    %c0_i32 = arith.constant 0 : i32
    %c0_i32_0 = arith.constant 0 : i32
    %c0_i32_1 = arith.constant 0 : i32
    return %c0_i32, %c0_i32_0 : i32, i32
  }
  func.func @transform_3(%arg0: i32) -> (i32, i32, i32) {
    %c0_i32 = arith.constant 0 : i32
    %c0_i32_0 = arith.constant 0 : i32
    %c0_i32_1 = arith.constant 0 : i32
    return %arg0, %c0_i32, %c0_i32_0 : i32, i32, i32
  }
}

</mosaic_0001>

<bundles_post_ra>
// kernel: vqgan_forward.7
= control target key start
LH: loop header
LB: loop body
LE: loop exit
PB: predicated region body
PF: predicated region fallthrough
CT: control target
= control target key end

     0   :  { %s2030_s12 = smov 0   ;;  %s2351_s0 = inlined_call_operand.vmem [shape: bf16[2,160,128], index: 0, kind: input, shape index: {}]   ;;  %s2352_s1 = inlined_call_operand.vmem [shape: bf16[4,128,128], index: 1, kind: input, shape index: {}]   ;;  %s2353_s2 = inlined_call_operand.vmem [shape: f32[1,128], index: 2, kind: input, shape index: {}]   ;;  %s2354_s3 = inlined_call_operand.vmem [shape: bf16[2,128,128], index: 3, kind: output, shape index: {}]  }
   0x1 LB: > { %s1466_s13 = sadd.s32 4294967295, %s2008_s12   ;;  %p1470_p0 = scmp.ge.s32.totalorder %s2008_s12, 1  ;;  %s2008_s12 = sphi %s2030_s12, %s13_s12  }
   0x2   : > { %p137_p1 = scmp.lt.s32.totalorder %s2008_s12, 3 }
   0x4   : > { %p138_p2 = pnand %p1470_p0, %p137_p1 }
   0x5   : > { %p161_p3 = scmp.lt.s32.totalorder (!%p138_p2), %s1466_s13, 1 }
   0x6   : > { %141 = sbr.rel (%p138_p2) target bundleno = 343 (0x157), region = 32 }
   0xb   : > { %v1880_v0 = vld [vmem:[%s2352_s1 + $0x78] sm:$0xff]   ;;  %v1882_v2 = vld [vmem:[%s2352_s1 + $0x70] sm:$0xff]   ;;  %v1884_v4 = vld [vmem:[%s2352_s1 + $0x68] sm:$0xff]   ;;  %s2356_s13 = smov (!%p161_p3, %s1466_s13), 1  ;;  %vm265_vm0 = vsmask.f32 7424 }
   0xc   : > { %v1881_v1 = vld [vmem:[%s2352_s1 + $0x38] sm:$0xff]   ;;  %1743 = vmatprep.subr.bf16.mxu0 %v1880_v0  ;;  %v1883_v3 = vld [vmem:[%s2352_s1 + $0x30] sm:$0xff]   ;;  %v1885_v5 = vld [vmem:[%s2352_s1 + $0x28] sm:$0xff]   ;;  %s1871_s30 = smul.u32 80, %s2356_s13  ;;  %s1615_s7 = sshll.u32 %s2356_s13, 6 }
   0xd   : > { %1775 = vmatprep.subr.bf16.mxu1 %v1881_v1  ;;  %1744 = vmatpush3.bf16.msra.mxu0 %v1880_v0  ;;  %v1886_v6 = vld [vmem:[%s2352_s1 + $0x60] sm:$0xff]   ;;  %v1888_v8 = vld [vmem:[%s2352_s1 + $0x58] sm:$0xff]   ;;  %v1890_v10 = vld [vmem:[%s2352_s1 + $0x50] sm:$0xff]   ;;  %s2324_s10 = scalar_lea.vmem %s2354_s3, %s1615_s7 }
   0xe   : > { %1776 = vmatpush3.bf16.msra.mxu1 %v1881_v1  ;;  %1745 = vmatprep.subr.bf16.mxu0 %v1882_v2  ;;  %v1887_v7 = vld [vmem:[%s2352_s1 + $0x20] sm:$0xff]   ;;  %v1889_v9 = vld [vmem:[%s2352_s1 + $0x18] sm:$0xff]   ;;  %s2077_s14 = scalar_lea.vmem %s2351_s0, %s1871_s30  ;;  %v1891_v11 = vld [vmem:[%s2352_s1 + $0x10] sm:$0xff]  }
   0xf   : > { %1777 = vmatprep.subr.bf16.mxu1 %v1883_v3  ;;  %v1896_v12 = vld [vmem:[%s2077_s14] sm:$0xff]   ;;  %v1897_v13 = vld [vmem:[%s2077_s14 + $0x8] sm:$0xff]   ;;  %v2085_v14 = vld [vmem:[%s2077_s14 + $0x10] sm:$0xff]  }
  0x10   : > { %v1892_v15 = vld [vmem:[%s2352_s1 + $0x48] sm:$0xff]   ;;  %v267_v16 = vshrl.u32 %v1896_v12, 16  ;;  %v269_v17 = vshll.u32 %v1896_v12, 16  ;;  %v274_v18 = vshll.u32 %v1897_v13, 16  ;;  %1791 = vmatprep.mubr.bf16.mxu1 %v1896_v12  ;;  %v1894_v22 = vld [vmem:[%s2352_s1 + $0x40] sm:$0xff]   ;;  %v278_v23 = vshrl.u32 %v1897_v13, 16 }
  0x11   : > { %1746 = vmatpush3.bf16.msra.mxu0 %v1882_v2  ;;  %v1893_v19 = vld [vmem:[%s2352_s1 + $0x8] sm:$0xff]   ;;  %v282_v24 = vshll.u32 %v2085_v14, 16  ;;  %v1903_v26 = vld [vmem:[%s2077_s14 + $0x18] sm:$0xff]   ;;  %v1895_v27 = vld [vmem:[%s2352_s1] sm:$0xff]   ;;  %v286_v29 = vshrl.u32 %v2085_v14, 16 }
  0x12   : > { %1778 = vmatpush3.bf16.msra.mxu1 %v1883_v3  ;;  %1747 = vmatprep.subr.bf16.mxu0 %v1884_v4  ;;  %v271_v20 = vrot.slane %v269_v17, 1  ;;  %v276_v21 = vrot.slane %v274_v18, 1  ;;  %v290_v30 = vshll.u32 %v1903_v26, 16  ;;  %v1904_v33 = vld [vmem:[%s2077_s14 + $0x20] sm:$0xff]   ;;  %v1899_v34 = vld [vmem:[%s2352_s1 + $0xb8] sm:$0xff]   ;;  %v1901_v36 = vld [vmem:[%s2352_s1 + $0xb0] sm:$0xff]  }
  0x13   : > { %1779 = vmatprep.subr.bf16.mxu1 %v1885_v5  ;;  %v284_v32 = vrot.slane %v282_v24, 1  ;;  %v1900_v35 = vld [vmem:[%s2352_s1 + $0xf8] sm:$0xff]   ;;  %v2114_v39 = vld [vmem:[%s2077_s14 + $0x28] sm:$0xff]   ;;  %v294_v41 = vshrl.u32 %v1903_v26, 16  ;;  %v298_v42 = vshll.u32 %v1904_v33, 16  ;;  %v1902_v43 = vld [vmem:[%s2352_s1 + $0xf0] sm:$0xff]  }
  0x14   : > { %v272_v25 = vor.u32 %v271_v20, %v267_v16  ;;  %v280_v31 = vor.u32 %v278_v23, %v276_v21  ;;  %v292_v38 = vrot.slane %v290_v30, 1  ;;  %v2121_v44 = vld [vmem:[%s2077_s14 + $0x30] sm:$0xff]   ;;  %v302_v46 = vshrl.u32 %v1904_v33, 16  ;;  %v1905_v50 = vld [vmem:[%s2352_s1 + $0xa8] sm:$0xff]   ;;  %v2134_v55 = vld [vmem:[%s2077_s14 + $0x38] sm:$0xff]  }
  0x15   : > { %1748 = vmatpush3.bf16.msra.mxu0 %v1884_v4  ;;  %v288_v37 = vor.u32 %v286_v29, %v284_v32  ;;  %v306_v47 = vshll.u32 %v2114_v39, 16  ;;  %v300_v49 = vrot.slane %v298_v42, 1  ;;  %v1906_v51 = vld [vmem:[%s2352_s1 + $0xe8] sm:$0xff]   ;;  %v314_v52 = vshll.u32 %v2121_v44, 16  ;;  %v1907_v59 = vld [vmem:[%s2352_s1 + $0xa0] sm:$0xff]   ;;  %v1911_v2 = vld [vmem:[%s2352_s1 + $0x98] sm:$0xff]  }
  0x16   : > { %1780 = vmatpush3.bf16.msra.mxu1 %v1885_v5  ;;  %1749 = vmatprep.subr.bf16.mxu0 %v1886_v6  ;;  %v277_v28 = vsel %vm265_vm0, %v272_v25, %v276_v21  ;;  %v285_v40 = vsel %vm265_vm0, %v280_v31, %v284_v32  ;;  %v296_v48 = vor.u32 %v294_v41, %v292_v38  ;;  %v310_v57 = vshrl.u32 %v2114_v39, 16  ;;  %v1916_v58 = vld [vmem:[%s2077_s14 + $0x40] ss:$0 sps:$4 sm:$0x11]   ;;  %v1922_v3 = vld [vmem:[%s2077_s14 + $0x8] sm:$0xff]   ;;  %v1912_v4 = vld [vmem:[%s2352_s1 + $0xd8] sm:$0xff]  }
  0x17   : > { %1781 = vmatprep.subr.bf16.mxu1 %v1887_v7  ;;  %1759 = vmatprep.mubr.bf16.mxu0 %v277_v28  ;;  %v293_v45 = vsel %vm265_vm0, %v288_v37, %v292_v38  ;;  %v304_v53 = vor.u32 %v302_v46, %v300_v49  ;;  %v308_v54 = vrot.slane %v306_v47, 1  ;;  %v1908_v60 = vld [vmem:[%s2352_s1 + $0xe0] sm:$0xff]   ;;  %v316_v61 = vrot.slane %v314_v52, 1  ;;  %v1913_v12 = vld [vmem:[%s2352_s1 + $0x90] sm:$0xff]   ;;  %v1917_v16 = vld [vmem:[%s2352_s1 + $0x88] sm:$0xff]  }
  0x18   : > { %v301_v56 = vsel %vm265_vm0, %v296_v48, %v300_v49  ;;  %v318_v63 = vshrl.u32 %v2121_v44, 16  ;;  %v322_v0 = vshll.u32 %v2134_v55, 16  ;;  %v330_v5 = vshll.u32 %v1916_v58, 16  ;;  %v1925_v21 = vld [vmem:[%s2077_s14 + $0x18] sm:$0xff]   ;;  %v1918_v23 = vld [vmem:[%s2352_s1 + $0xc8] sm:$0xff]   ;;  %v1919_v24 = vld [vmem:[%s2352_s1 + $0x80] sm:$0xff]  }
  0x19   : > { %1750 = vmatpush3.bf16.msra.mxu0 %v1886_v6  ;;  %v309_v62 = vsel %vm265_vm0, %v304_v53, %v308_v54  ;;  %v312_v1 = vor.u32 %v310_v57, %v308_v54  ;;  %v960_v17 = vshrl.u32 %v1922_v3, 16  ;;  %v975_v29 = vshll.u32 %v1925_v21, 16  ;;  %v1921_v30 = vld [vmem:[%s2077_s14 + $0x8] sm:$0xff]   ;;  %v1926_v48 = vld [vmem:[%s2077_s14 + $0x18] sm:$0xff]  }
  0x1a   : > { %1782 = vmatpush3.bf16.msra.mxu1 %v1887_v7  ;;  %1751 = vmatprep.subr.bf16.mxu0 %v1888_v8  ;;  %v320_v6 = vor.u32 %v318_v63, %v316_v61  ;;  %v324_v7 = vrot.slane %v322_v0, 1  ;;  %v979_v32 = vshrl.u32 %v1925_v21, 16  ;;  %v1929_v37 = vld [vmem:[%s2077_s14 + $0x28] sm:$0xff]   ;;  %v1928_v63 = vld [vmem:[%s2077_s14 + $0x20] sm:$0xff]  }
  0x1b   : > { %1783 = vmatprep.subr.bf16.mxu1 %v1889_v9  ;;  %v991_v49 = vshll.u32 %v1929_v37, 16  ;;  %v1930_v0 = vld [vmem:[%s2077_s14 + $0x28] sm:$0xff]  }
  0x1d   : > { %1752 = vmatpush3.bf16.msra.mxu0 %v1888_v8  ;;  %v1923_v8 = vld [vmem:[%s2077_s14 + $0x10] sm:$0xff]   ;;  %v993_v58 = vrot.slane %v991_v49, 1 }
  0x1e   : > { %1784 = vmatpush3.bf16.msra.mxu1 %v1889_v9  ;;  %1753 = vmatprep.subr.bf16.mxu0 %v1890_v10  ;;  %v317_v9 = vsel %vm265_vm0, %v312_v1, %v316_v61  ;;  %v967_v18 = vshll.u32 %v1923_v8, 16  ;;  %v971_v31 = vshrl.u32 %v1923_v8, 16 }
  0x1f   : > { %1785 = vmatprep.subr.bf16.mxu1 %v1891_v11 }
  0x20   : > { %v969_v28 = vrot.slane %v967_v18, 1 }
  0x21   : > { %1754 = vmatpush3.bf16.msra.mxu0 %v1890_v10  ;;  %v326_v10 = vshrl.u32 %v2134_v55, 16 }
  0x22   : > { %1786 = vmatpush3.bf16.msra.mxu1 %v1891_v11  ;;  %1755 = vmatprep.subr.bf16.mxu0 %v1892_v15  ;;  %v962_v11 = vshll.u32 %v1922_v3, 16  ;;  %v973_v38 = vor.u32 %v971_v31, %v969_v28 }
  0x23   : > { %1787 = vmatprep.subr.bf16.mxu1 %v1893_v19 }
  0x24   : > { %v964_v20 = vrot.slane %v962_v11, 1 }
  0x25   : > { %1756 = vmatpush3.bf16.msra.mxu0 %v1892_v15  ;;  %v325_v15 = vsel %vm265_vm0, %v320_v6, %v324_v7 }
  0x26   : > { %1788 = vmatpush3.bf16.msra.mxu1 %v1893_v19  ;;  %1757 = vmatprep.subr.bf16.mxu0 %v1894_v22  ;;  %v328_v19 = vor.u32 %v326_v10, %v324_v7  ;;  %v1934_v10 = vld [vmem:[%s2077_s14 + $0x38] sm:$0xff]  }
  0x27   : > { %1789 = vmatprep.subr.bf16.mxu1 %v1895_v27 }
  0x29   : > { %1758 = vmatpush3.bf16.msra.mxu0 %v1894_v22  ;;  %v1927_v22 = vld [vmem:[%s2077_s14 + $0x20] sm:$0xff]  }
  0x2a   : > { %1790 = vmatpush3.bf16.msra.mxu1 %v1895_v27  ;;  %1807 = vmatprep.subr.bf16.mxu0 %v1899_v34  ;;  %v965_v27 = vor.u32 %v964_v20, %v960_v17 }
  0x2b   : > { %1839 = vmatprep.subr.bf16.mxu1 %v1900_v35 }
  0x2c   : > { %1760 = vmatmul.mubr.bf16.vlgmr.msra.gmra.mxu0 %v285_v40  ;;  %v1937_v40 = vld [vmem:[%s2077_s14 + $0x48] ss:$0 sps:$4 sm:$0x11]  }
  0x2d   : > { %1792 = vmatmul.mubr.bf16.vlgmr.msra.gmra.mxu1 %v1897_v13  ;;  %1808 = vmatpush3.bf16.msra.mxu0 %v1899_v34  ;;  %v1914_v13 = vld [vmem:[%s2352_s1 + $0xd0] sm:$0xff]   ;;  %v1935_v34 = vld [vmem:[%s2077_s14 + $0x40] sm:$0xff]   ;;  %v1023_v47 = vshll.u32 %v1937_v40, 16 }
  0x2e   : > { %1840 = vmatpush3.bf16.msra.mxu1 %v1900_v35  ;;  %1809 = vmatprep.subr.bf16.mxu0 %v1901_v36  ;;  %v970_v35 = vsel %vm265_vm0, %v965_v27, %v969_v28 }
  0x2f   : > { %1841 = vmatprep.subr.bf16.mxu1 %v1902_v43  ;;  %1763 = vmatprep.mubr.bf16.mxu0 %v293_v45  ;;  %v1924_v45 = vld [vmem:[%s2077_s14 + $0x10] sm:$0xff]   ;;  %v1025_v53 = vrot.slane %v1023_v47, 1 }
  0x30   : > { %1795 = vmatprep.mubr.bf16.mxu1 %v2085_v14  ;;  %v332_v14 = vrot.slane %v330_v5, 1 }
  0x31   : > { %1810 = vmatpush3.bf16.msra.mxu0 %v1901_v36  ;;  %v977_v36 = vrot.slane %v975_v29, 1 }
  0x32   : > { %1842 = vmatpush3.bf16.msra.mxu1 %v1902_v43  ;;  %1811 = vmatprep.subr.bf16.mxu0 %v1905_v50  ;;  %v333_v25 = vsel %vm265_vm0, %v328_v19, %v332_v14  ;;  %v1931_v43 = vld [vmem:[%s2077_s14 + $0x30] sm:$0xff]  }
  0x33   : > { %1843 = vmatprep.subr.bf16.mxu1 %v1906_v51  ;;  %v981_v41 = vor.u32 %v979_v32, %v977_v36  ;;  %v1003_v3 = vshrl.u32 %v1931_v43, 16 }
  0x34   : > { %1764 = vmatmul.mubr.bf16.gmra.mxu0 %v301_v56  ;;  %v999_v56 = vshll.u32 %v1931_v43, 16 }
  0x35   : > { %1796 = vmatmul.mubr.bf16.gmra.mxu1 %v1903_v26  ;;  %1812 = vmatpush3.bf16.msra.mxu0 %v1905_v50  ;;  %v1920_v26 = vld [vmem:[%s2352_s1 + $0xc0] sm:$0xff]   ;;  %v978_v50 = vsel %vm265_vm0, %v973_v38, %v977_v36 }
  0x36   : > { %1844 = vmatpush3.bf16.msra.mxu1 %v1906_v51  ;;  %1813 = vmatprep.subr.bf16.mxu0 %v1907_v59  ;;  %v987_v51 = vshrl.u32 %v1927_v22, 16 }
  0x37   : > { %1845 = vmatprep.subr.bf16.mxu1 %v1908_v60  ;;  %1767 = vmatprep.mubr.bf16.mxu0 %v309_v62  ;;  %v1001_v62 = vrot.slane %v999_v56, 1 }
  0x38   : > { %1799 = vmatprep.mubr.bf16.mxu1 %v1904_v33  ;;  %v983_v33 = vshll.u32 %v1927_v22, 16 }
  0x39   : > { %1814 = vmatpush3.bf16.msra.mxu0 %v1907_v59  ;;  %v1933_v59 = vld [vmem:[%s2077_s14 + $0x38] sm:$0xff]   ;;  %v1005_v7 = vor.u32 %v1003_v3, %v1001_v62 }
  0x3a   : > { %1846 = vmatpush3.bf16.msra.mxu1 %v1908_v60  ;;  %1815 = vmatprep.subr.bf16.mxu0 %v1911_v2  ;;  %v985_v42 = vrot.slane %v983_v33, 1  ;;  %v1007_v1 = vshll.u32 %v1933_v59, 16  ;;  %v1011_v5 = vshrl.u32 %v1933_v59, 16 }
  0x3b   : > { %1847 = vmatprep.subr.bf16.mxu1 %v1912_v4 }
  0x3c   : > { %1768 = vmatmul.mubr.bf16.gmra.mxu0 %v317_v9  ;;  %v986_v54 = vsel %vm265_vm0, %v981_v41, %v985_v42  ;;  %v989_v60 = vor.u32 %v987_v51, %v985_v42  ;;  %v1009_v6 = vrot.slane %v1007_v1, 1  ;;  %v1932_v9 = vld [vmem:[%s2077_s14 + $0x30] sm:$0xff]   ;;  %v2237_v51 = vld [vmem:[%s2353_s2] ss:$0 sm:$0xff] }
  0x3d   : > { %1800 = vmatmul.mubr.bf16.gmra.mxu1 %v2114_v39  ;;  %1816 = vmatpush3.bf16.msra.mxu0 %v1911_v2  ;;  %v1015_v39 = vshll.u32 %v1935_v34, 16 }
  0x3e   : > { %1848 = vmatpush3.bf16.msra.mxu1 %v1912_v4  ;;  %1817 = vmatprep.subr.bf16.mxu0 %v1913_v12  ;;  %v994_v2 = vsel %vm265_vm0, %v989_v60, %v993_v58  ;;  %v1013_v8 = vor.u32 %v1011_v5, %v1009_v6  ;;  %v1010_v11 = vsel %vm265_vm0, %v1005_v7, %v1009_v6 }
  0x3f   : > { %1849 = vmatprep.subr.bf16.mxu1 %v1914_v13  ;;  %1771 = vmatprep.mubr.bf16.mxu0 %v325_v15  ;;  %v1017_v46 = vrot.slane %v1015_v39, 1 }
  0x40   : > { %1803 = vmatprep.mubr.bf16.mxu1 %v2121_v44  ;;  %v1019_v44 = vshrl.u32 %v1935_v34, 16 }
  0x41   : > { %1818 = vmatpush3.bf16.msra.mxu0 %v1913_v12  ;;  %v1018_v12 = vsel %vm265_vm0, %v1013_v8, %v1017_v46 }
  0x42   : > { %1850 = vmatpush3.bf16.msra.mxu1 %v1914_v13  ;;  %1819 = vmatprep.subr.bf16.mxu0 %v1917_v16  ;;  %v1021_v52 = vor.u32 %v1019_v44, %v1017_v46  ;;  %v1936_v13 = vld [vmem:[%s2077_s14 + $0x40] sm:$0xff]  }
  0x43   : > { %1851 = vmatprep.subr.bf16.mxu1 %v1918_v23 }
  0x44   : > { %1772 = vmatmul.mubr.bf16.gmra.mxu0 %v333_v25  ;;  %v1026_v57 = vsel %vm265_vm0, %v1021_v52, %v1025_v53 }
  0x45   : > { %1804 = vmatmul.mubr.bf16.gmra.mxu1 %v2134_v55  ;;  %1820 = vmatpush3.bf16.msra.mxu0 %v1917_v16  ;;  %v995_v55 = vshrl.u32 %v1929_v37, 16 }
  0x46   : > { %1852 = vmatpush3.bf16.msra.mxu1 %v1918_v23  ;;  %1821 = vmatprep.subr.bf16.mxu0 %v1919_v24 }
  0x47   : > { %1853 = vmatprep.subr.bf16.mxu1 %v1920_v26  ;;  %1823 = vmatprep.mubr.bf16.mxu0 %v1921_v30  ;;  %v997_v61 = vor.u32 %v995_v55, %v993_v58 }
  0x48   : > { %1855 = vmatprep.mubr.bf16.mxu1 %v970_v35 }
  0x49   : > { %1822 = vmatpush3.bf16.msra.mxu0 %v1919_v24  ;;  %v1002_v4 = vsel %vm265_vm0, %v997_v61, %v1001_v62 }
  0x4a   : > { %1854 = vmatpush3.bf16.msra.mxu1 %v1920_v26 }
  0x4c   : > { %1824 = vmatmul.mubr.bf16.vlgmr.msra.gmra.mxu0 %v1924_v45 }
  0x4d   : > { %1856 = vmatmul.mubr.bf16.vlgmr.msra.gmra.mxu1 %v978_v50  ;;  %1827 = vmatprep.mubr.bf16.mxu0 %v1926_v48 }
  0x4e   : > { %1859 = vmatprep.mubr.bf16.mxu1 %v986_v54 }
  0x54   : > { %1828 = vmatmul.mubr.bf16.gmra.mxu0 %v1928_v63 }
  0x55   : > { %1860 = vmatmul.mubr.bf16.gmra.mxu1 %v994_v2  ;;  %1831 = vmatprep.mubr.bf16.mxu0 %v1930_v0 }
  0x56   : > { %1863 = vmatprep.mubr.bf16.mxu1 %v1002_v4 }
  0x5c   : > { %1832 = vmatmul.mubr.bf16.gmra.mxu0 %v1932_v9 }
  0x5d   : > { %1864 = vmatmul.mubr.bf16.gmra.mxu1 %v1010_v11  ;;  %1835 = vmatprep.mubr.bf16.mxu0 %v1934_v10 }
  0x5e   : > { %1867 = vmatprep.mubr.bf16.mxu1 %v1018_v12 }
  0x64   : > { %1836 = vmatmul.mubr.bf16.gmra.mxu0 %v1936_v13 }
  0x65   : > { %1868 = vmatmul.mubr.bf16.gmra.mxu1 %v1026_v57 }
  0xec   : > { %v1761_v14 = vpop.f32.mrf.mxu0 }
  0xed   : > { %v1793_v15 = vpop.f32.mrf.mxu1 }
  0xee   : > { %v424_v16 = vpop.f32.mrf.mxu0  ;;  %v586_v45 = vadd.f32 %v1793_v15, %v1761_v14 }
  0xef   : > { %v577_v17 = vpop.f32.mrf.mxu1 }
  0xf0   : > { %v1762_v18 = vpop.f32.mrf.mxu0  ;;  %v578_v48 = vadd.f32 %v577_v17, %v424_v16 }
  0xf1   : > { %v1794_v19 = vpop.f32.mrf.mxu1 }
  0xf2   : > { %v427_v20 = vpop.f32.mrf.mxu0  ;;  %v589_v53 = vadd.f32 %v1794_v19, %v1762_v18 }
  0xf3   : > { %v580_v21 = vpop.f32.mrf.mxu1 }
  0xf4   : > { %v1765_v22 = vpop.f32.mrf.mxu0  ;;  %v581_v58 = vadd.f32 %v580_v21, %v427_v20 }
  0xf5   : > { %v1797_v23 = vpop.f32.mrf.mxu1 }
  0xf6   : > { %v440_v24 = vpop.f32.mrf.mxu0  ;;  %v602_v5 = vadd.f32 %v1797_v23, %v1765_v22 }
  0xf7   : > { %v593_v25 = vpop.f32.mrf.mxu1 }
  0xf8   : > { %v1766_v26 = vpop.f32.mrf.mxu0  ;;  %v594_v6 = vadd.f32 %v593_v25, %v440_v24 }
  0xf9   : > { %v1798_v27 = vpop.f32.mrf.mxu1 }
  0xfa   : > { %v443_v28 = vpop.f32.mrf.mxu0  ;;  %v605_v12 = vadd.f32 %v1798_v27, %v1766_v26 }
  0xfb   : > { %v596_v29 = vpop.f32.mrf.mxu1 }
  0xfc   : > { %v2204_v30 = vpop.f32.mrf.mxu0  ;;  %v597_v19 = vadd.f32 %v596_v29, %v443_v28 }
  0xfd   : > { %v1801_v31 = vpop.f32.mrf.mxu1 }
  0xfe   : > { %v2206_v32 = vpop.f32.mrf.mxu0  ;;  %v618_v26 = vadd.f32 %v1801_v31, %v2204_v30 }
  0xff   : > { %v2208_v33 = vpop.f32.mrf.mxu1 }
 0x100   : > { %v2210_v34 = vpop.f32.mrf.mxu0 }
 0x101   : > { %v2212_v35 = vpop.f32.mrf.mxu1 }
 0x102   : > { %v2214_v36 = vpop.f32.mrf.mxu0 }
 0x103   : > { %v2216_v37 = vpop.f32.mrf.mxu1 }
 0x104   : > { %v2218_v38 = vpop.f32.mrf.mxu0 }
 0x105   : > { %v2220_v39 = vpop.f32.mrf.mxu1 }
 0x106   : > { %v2222_v40 = vpop.f32.mrf.mxu0 }
 0x107   : > { %v2224_v41 = vpop.f32.mrf.mxu1 }
 0x108   : > { %v2226_v42 = vpop.f32.mrf.mxu0 }
 0x109   : > { %v2228_v43 = vpop.f32.mrf.mxu1 }
 0x10a   : > { %v2230_v44 = vpop.f32.mrf.mxu0 }
 0x10b   : > { %v2232_v46 = vpop.f32.mrf.mxu1 }
 0x10c   : > { %v1825_v47 = vpop.f32.mrf.mxu0 }
 0x10d   : > { %v868_v49 = vadd.f32 %v1825_v47, %v586_v45  ;;  %v1857_v50 = vpop.f32.mrf.mxu1 }
 0x10e   : > { %v803_v52 = vpop.f32.mrf.mxu0 }
 0x10f   : > { %v1182_v54 = vadd.f32 %v1857_v50, %v868_v49  ;;  %v866_v55 = vadd.f32 %v803_v52, %v578_v48  ;;  %v1117_v56 = vpop.f32.mrf.mxu1 }
 0x110   : > { %v1826_v57 = vpop.f32.mrf.mxu0 }
 0x111   : > { %v2240_v59 = vadd.f32 %v2237_v51, %v1182_v54  ;;  %v1180_v60 = vadd.f32 %v1117_v56, %v866_v55  ;;  %v869_v61 = vadd.f32 %v1826_v57, %v589_v53  ;;  %v1858_v62 = vpop.f32.mrf.mxu1  ;;  %v610_v55 = vadd.f32 %v2208_v33, %v2206_v32 }
 0x112   : > { %v806_v63 = vpop.f32.mrf.mxu0  ;;  %v621_v56 = vadd.f32 %v2212_v35, %v2210_v34 }
 0x113   : > { %v1583_v0 = vmul.f32 -1.442695, %v2240_v59  ;;  %v2244_v1 = vadd.f32 %v2237_v51, %v1180_v60  ;;  %v1183_v2 = vadd.f32 %v1858_v62, %v869_v61  ;;  %v867_v3 = vadd.f32 %v806_v63, %v581_v58  ;;  %v1120_v4 = vpop.f32.mrf.mxu1 }
 0x114   : > { %v1829_v7 = vpop.f32.mrf.mxu0 }
 0x115   : > { %1938 = vpow2.f32 %v1583_v0  ;;  %v1581_v8 = vmul.f32 -1.442695, %v2244_v1  ;;  %v2248_v9 = vadd.f32 %v2237_v51, %v1183_v2  ;;  %v1181_v10 = vadd.f32 %v1120_v4, %v867_v3  ;;  %v1861_v11 = vpop.f32.mrf.mxu1 }
 0x116   : > { %v872_v13 = vadd.f32 %v1829_v7, %v602_v5  ;;  %v819_v14 = vpop.f32.mrf.mxu0  ;;  %v613_v3 = vadd.f32 %v2216_v37, %v2214_v36  ;;  %v634_v4 = vadd.f32 %v2220_v39, %v2218_v38 }
 0x117   : > { %1940 = vpow2.f32 %v1581_v8  ;;  %v1584_v15 = vmul.f32 -1.442695, %v2248_v9  ;;  %v2252_v16 = vadd.f32 %v2237_v51, %v1181_v10  ;;  %v870_v17 = vadd.f32 %v819_v14, %v594_v6  ;;  %v1133_v18 = vpop.f32.mrf.mxu1 }
 0x118   : > { %v1186_v20 = vadd.f32 %v1861_v11, %v872_v13  ;;  %v1830_v21 = vpop.f32.mrf.mxu0  ;;  %v626_v13 = vadd.f32 %v2224_v41, %v2222_v40 }
 0x119   : > { %1942 = vpow2.f32 %v1584_v15  ;;  %v1582_v22 = vmul.f32 -1.442695, %v2252_v16  ;;  %v1184_v23 = vadd.f32 %v1133_v18, %v870_v17  ;;  %v873_v24 = vadd.f32 %v1830_v21, %v605_v12  ;;  %v1862_v25 = vpop.f32.mrf.mxu1 }
 0x11a   : > { %v2257_v27 = vadd.f32 %v2237_v51, %v1186_v20  ;;  %v822_v45 = vpop.f32.mrf.mxu0 }
 0x11b   : > { %1944 = vpow2.f32 %v1582_v22  ;;  %v2260_v47 = vadd.f32 %v2237_v51, %v1184_v23  ;;  %v1187_v48 = vadd.f32 %v1862_v25, %v873_v24  ;;  %v871_v28 = vadd.f32 %v822_v45, %v597_v19  ;;  %v1136_v29 = vpop.f32.mrf.mxu1 }
 0x11c   : > { %v1587_v49 = vmul.f32 -1.442695, %v2257_v27  ;;  %v1833_v50 = vpop.f32.mrf.mxu0  ;;  %v637_v19 = vadd.f32 %v2228_v43, %v2226_v42 }
 0x11d   : > { %v1585_v52 = vmul.f32 -1.442695, %v2260_v47  ;;  %v2265_v53 = vadd.f32 %v2237_v51, %v1187_v48  ;;  %v1185_v30 = vadd.f32 %v1136_v29, %v871_v28  ;;  %v876_v31 = vadd.f32 %v1833_v50, %v618_v26  ;;  %v1865_v54 = vpop.f32.mrf.mxu1 }
 0x11e   : > { %1946 = vpow2.f32 %v1587_v49  ;;  %v835_v57 = vpop.f32.mrf.mxu0  ;;  %v629_v26 = vadd.f32 %v2232_v46, %v2230_v44 }
 0x11f   : > { %1948 = vpow2.f32 %v1585_v52  ;;  %v1588_v58 = vmul.f32 -1.442695, %v2265_v53  ;;  %v2273_v60 = vadd.f32 %v2237_v51, %v1185_v30  ;;  %v1190_v61 = vadd.f32 %v1865_v54, %v876_v31  ;;  %v1149_v62 = vpop.f32.mrf.mxu1 }
 0x120   : > { %v874_v63 = vadd.f32 %v835_v57, %v610_v55  ;;  %v1834_v0 = vpop.f32.mrf.mxu0 }
 0x121   : > { %1950 = vpow2.f32 %v1588_v58  ;;  %v1586_v2 = vmul.f32 -1.442695, %v2273_v60  ;;  %v2277_v32 = vadd.f32 %v2237_v51, %v1190_v61  ;;  %v877_v33 = vadd.f32 %v1834_v0, %v621_v56  ;;  %v1866_v34 = vpop.f32.mrf.mxu1 }
 0x122   : > { %v1939_v35 = vpop.eup %1938  ;;  %v1188_v5 = vadd.f32 %v1149_v62, %v874_v63  ;;  %v838_v6 = vpop.f32.mrf.mxu0 }
 0x123   : > { %v1269_v7 = vadd.f32 1.0, %v1939_v35  ;;  %1952 = vpow2.f32 %v1586_v2  ;;  %v1591_v8 = vmul.f32 -1.442695, %v2277_v32  ;;  %v1191_v10 = vadd.f32 %v1866_v34, %v877_v33  ;;  %v1152_v11 = vpop.f32.mrf.mxu1 }
 0x124   : > { %v1941_v12 = vpop.eup %1940  ;;  %v2287_v14 = vadd.f32 %v2237_v51, %v1188_v5  ;;  %v875_v15 = vadd.f32 %v838_v6, %v613_v3  ;;  %v1837_v36 = vpop.f32.mrf.mxu0 }
 0x125   : > { %1954 = vrcp.f32 %v1269_v7  ;;  %v1267_v37 = vadd.f32 1.0, %v1941_v12  ;;  %v2290_v38 = vadd.f32 %v2237_v51, %v1191_v10  ;;  %v880_v39 = vadd.f32 %v1837_v36, %v634_v4  ;;  %v1869_v17 = vpop.f32.mrf.mxu1 }
 0x126   : > { %v1943_v18 = vpop.eup %1942  ;;  %1956 = vpow2.f32 %v1591_v8  ;;  %v1589_v20 = vmul.f32 -1.442695, %v2287_v14  ;;  %v1189_v40 = vadd.f32 %v1152_v11, %v875_v15  ;;  %v851_v41 = vpop.f32.mrf.mxu0 }
 0x127   : > { %1958 = vrcp.f32 %v1267_v37  ;;  %v1270_v21 = vadd.f32 1.0, %v1943_v18  ;;  %v1592_v22 = vmul.f32 -1.442695, %v2290_v38  ;;  %v1194_v23 = vadd.f32 %v1869_v17, %v880_v39  ;;  %v1165_v24 = vpop.f32.mrf.mxu1 }
 0x128   : > { %v1945_v25 = vpop.eup %1944  ;;  %1960 = vpow2.f32 %v1589_v20  ;;  %v2299_v45 = vadd.f32 %v2237_v51, %v1189_v40  ;;  %v878_v42 = vadd.f32 %v851_v41, %v626_v13  ;;  %v1838_v43 = vpop.f32.mrf.mxu0 }
 0x129   : > { %1962 = vrcp.f32 %v1270_v21  ;;  %v1268_v48 = vadd.f32 1.0, %v1945_v25  ;;  %v2302_v28 = vadd.f32 %v2237_v51, %v1194_v23  ;;  %v881_v29 = vadd.f32 %v1838_v43, %v637_v19  ;;  %v1870_v49 = vpop.f32.mrf.mxu1 }
 0x12a   : > { %1964 = vpow2.f32 %v1592_v22  ;;  %v1590_v50 = vmul.f32 -1.442695, %v2299_v45  ;;  %v1192_v52 = vadd.f32 %v1165_v24, %v878_v42  ;;  %v854_v30 = vpop.f32.mrf.mxu0 }
 0x12b   : > { %v1947_v31 = vpop.eup %1946  ;;  %1966 = vrcp.f32 %v1268_v48  ;;  %v1595_v44 = vmul.f32 -1.442695, %v2302_v28  ;;  %v1195_v46 = vadd.f32 %v1870_v49, %v881_v29  ;;  %v879_v54 = vadd.f32 %v854_v30, %v629_v26  ;;  %v1168_v58 = vpop.f32.mrf.mxu1 }
 0x12c   : > { %v1949_v55 = vpop.eup %1948  ;;  %v1273_v56 = vadd.f32 1.0, %v1947_v31  ;;  %1968 = vpow2.f32 %v1590_v50  ;;  %v2307_v57 = vadd.f32 %v2237_v51, %v1192_v52 }
 0x12d   : > { %v1271_v61 = vadd.f32 1.0, %v1949_v55  ;;  %1970 = vpow2.f32 %v1595_v44  ;;  %v2310_v62 = vadd.f32 %v2237_v51, %v1195_v46  ;;  %v1193_v63 = vadd.f32 %v1168_v58, %v879_v54 }
 0x12e   : > { %v1951_v0 = vpop.eup %1950  ;;  %1972 = vrcp.f32 %v1273_v56  ;;  %v1593_v2 = vmul.f32 -1.442695, %v2307_v57 }
 0x12f   : > { %1974 = vrcp.f32 %v1271_v61  ;;  %v1274_v33 = vadd.f32 1.0, %v1951_v0  ;;  %v1596_v34 = vmul.f32 -1.442695, %v2310_v62  ;;  %v2315_v35 = vadd.f32 %v2237_v51, %v1193_v63 }
 0x130   : > { %v1953_v3 = vpop.eup %1952  ;;  %1976 = vpow2.f32 %v1593_v2 }
 0x131   : > { %1978 = vrcp.f32 %v1274_v33  ;;  %v1272_v4 = vadd.f32 1.0, %v1953_v3  ;;  %v1594_v5 = vmul.f32 -1.442695, %v2315_v35 }
 0x132   : > { %v1955_v6 = vpop.eup %1954  ;;  %1980 = vpow2.f32 %v1596_v34 }
 0x133   : > { %v1957_v7 = vpop.eup %1956  ;;  %1982 = vrcp.f32 %v1272_v4  ;;  %v1317_v51 = vmul.f32 %v1955_v6, %v2240_v59 }
 0x134   : > { %v1959_v8 = vpop.eup %1958  ;;  %v1277_v10 = vadd.f32 1.0, %v1957_v7  ;;  %1984 = vpow2.f32 %v1594_v5 }
 0x135   : > { %v1961_v11 = vpop.eup %1960  ;;  %v1315_v18 = vmul.f32 %v1959_v8, %v2244_v1 }
 0x136   : > { %v1963_v12 = vpop.eup %1962  ;;  %v1275_v13 = vadd.f32 1.0, %v1961_v11  ;;  %1986 = vrcp.f32 %v1277_v10 }
 0x137   : > { %v1965_v15 = vpop.eup %1964  ;;  %v1318_v36 = vmul.f32 %v1963_v12, %v2248_v9 }
 0x138   : > { %v1967_v37 = vpop.eup %1966  ;;  %v1278_v39 = vadd.f32 1.0, %v1965_v15  ;;  %1988 = vrcp.f32 %v1275_v13 }
 0x139   : > { %v1969_v17 = vpop.eup %1968  ;;  %v1640_v19 = vpack.c.bf16 %v1318_v36, %v1317_v51  ;;  %v1316_v20 = vmul.f32 %v1967_v37, %v2252_v16 }
 0x13a   : > { %v1971_v59 = vpop.eup %1970  ;;  %1990 = vrcp.f32 %v1278_v39  ;;  %v1276_v9 = vadd.f32 1.0, %v1969_v17 }
 0x13b   : > { %v1973_v40 = vpop.eup %1972  ;;  %1672 = vst [vmem:[%s2324_s10 + $0x8] sm:$0xff] %v1640_v19   ;;  %v1635_v41 = vpack.c.bf16 %v1316_v20, %v1315_v18  ;;  %v1281_v22 = vadd.f32 1.0, %v1971_v59 }
 0x13c   : > { %v1975_v21 = vpop.eup %1974  ;;  %1992 = vrcp.f32 %v1276_v9  ;;  %v1321_v1 = vmul.f32 %v1973_v40, %v2257_v27 }
 0x13d   : > { %v1977_v23 = vpop.eup %1976  ;;  %1636 = vst [vmem:[%s2324_s10] sm:$0xff] %v1635_v41   ;;  %1994 = vrcp.f32 %v1281_v22  ;;  %v1319_v29 = vmul.f32 %v1975_v21, %v2260_v47 }
 0x13e   : > { %v1979_v24 = vpop.eup %1978  ;;  %v1279_v25 = vadd.f32 1.0, %v1977_v23 }
 0x13f   : > { %v1981_v26 = vpop.eup %1980  ;;  %v1322_v16 = vmul.f32 %v1979_v24, %v2265_v53 }
 0x140   : > { %v1983_v42 = vpop.eup %1982  ;;  %v1282_v43 = vadd.f32 1.0, %v1981_v26  ;;  %1996 = vrcp.f32 %v1279_v25 }
 0x141   : > { %v1985_v48 = vpop.eup %1984  ;;  %v1650_v49 = vpack.c.bf16 %v1322_v16, %v1321_v1  ;;  %v1320_v50 = vmul.f32 %v1983_v42, %v2273_v60 }
 0x142   : > { %1998 = vrcp.f32 %v1282_v43  ;;  %v1280_v52 = vadd.f32 1.0, %v1985_v48 }
 0x143   : > { %1674 = vst [vmem:[%s2324_s10 + $0x18] sm:$0xff] %v1650_v49   ;;  %v1645_v30 = vpack.c.bf16 %v1320_v50, %v1319_v29  ;;  %v1987_v27 = vpop.eup %1986 }
 0x144   : > { %2000 = vrcp.f32 %v1280_v52  ;;  %v1325_v44 = vmul.f32 %v1987_v27, %v2277_v32 }
 0x145   : > { %1673 = vst [vmem:[%s2324_s10 + $0x10] sm:$0xff] %v1645_v30   ;;  %v1989_v53 = vpop.eup %1988 }
 0x146   : > { %v1323_v60 = vmul.f32 %v1989_v53, %v2287_v14 }
 0x147   : > { %v1991_v31 = vpop.eup %1990 }
 0x148   : > { %v1326_v46 = vmul.f32 %v1991_v31, %v2290_v38 }
 0x149   : > { %v1993_v47 = vpop.eup %1992 }
 0x14a   : > { %v1660_v54 = vpack.c.bf16 %v1326_v46, %v1325_v44  ;;  %v1324_v55 = vmul.f32 %v1993_v47, %v2299_v45  ;;  %v1995_v58 = vpop.eup %1994 }
 0x14b   : > { %v1329_v0 = vmul.f32 %v1995_v58, %v2302_v28 }
 0x14c   : > { %1676 = vst [vmem:[%s2324_s10 + $0x28] sm:$0xff] %v1660_v54   ;;  %v1655_v56 = vpack.c.bf16 %v1324_v55, %v1323_v60 }
 0x14d   : > { %v1997_v61 = vpop.eup %1996 }
 0x14e   : > { %1675 = vst [vmem:[%s2324_s10 + $0x20] sm:$0xff] %v1655_v56   ;;  %v1327_v38 = vmul.f32 %v1997_v61, %v2307_v57 }
 0x14f   : > { %v1999_v63 = vpop.eup %1998 }
 0x150   : > { %v1330_v32 = vmul.f32 %v1999_v63, %v2310_v62 }
 0x151   : > { %v2001_v2 = vpop.eup %2000 }
 0x152   : > { %v1670_v33 = vpack.c.bf16 %v1330_v32, %v1329_v0  ;;  %v1328_v14 = vmul.f32 %v2001_v2, %v2315_v35 }
 0x154   : > { %1678 = vst [vmem:[%s2324_s10 + $0x38] sm:$0xff] %v1670_v33   ;;  %v1665_v34 = vpack.c.bf16 %v1328_v14, %v1327_v38 }
 0x156   : > { %1677 = vst [vmem:[%s2324_s10 + $0x30] sm:$0xff] %v1665_v34  }
 0x157 PF: > { %s13_s12 = sadd.s32 1, %s2008_s12  }
 0x158   : > { %p10_p4 = scmp.ge.s32.totalorder %s13_s12, 4  }
 0x15a   :  { %12 = sbr.rel (!%p10_p4) target bundleno = 1 (0x1), region = 65 }

// kernel: vqgan_forward.8
= control target key start
LH: loop header
LB: loop body
LE: loop exit
PB: predicated region body
PF: predicated region fallthrough
CT: control target
= control target key end

     0   :  { %s1175_s12 = smov 0   ;;  %s1314_s0 = inlined_call_operand.vmem [shape: bf16[2,48,128], index: 0, kind: input, shape index: {}]   ;;  %s1315_s1 = inlined_call_operand.vmem [shape: bf16[4,128,128], index: 1, kind: input, shape index: {}]   ;;  %s1316_s2 = inlined_call_operand.vmem [shape: f32[1,128], index: 2, kind: input, shape index: {}]   ;;  %s1317_s3 = inlined_call_operand.vmem [shape: bf16[2,32,128], index: 3, kind: output, shape index: {}]  }
   0x1 LB: > { %s839_s13 = sadd.s32 4294967295, %s1153_s12   ;;  %p843_p0 = scmp.ge.s32.totalorder %s1153_s12, 1  ;;  %s1153_s12 = sphi %s1175_s12, %s13_s12  }
   0x2   : > { %p137_p1 = scmp.lt.s32.totalorder %s1153_s12, 3 }
   0x4   : > { %p138_p2 = pnand %p843_p0, %p137_p1 }
   0x5   : > { %p161_p3 = scmp.lt.s32.totalorder (!%p138_p2), %s839_s13, 1 }
   0x6   : > { %141 = sbr.rel (%p138_p2) target bundleno = 318 (0x13e), region = 32 }
   0xb   : > { %v1091_v0 = vld [vmem:[%s1315_s1 + $0x78] sm:$0xff]   ;;  %v1093_v2 = vld [vmem:[%s1315_s1 + $0x70] sm:$0xff]   ;;  %v1095_v4 = vld [vmem:[%s1315_s1 + $0x68] sm:$0xff]   ;;  %s1319_s13 = smov (!%p161_p3, %s839_s13), 1  ;;  %vm223_vm0 = vsmask.f32 7424 }
   0xc   : > { %v1092_v1 = vld [vmem:[%s1315_s1 + $0x38] sm:$0xff]   ;;  %1002 = vmatprep.subr.bf16.mxu0 %v1091_v0  ;;  %v1094_v3 = vld [vmem:[%s1315_s1 + $0x30] sm:$0xff]   ;;  %v1096_v5 = vld [vmem:[%s1315_s1 + $0x28] sm:$0xff]   ;;  %s1082_s30 = smul.u32 24, %s1319_s13  ;;  %s946_s7 = sshll.u32 %s1319_s13, 4 }
   0xd   : > { %1022 = vmatprep.subr.bf16.mxu1 %v1092_v1  ;;  %1003 = vmatpush3.bf16.msra.mxu0 %v1091_v0  ;;  %v1097_v6 = vld [vmem:[%s1315_s1 + $0x60] sm:$0xff]   ;;  %v1099_v8 = vld [vmem:[%s1315_s1 + $0x58] sm:$0xff]   ;;  %v1101_v10 = vld [vmem:[%s1315_s1 + $0x50] sm:$0xff]   ;;  %s170_s11 = scalar_lea.vmem %s1317_s3, %s946_s7 }
   0xe   : > { %1023 = vmatpush3.bf16.msra.mxu1 %v1092_v1  ;;  %1004 = vmatprep.subr.bf16.mxu0 %v1093_v2  ;;  %v1098_v7 = vld [vmem:[%s1315_s1 + $0x20] sm:$0xff]   ;;  %v1100_v9 = vld [vmem:[%s1315_s1 + $0x18] sm:$0xff]   ;;  %s1219_s10 = scalar_lea.vmem %s1314_s0, %s1082_s30  ;;  %v1102_v14 = vld [vmem:[%s1315_s1 + $0x10] sm:$0xff]  }
   0xf   : > { %1024 = vmatprep.subr.bf16.mxu1 %v1094_v3  ;;  %v172_v11 = vld [vmem:[%s1219_s10] sm:$0xf]  ;;  %v173_v12 = vld [vmem:[%s1219_s10 + $0x4] sm:$0xf]  ;;  %v174_v13 = vld [vmem:[%s1219_s10 + $0x8] sm:$0xf] }
  0x10   : > { %v1231_v15 = vld [vmem:[%s1219_s10 + $0xc] sm:$0xf]  ;;  %v863_v16 = vcombine.low %v172_v11, %v173_v12  ;;  %v1109_v18 = vld [vmem:[%s1219_s10 + $0x10] ss:$0 sps:$4 sm:$0x11]   ;;  %v1105_v29 = vld [vmem:[%s1315_s1 + $0x40] sm:$0xff]   ;;  %v898_v39 = vcombine.low %v173_v12, %v174_v13 }
  0x11   : > { %1005 = vmatpush3.bf16.msra.mxu0 %v1093_v2  ;;  %v864_v17 = vcombine.low %v174_v13, %v1231_v15  ;;  %v1103_v21 = vld [vmem:[%s1315_s1 + $0x48] sm:$0xff]   ;;  %v240_v28 = vshll.u32 %v1109_v18, 16  ;;  %v1106_v30 = vld [vmem:[%s1315_s1] sm:$0xff]   ;;  %v1110_v34 = vld [vmem:[%s1315_s1 + $0xb8] sm:$0xff]  }
  0x12   : > { %1025 = vmatpush3.bf16.msra.mxu1 %v1094_v3  ;;  %1006 = vmatprep.subr.bf16.mxu0 %v1095_v4  ;;  %v225_v19 = vshrl.u32 %v863_v16, 16  ;;  %v227_v20 = vshll.u32 %v863_v16, 16  ;;  %v1104_v23 = vld [vmem:[%s1315_s1 + $0x8] sm:$0xff]   ;;  %v1111_v35 = vld [vmem:[%s1315_s1 + $0xf8] sm:$0xff]   ;;  %v1112_v37 = vld [vmem:[%s1315_s1 + $0xb0] sm:$0xff]  }
  0x13   : > { %1026 = vmatprep.subr.bf16.mxu1 %v1096_v5  ;;  %1038 = vmatprep.mubr.bf16.mxu1 %v863_v16  ;;  %v232_v22 = vshll.u32 %v864_v17, 16  ;;  %v236_v27 = vshrl.u32 %v864_v17, 16  ;;  %v242_v33 = vrot.slane %v240_v28, 1  ;;  %v1113_v38 = vld [vmem:[%s1315_s1 + $0xf0] sm:$0xff]   ;;  %v1114_v40 = vld [vmem:[%s1315_s1 + $0xa8] sm:$0xff]   ;;  %v1116_v47 = vld [vmem:[%s1315_s1 + $0xa0] sm:$0xff]  }
  0x14   : > { %v229_v24 = vrot.slane %v227_v20, 1  ;;  %v1127_v41 = vld [vmem:[%s1219_s10 + $0x4] sm:$0xff]   ;;  %v1128_v43 = vld [vmem:[%s1219_s10 + $0xc] sm:$0xff]   ;;  %v1118_v52 = vld [vmem:[%s1315_s1 + $0x98] sm:$0xff]  }
  0x15   : > { %1007 = vmatpush3.bf16.msra.mxu0 %v1095_v4  ;;  %v234_v25 = vrot.slane %v232_v22, 1  ;;  %v1115_v42 = vld [vmem:[%s1315_s1 + $0xe8] sm:$0xff]   ;;  %v603_v44 = vshrl.u32 %v1127_v41, 16  ;;  %v605_v45 = vshll.u32 %v1127_v41, 16  ;;  %v610_v46 = vshll.u32 %v1128_v43, 16  ;;  %v1117_v49 = vld [vmem:[%s1315_s1 + $0xe0] sm:$0xff]  }
  0x16   : > { %1027 = vmatpush3.bf16.msra.mxu1 %v1096_v5  ;;  %1008 = vmatprep.subr.bf16.mxu0 %v1097_v6  ;;  %v230_v26 = vor.u32 %v229_v24, %v225_v19  ;;  %v1119_v54 = vld [vmem:[%s1315_s1 + $0xd8] sm:$0xff]   ;;  %v1120_v55 = vld [vmem:[%s1315_s1 + $0x90] sm:$0xff]   ;;  %v1122_v57 = vld [vmem:[%s1315_s1 + $0x88] sm:$0xff]   ;;  %v614_v61 = vshrl.u32 %v1128_v43, 16 }
  0x17   : > { %1028 = vmatprep.subr.bf16.mxu1 %v1098_v7  ;;  %v238_v32 = vor.u32 %v236_v27, %v234_v25  ;;  %v607_v48 = vrot.slane %v605_v45, 1  ;;  %v612_v50 = vrot.slane %v610_v46, 1  ;;  %v1121_v56 = vld [vmem:[%s1315_s1 + $0xd0] sm:$0xff]   ;;  %v1123_v59 = vld [vmem:[%s1315_s1 + $0xc8] sm:$0xff]   ;;  %v1124_v60 = vld [vmem:[%s1315_s1 + $0x80] sm:$0xff]  }
  0x18   : > { %v235_v31 = vsel %vm223_vm0, %v230_v26, %v234_v25  ;;  %v1130_v58 = vld [vmem:[%s1219_s10 + $0x14] ss:$0 sps:$4 sm:$0x11]   ;;  %v1125_v63 = vld [vmem:[%s1315_s1 + $0xc0] sm:$0xff]   ;;  %v442_v0 = vld [vmem:[%s1219_s10 + $0x10] sm:$0xf] }
  0x19   : > { %1009 = vmatpush3.bf16.msra.mxu0 %v1097_v6  ;;  %1018 = vmatprep.mubr.bf16.mxu0 %v235_v31  ;;  %v243_v36 = vsel %vm223_vm0, %v238_v32, %v242_v33  ;;  %v608_v51 = vor.u32 %v607_v48, %v603_v44  ;;  %v618_v62 = vshll.u32 %v1130_v58, 16  ;;  %v616_v1 = vor.u32 %v614_v61, %v612_v50 }
  0x1a   : > { %1029 = vmatpush3.bf16.msra.mxu1 %v1098_v7  ;;  %1010 = vmatprep.subr.bf16.mxu0 %v1099_v8  ;;  %v899_v3 = vcombine.low %v1231_v15, %v442_v0  ;;  %v935_v15 = vld [vmem:[%s1316_s2] ss:$0 sm:$0xff] }
  0x1b   : > { %1030 = vmatprep.subr.bf16.mxu1 %v1100_v9  ;;  %v613_v53 = vsel %vm223_vm0, %v608_v51, %v612_v50  ;;  %v620_v2 = vrot.slane %v618_v62, 1 }
  0x1d   : > { %1011 = vmatpush3.bf16.msra.mxu0 %v1099_v8  ;;  %v621_v4 = vsel %vm223_vm0, %v616_v1, %v620_v2 }
  0x1e   : > { %1031 = vmatpush3.bf16.msra.mxu1 %v1100_v9  ;;  %1012 = vmatprep.subr.bf16.mxu0 %v1101_v10 }
  0x1f   : > { %1032 = vmatprep.subr.bf16.mxu1 %v1102_v14 }
  0x21   : > { %1013 = vmatpush3.bf16.msra.mxu0 %v1101_v10 }
  0x22   : > { %1033 = vmatpush3.bf16.msra.mxu1 %v1102_v14  ;;  %1014 = vmatprep.subr.bf16.mxu0 %v1103_v21 }
  0x23   : > { %1034 = vmatprep.subr.bf16.mxu1 %v1104_v23 }
  0x25   : > { %1015 = vmatpush3.bf16.msra.mxu0 %v1103_v21 }
  0x26   : > { %1035 = vmatpush3.bf16.msra.mxu1 %v1104_v23  ;;  %1016 = vmatprep.subr.bf16.mxu0 %v1105_v29 }
  0x27   : > { %1036 = vmatprep.subr.bf16.mxu1 %v1106_v30 }
  0x29   : > { %1017 = vmatpush3.bf16.msra.mxu0 %v1105_v29 }
  0x2a   : > { %1037 = vmatpush3.bf16.msra.mxu1 %v1106_v30  ;;  %1042 = vmatprep.subr.bf16.mxu0 %v1110_v34 }
  0x2b   : > { %1062 = vmatprep.subr.bf16.mxu1 %v1111_v35 }
  0x2c   : > { %1019 = vmatmul.mubr.bf16.vlgmr.msra.gmra.mxu0 %v243_v36 }
  0x2d   : > { %1039 = vmatmul.mubr.bf16.vlgmr.msra.gmra.mxu1 %v864_v17  ;;  %1043 = vmatpush3.bf16.msra.mxu0 %v1110_v34 }
  0x2e   : > { %1063 = vmatpush3.bf16.msra.mxu1 %v1111_v35  ;;  %1044 = vmatprep.subr.bf16.mxu0 %v1112_v37 }
  0x2f   : > { %1064 = vmatprep.subr.bf16.mxu1 %v1113_v38  ;;  %1058 = vmatprep.mubr.bf16.mxu0 %v898_v39 }
  0x30   : > { %1078 = vmatprep.mubr.bf16.mxu1 %v613_v53 }
  0x31   : > { %1045 = vmatpush3.bf16.msra.mxu0 %v1112_v37 }
  0x32   : > { %1065 = vmatpush3.bf16.msra.mxu1 %v1113_v38  ;;  %1046 = vmatprep.subr.bf16.mxu0 %v1114_v40 }
  0x33   : > { %1066 = vmatprep.subr.bf16.mxu1 %v1115_v42 }
  0x35   : > { %1047 = vmatpush3.bf16.msra.mxu0 %v1114_v40 }
  0x36   : > { %1067 = vmatpush3.bf16.msra.mxu1 %v1115_v42  ;;  %1048 = vmatprep.subr.bf16.mxu0 %v1116_v47 }
  0x37   : > { %1068 = vmatprep.subr.bf16.mxu1 %v1117_v49 }
  0x39   : > { %1049 = vmatpush3.bf16.msra.mxu0 %v1116_v47 }
  0x3a   : > { %1069 = vmatpush3.bf16.msra.mxu1 %v1117_v49  ;;  %1050 = vmatprep.subr.bf16.mxu0 %v1118_v52 }
  0x3b   : > { %1070 = vmatprep.subr.bf16.mxu1 %v1119_v54 }
  0x3d   : > { %1051 = vmatpush3.bf16.msra.mxu0 %v1118_v52 }
  0x3e   : > { %1071 = vmatpush3.bf16.msra.mxu1 %v1119_v54  ;;  %1052 = vmatprep.subr.bf16.mxu0 %v1120_v55 }
  0x3f   : > { %1072 = vmatprep.subr.bf16.mxu1 %v1121_v56 }
  0x41   : > { %1053 = vmatpush3.bf16.msra.mxu0 %v1120_v55 }
  0x42   : > { %1073 = vmatpush3.bf16.msra.mxu1 %v1121_v56  ;;  %1054 = vmatprep.subr.bf16.mxu0 %v1122_v57 }
  0x43   : > { %1074 = vmatprep.subr.bf16.mxu1 %v1123_v59 }
  0x45   : > { %1055 = vmatpush3.bf16.msra.mxu0 %v1122_v57 }
  0x46   : > { %1075 = vmatpush3.bf16.msra.mxu1 %v1123_v59  ;;  %1056 = vmatprep.subr.bf16.mxu0 %v1124_v60 }
  0x47   : > { %1076 = vmatprep.subr.bf16.mxu1 %v1125_v63 }
  0x49   : > { %1057 = vmatpush3.bf16.msra.mxu0 %v1124_v60 }
  0x4a   : > { %1077 = vmatpush3.bf16.msra.mxu1 %v1125_v63 }
  0x4c   : > { %1059 = vmatmul.mubr.bf16.vlgmr.msra.gmra.mxu0 %v899_v3 }
  0x4d   : > { %1079 = vmatmul.mubr.bf16.vlgmr.msra.gmra.mxu1 %v621_v4 }
  0xec   : > { %v1020_v5 = vpop.f32.mrf.mxu0 }
  0xed   : > { %v1040_v6 = vpop.f32.mrf.mxu1 }
  0xee   : > { %v328_v7 = vpop.f32.mrf.mxu0  ;;  %v436_v12 = vadd.f32 %v1040_v6, %v1020_v5 }
  0xef   : > { %v427_v8 = vpop.f32.mrf.mxu1 }
  0xf0   : > { %v1021_v9 = vpop.f32.mrf.mxu0  ;;  %v428_v16 = vadd.f32 %v427_v8, %v328_v7 }
  0xf1   : > { %v1041_v10 = vpop.f32.mrf.mxu1 }
  0xf2   : > { %v331_v11 = vpop.f32.mrf.mxu0  ;;  %v439_v20 = vadd.f32 %v1041_v10, %v1021_v9 }
  0xf3   : > { %v430_v13 = vpop.f32.mrf.mxu1 }
  0xf4   : > { %v431_v25 = vadd.f32 %v430_v13, %v331_v11 }
 0x10c   : > { %v1060_v14 = vpop.f32.mrf.mxu0 }
 0x10d   : > { %v565_v17 = vadd.f32 %v1060_v14, %v436_v12  ;;  %v1080_v18 = vpop.f32.mrf.mxu1 }
 0x10e   : > { %v548_v19 = vpop.f32.mrf.mxu0 }
 0x10f   : > { %v723_v21 = vadd.f32 %v1080_v18, %v565_v17  ;;  %v563_v22 = vadd.f32 %v548_v19, %v428_v16  ;;  %v706_v23 = vpop.f32.mrf.mxu1 }
 0x110   : > { %v1061_v24 = vpop.f32.mrf.mxu0 }
 0x111   : > { %v734_v26 = vadd.f32 %v935_v15, %v723_v21  ;;  %v721_v27 = vadd.f32 %v706_v23, %v563_v22  ;;  %v566_v28 = vadd.f32 %v1061_v24, %v439_v20  ;;  %v1081_v29 = vpop.f32.mrf.mxu1 }
 0x112   : > { %v551_v30 = vpop.f32.mrf.mxu0 }
 0x113   : > { %v938_v31 = vmul.f32 -1.442695, %v734_v26  ;;  %v732_v32 = vadd.f32 %v935_v15, %v721_v27  ;;  %v724_v33 = vadd.f32 %v1081_v29, %v566_v28  ;;  %v564_v34 = vadd.f32 %v551_v30, %v431_v25  ;;  %v709_v35 = vpop.f32.mrf.mxu1 }
 0x115   : > { %1131 = vpow2.f32 %v938_v31  ;;  %v936_v36 = vmul.f32 -1.442695, %v732_v32  ;;  %v735_v37 = vadd.f32 %v935_v15, %v724_v33  ;;  %v722_v38 = vadd.f32 %v709_v35, %v564_v34 }
 0x117   : > { %1133 = vpow2.f32 %v936_v36  ;;  %v939_v39 = vmul.f32 -1.442695, %v735_v37  ;;  %v733_v40 = vadd.f32 %v935_v15, %v722_v38 }
 0x119   : > { %1135 = vpow2.f32 %v939_v39  ;;  %v937_v41 = vmul.f32 -1.442695, %v733_v40 }
 0x11b   : > { %1137 = vpow2.f32 %v937_v41 }
 0x122   : > { %v1132_v42 = vpop.eup %1131 }
 0x123   : > { %v750_v43 = vadd.f32 1.0, %v1132_v42 }
 0x124   : > { %v1134_v44 = vpop.eup %1133 }
 0x125   : > { %v748_v45 = vadd.f32 1.0, %v1134_v44  ;;  %1139 = vrcp.f32 %v750_v43 }
 0x126   : > { %v1136_v46 = vpop.eup %1135 }
 0x127   : > { %v751_v47 = vadd.f32 1.0, %v1136_v46  ;;  %1141 = vrcp.f32 %v748_v45 }
 0x128   : > { %v1138_v48 = vpop.eup %1137 }
 0x129   : > { %1143 = vrcp.f32 %v751_v47  ;;  %v749_v49 = vadd.f32 1.0, %v1138_v48 }
 0x12b   : > { %1145 = vrcp.f32 %v749_v49 }
 0x132   : > { %v1140_v50 = vpop.eup %1139 }
 0x133   : > { %v762_v53 = vmul.f32 %v1140_v50, %v734_v26 }
 0x134   : > { %v1142_v51 = vpop.eup %1141 }
 0x135   : > { %v760_v56 = vmul.f32 %v1142_v51, %v732_v32 }
 0x136   : > { %v1144_v52 = vpop.eup %1143 }
 0x137   : > { %v763_v54 = vmul.f32 %v1144_v52, %v735_v37 }
 0x138   : > { %v1146_v55 = vpop.eup %1145 }
 0x139   : > { %v959_v57 = vpack.c.bf16 %v763_v54, %v762_v53  ;;  %v761_v58 = vmul.f32 %v1146_v55, %v733_v40 }
 0x13b   : > { %961 = vst [vmem:[%s170_s11 + $0x8] sm:$0xff] %v959_v57   ;;  %v954_v59 = vpack.c.bf16 %v761_v58, %v760_v56 }
 0x13d   : > { %955 = vst [vmem:[%s170_s11] sm:$0xff] %v954_v59  }
 0x13e PF: > { %s13_s12 = sadd.s32 1, %s1153_s12  }
 0x13f   : > { %p10_p4 = scmp.ge.s32.totalorder %s13_s12, 4  }
 0x141   :  { %12 = sbr.rel (!%p10_p4) target bundleno = 1 (0x1), region = 65 }

// kernel: vqgan_forward.10
= control target key start
LH: loop header
LB: loop body
LE: loop exit
PB: predicated region body
PF: predicated region fallthrough
CT: control target
= control target key end

     0   :  { %s848_s0 = inlined_call_operand.vmem [shape: bf16[32,128], index: 0, kind: input, shape index: {}]   ;;  %s849_s1 = inlined_call_operand.vmem [shape: bf16[128,128], index: 1, kind: input, shape index: {}]   ;;  %s850_s2 = inlined_call_operand.vmem [shape: f32[1,128], index: 2, kind: input, shape index: {}]   ;;  %s851_s3 = inlined_call_operand.vmem [shape: f32[128,128], index: 3, kind: input, shape index: {}]   ;;  %s852_s4 = inlined_call_operand.vmem [shape: bf16[32,128], index: 4, kind: output, shape index: {0}]   ;;  %s853_s5 = inlined_call_operand.hbm [shape: s32[1,1,32], index: 5, kind: output, shape index: {1}]   ;;  %s854_s6 = inlined_call_operand.vmem [shape: f32[1,1,128], index: 6, kind: output, shape index: {2}]  }
   0x1   :  { %v628_v0 = vld [vmem:[%s849_s1 + $0x38] sm:$0xff]   ;;  %v629_v1 = vld [vmem:[%s849_s1 + $0x30] sm:$0xff]   ;;  %v630_v2 = vld [vmem:[%s849_s1 + $0x28] sm:$0xff]  }
   0x2   :  { %566 = vmatprep.subr.bf16.mxu0 %v628_v0  ;;  %v631_v3 = vld [vmem:[%s849_s1 + $0x20] sm:$0xff]   ;;  %v24_v5 = vld [vmem:[%s848_s0 + $0x8] sm:$0xff]  }
   0x3   :  { %567 = vmatpush3.bf16.msra.mxu0 %v628_v0  ;;  %v22_v4 = vld [vmem:[%s848_s0] sm:$0xff]  }
   0x4   :  { %568 = vmatprep.subr.bf16.mxu0 %v629_v1 }
   0x7   :  { %569 = vmatpush3.bf16.msra.mxu0 %v629_v1 }
   0x8   :  { %570 = vmatprep.subr.bf16.mxu0 %v630_v2 }
   0x9   :  { %12 = vsyncpa [#allocation3], 0  ;;  %v28_v6 = vunpack.c.l.bf16 %v24_v5  ;;  %v26_v7 = vunpack.c.l.bf16 %v22_v4  ;;  %v29_v8 = vunpack.c.h.bf16 %v24_v5  ;;  %v27_v9 = vunpack.c.h.bf16 %v22_v4  ;;  %582 = vmatprep.mubr.bf16.mxu0 %v22_v4  ;;  %v632_v12 = vld [vmem:[%s849_s1 + $0x18] sm:$0xff]   ;;  %v633_v15 = vld [vmem:[%s849_s1 + $0x10] sm:$0xff]   ;;  %s663_s23 = smov [#allocation2]  }
   0xa   :  { %v634_v16 = vld [vmem:[%s849_s1 + $0x8] sm:$0xff]   ;;  %v635_v17 = vld [vmem:[%s849_s1] sm:$0xff]   ;;  %v186_v21 = vlaneseq  ;;  %vm296_vm2 = vcmask 7168   ;;  %vm325_vm11 = vcmask 130112   ;;  %vm332_vm14 = vcmask 195712   ;;  %s484_s24 = sshll.u32 %s663_s23, 4  ;;  %s485_s24 = int_to_ptr.vmem [resolvable:$true] %s484_s24 }
   0xb   :  { %571 = vmatpush3.bf16.msra.mxu0 %v630_v2  ;;  %v32_v10 = vmul.f32 %v28_v6, %v28_v6  ;;  %v30_v11 = vmul.f32 %v26_v7, %v26_v7  ;;  %v33_v13 = vmul.f32 %v29_v8, %v29_v8  ;;  %v31_v14 = vmul.f32 %v27_v9, %v27_v9  ;;  %v508_v33 = vld [vmem:[%s850_s2] ss:$0 sm:$0xff]  ;;  %v370_v2 = vld [vmem:[%s851_s3 + $0x78] sm:$0xff]  ;;  %v368_v4 = vld [vmem:[%s851_s3 + $0x68] sm:$0xff]  ;;  %s640_s25 = scalar_lea.vmem %s485_s24, 16  ;;  %s644_s26 = scalar_lea.vmem %s485_s24, 32 }
   0xc   :  { %572 = vmatprep.subr.bf16.mxu0 %v631_v3  ;;  %v730_v26 = vand.u32 127, %v186_v21  ;;  %586 = vmatprep.subr.mxu1 %v370_v2  ;;  %v366_v6 = vld [vmem:[%s851_s3 + $0x58] sm:$0xff]  ;;  %v365_v7 = vld [vmem:[%s851_s3 + $0x50] sm:$0xff]  ;;  %v364_v8 = vld [vmem:[%s851_s3 + $0x48] sm:$0xff]  ;;  %vm339_vm15 = vcmask 261312   ;;  %p641_p0 = scmp.ne.s32.totalorder %s485_s24, %s640_s25  ;;  %p645_p1 = scmp.lt.s32.totalorder %s485_s24, %s485_s24 }
   0xd   :  { %38 = vadd.xlane.f32.xlu1 %v32_v10  ;;  %34 = vadd.xlane.f32.xlu0 %v30_v11  ;;  %v363_v9 = vld [vmem:[%s851_s3 + $0x40] sm:$0xff]  ;;  %v362_v10 = vld [vmem:[%s851_s3 + $0x38] sm:$0xff]  ;;  %v361_v11 = vld [vmem:[%s851_s3 + $0x30] sm:$0xff]  ;;  %p646_p2 = scmp.lt.s32.totalorder %s644_s26, %s640_s25 }
   0xe   :  { %vm188_vm0 = vcmp.lt.s32.totalorder %v730_v26, 32  ;;  %587 = vmatpush3.msra.mxu1 %v370_v2 }
   0xf   :  { %573 = vmatpush3.bf16.msra.mxu0 %v631_v3  ;;  %v369_v3 = vld [vmem:[%s851_s3 + $0x70] sm:$0xff]  ;;  %p647_p3 = por %p646_p2, %p645_p1 }
  0x10   :  { %574 = vmatprep.subr.bf16.mxu0 %v632_v12  ;;  %588 = vmatprep.subr.mxu1 %v369_v3 }
  0x11   :  { %40 = vadd.xlane.f32.xlu1 %v33_v13  ;;  %36 = vadd.xlane.f32.xlu0 %v31_v14  ;;  %v359_v13 = vld [vmem:[%s851_s3 + $0x20] sm:$0xff]  ;;  %p648_p4 = pnand %p647_p3, %p641_p0 }
  0x12   :  { %589 = vmatpush3.msra.mxu1 %v369_v3 }
  0x13   :  { %575 = vmatpush3.bf16.msra.mxu0 %v632_v12  ;;  %590 = vmatprep.subr.mxu1 %v368_v4  ;;  %v360_v12 = vld [vmem:[%s851_s3 + $0x28] sm:$0xff] }
  0x14   :  { %576 = vmatprep.subr.bf16.mxu0 %v633_v15  ;;  %591 = vmatpush3.msra.mxu1 %v368_v4 }
  0x17   :  { %577 = vmatpush3.bf16.msra.mxu0 %v633_v15 }
  0x18   :  { %578 = vmatprep.subr.bf16.mxu0 %v634_v16 }
  0x1b   :  { %579 = vmatpush3.bf16.msra.mxu0 %v634_v16 }
  0x1c   :  { %580 = vmatprep.subr.bf16.mxu0 %v635_v17 }
  0x1f   :  { %581 = vmatpush3.bf16.msra.mxu0 %v635_v17 }
  0x22   :  { %583 = vmatmul.mubr.bf16.vlgmr.msra.gmra.mxu0 %v24_v5  ;;  %v367_v5 = vld [vmem:[%s851_s3 + $0x60] sm:$0xff] }
  0x23   :  { %592 = vmatprep.subr.mxu1 %v367_v5 }
  0x24   :  { %593 = vmatpush3.msra.mxu1 %v367_v5 }
  0x25   :  { %594 = vmatprep.subr.mxu1 %v366_v6 }
  0x26   :  { %595 = vmatpush3.msra.mxu1 %v366_v6 }
  0x27   :  { %596 = vmatprep.subr.mxu1 %v365_v7 }
  0x28   :  { %597 = vmatpush3.msra.mxu1 %v365_v7 }
  0x29   :  { %598 = vmatprep.subr.mxu1 %v364_v8 }
  0x2a   :  { %599 = vmatpush3.msra.mxu1 %v364_v8 }
  0x2b   :  { %600 = vmatprep.subr.mxu1 %v363_v9 }
  0x2c   :  { %601 = vmatpush3.msra.mxu1 %v363_v9 }
  0x2d   :  { %602 = vmatprep.subr.mxu1 %v362_v10 }
  0x2e   :  { %603 = vmatpush3.msra.mxu1 %v362_v10 }
  0x2f   :  { %604 = vmatprep.subr.mxu1 %v361_v11 }
  0x30   :  { %605 = vmatpush3.msra.mxu1 %v361_v11 }
  0x31   :  { %606 = vmatprep.subr.mxu1 %v360_v12 }
  0x32   :  { %607 = vmatpush3.msra.mxu1 %v360_v12 }
  0x33   :  { %608 = vmatprep.subr.mxu1 %v359_v13 }
  0x34   :  { %609 = vmatpush3.msra.mxu1 %v359_v13 }
  0x96   :  { %v39_v18 = vpop.xlane.xlu1 %38  ;;  %v35_v20 = vpop.xlane.xlu0 %34 }
  0x9a   :  { %v41_v30 = vpop.xlane.xlu1 %40  ;;  %v37_v32 = vpop.xlane.xlu0 %36 }
  0xe2   :  { %v584_v19 = vpop.f32.mrf.mxu0 }
  0xe3   :  { %v169_v22 = vmul.f32 2.0, %v584_v19 }
  0xe4   :  { %v152_v23 = vpop.f32.mrf.mxu0 }
  0xe5   :  { %v167_v24 = vmul.f32 2.0, %v152_v23  ;;  %v173_v27 = vsub.f32 %v39_v18, %v169_v22 }
  0xe6   :  { %v585_v25 = vpop.f32.mrf.mxu0 }
  0xe7   :  { %v170_v28 = vmul.f32 2.0, %v585_v25  ;;  %v171_v29 = vsub.f32 %v35_v20, %v167_v24  ;;  %v184_v39 = vadd.f32 %v508_v33, %v173_v27 }
  0xe8   :  { %v155_v31 = vpop.f32.mrf.mxu0 }
  0xe9   :  { %v168_v34 = vmul.f32 2.0, %v155_v31  ;;  %v182_v35 = vadd.f32 %v508_v33, %v171_v29  ;;  %v174_v36 = vsub.f32 %v41_v30, %v170_v28  ;;  %v191_v41 = vsel %vm188_vm0, %v184_v39, inf  ;;  %v357_v39 = vld [vmem:[%s851_s3 + $0x10] sm:$0xff] }
  0xeb   :  { %v172_v37 = vsub.f32 %v37_v32, %v168_v34  ;;  %v189_v38 = vsel %vm188_vm0, %v182_v35, inf  ;;  %v185_v43 = vadd.f32 %v508_v33, %v174_v36 }
  0xec   :  { %193 = vmin.xlane.f32.xlu0 %v189_v38 }
  0xed   :  { %v183_v40 = vadd.f32 %v508_v33, %v172_v37  ;;  %v192_v44 = vsel %vm188_vm0, %v185_v43, inf }
  0xef   :  { %v190_v42 = vsel %vm188_vm0, %v183_v40, inf  ;;  %v356_v40 = vld [vmem:[%s851_s3 + $0x8] sm:$0xff] }
  0xf0   :  { %197 = vmin.xlane.f32.xlu0 %v191_v41  ;;  %195 = vmin.xlane.f32.xlu1 %v190_v42 }
  0xf4   :  { %199 = vmin.xlane.f32.xlu1 %v192_v44 }
 0x175   :  { %v194_v45 = vpop.xlane.xlu0 %193 }
 0x176   :  { %vm201_vm1 = vcmp.le.f32.partialorder %v189_v38, %v194_v45  ;;  %v288_v47 = vmax.f32 %v194_v45, 0.0  ;;  %v358_v38 = vld [vmem:[%s851_s3 + $0x18] sm:$0xff]  ;;  %v317_v45 = vshrl.u32 %v186_v21, 7 }
 0x177   :  { %v737_v46 = vsel %vm201_vm1, %v730_v26, 32  ;;  %610 = vmatprep.subr.mxu1 %v358_v38  ;;  %vm341_vm1 = vcmask 253952  }
 0x178   :  { %v210_v48 = vshra.s32 %v737_v46, 16  ;;  %v297_v55 = vsel %vm296_vm2, %v288_v47, 0.0  ;;  %v209_v14 = vand.u32 65535, %v737_v46  ;;  %611 = vmatpush3.msra.mxu1 %v358_v38  ;;  %v320_v46 = vadd.s32 4294967288, %v730_v26 }
 0x179   :  { %v196_v49 = vpop.xlane.xlu1 %195  ;;  %v740_v50 = vpop.xlane.xlu0 %197  ;;  %612 = vmatprep.subr.mxu1 %v357_v39 }
 0x17a   :  { %vm202_vm3 = vcmp.le.f32.partialorder %v190_v42, %v196_v49  ;;  %v289_v51 = vmax.f32 %v196_v49, 0.0  ;;  %vm203_vm4 = vcmp.le.f32.partialorder %v191_v41, %v740_v50  ;;  %v212_v54 = vcvt.s32.f32 %v210_v48  ;;  %613 = vmatpush3.msra.mxu1 %v357_v39  ;;  %v355_v41 = vld [vmem:[%s851_s3] sm:$0xff] }
 0x17b   :  { %v744_v52 = vsel %vm202_vm3, %v730_v26, 32  ;;  %v747_v53 = vsel %vm203_vm4, %v730_v26, 32  ;;  %v290_v16 = vmax.f32 %v740_v50, 0.0  ;;  %v211_v18 = vcvt.s32.f32 %v209_v14  ;;  %614 = vmatprep.subr.mxu1 %v356_v40 }
 0x17c   :  { %v298_v56 = vsel %vm296_vm2, %v289_v51, 0.0  ;;  %v224_v57 = vshra.s32 %v744_v52, 16  ;;  %v238_v58 = vshra.s32 %v747_v53, 16  ;;  %213 = vmin.xlane.f32.xlu0 %v212_v54  ;;  %v223_v15 = vand.u32 65535, %v744_v52  ;;  %615 = vmatpush3.msra.mxu1 %v356_v40 }
 0x17d   :  { %v753_v59 = vadd.f32 %v298_v56, %v297_v55  ;;  %v755_v60 = vpop.xlane.xlu1 %199  ;;  %v237_v19 = vand.u32 65535, %v747_v53  ;;  %v300_v27 = vsel %vm296_vm2, %v290_v16, 0.0  ;;  %616 = vmatprep.subr.mxu1 %v355_v41  ;;  %v327_v50 = vadd.s32 4294967280, %v730_v26 }
 0x17e   :  { %vm204_vm5 = vcmp.le.f32.partialorder %v192_v44, %v755_v60  ;;  %v226_v61 = vcvt.s32.f32 %v224_v57  ;;  %v758_v62 = vcvt.s32.f32 %v238_v58  ;;  %v291_v20 = vmax.f32 %v755_v60, 0.0  ;;  %617 = vmatpush3.msra.mxu1 %v355_v41 }
 0x17f   :  { %v761_v63 = vsel %vm204_vm5, %v730_v26, 32  ;;  %v225_v24 = vcvt.s32.f32 %v223_v15  ;;  %v239_v29 = vcvt.s32.f32 %v237_v19  ;;  %v301_v31 = vadd.f32 %v300_v27, %v753_v59 }
 0x180   :  { %227 = vmin.xlane.f32.xlu1 %v226_v61  ;;  %v252_v0 = vshra.s32 %v761_v63, 16  ;;  %241 = vmin.xlane.f32.xlu0 %v758_v62  ;;  %v251_v25 = vand.u32 65535, %v761_v63  ;;  %v302_v33 = vsel %vm296_vm2, %v291_v20, 0.0  ;;  %v323_v56 = vsub.s32 %v320_v46, %v317_v45 }
 0x181   :  { %v303_v37 = vadd.f32 %v302_v33, %v301_v31  ;;  %v318_v59 = vsub.s32 %v730_v26, %v317_v45  ;;  %v330_v21 = vsub.s32 %v327_v50, %v317_v45  ;;  %v662_v63 = vmov 1.0  }
 0x182   :  { %v765_v1 = vcvt.s32.f32 %v252_v0  ;;  %v253_v35 = vcvt.s32.f32 %v251_v25 }
 0x184   :  { %255 = vmin.xlane.f32.xlu1 %v765_v1 }
 0x205   :  { %v214_v17 = vpop.xlane.xlu0 %213 }
 0x206   :  { %vm215_vm6 = vcmp.eq.f32.partialorder %v212_v54, %v214_v17  ;;  %v220_v42 = vcvt.f32.s32 %v214_v17  ;;  %v334_v54 = vadd.s32 4294967272, %v730_v26 }
 0x207   :  { %v216_v22 = vsel %vm215_vm6, %v211_v18, inf }
 0x208   :  { %217 = vmin.xlane.f32.xlu0 %v216_v22  ;;  %v221_v47 = vshll.u32 %v220_v42, 16  ;;  %v337_v2 = vsub.s32 %v334_v54, %v317_v45 }
 0x209   :  { %v228_v23 = vpop.xlane.xlu1 %227  ;;  %v242_v28 = vpop.xlane.xlu0 %241 }
 0x20a   :  { %vm229_vm7 = vcmp.eq.f32.partialorder %v226_v61, %v228_v23  ;;  %vm243_vm8 = vcmp.eq.f32.partialorder %v758_v62, %v242_v28  ;;  %v234_v43 = vcvt.f32.s32 %v228_v23  ;;  %v248_v48 = vcvt.f32.s32 %v242_v28 }
 0x20b   :  { %v230_v30 = vsel %vm229_vm7, %v225_v24, inf  ;;  %v244_v32 = vsel %vm243_vm8, %v239_v29, inf }
 0x20c   :  { %231 = vmin.xlane.f32.xlu1 %v230_v30  ;;  %245 = vmin.xlane.f32.xlu0 %v244_v32  ;;  %v235_v55 = vshll.u32 %v234_v43, 16  ;;  %v249_v60 = vshll.u32 %v248_v48, 16 }
 0x20d   :  { %v256_v34 = vpop.xlane.xlu1 %255 }
 0x20e   :  { %vm257_vm9 = vcmp.eq.f32.partialorder %v765_v1, %v256_v34  ;;  %v262_v51 = vcvt.f32.s32 %v256_v34 }
 0x20f   :  { %v258_v36 = vsel %vm257_vm9, %v253_v35, inf }
 0x210   :  { %259 = vmin.xlane.f32.xlu1 %v258_v36  ;;  %304 = vadd.xlane.f32.xlu0 %v303_v37  ;;  %v263_v0 = vshll.u32 %v262_v51, 16 }
 0x291   :  { %v218_v44 = vpop.xlane.xlu0 %217 }
 0x292   :  { %v219_v49 = vcvt.f32.s32 %v218_v44 }
 0x294   :  { %v222_v53 = vadd.s32 %v221_v47, %v219_v49 }
 0x295   :  { %v232_v52 = vpop.xlane.xlu1 %231  ;;  %v246_v58 = vpop.xlane.xlu0 %245 }
 0x296   :  { %v233_v57 = vcvt.f32.s32 %v232_v52  ;;  %v247_v61 = vcvt.f32.s32 %v246_v58  ;;  %vm343_vm10 = vcmp.eq.s32.totalorder %v730_v26, %v222_v53  ;;  %v319_v5 = vrot.slane %v222_v53, %v318_v59 }
 0x297   :  { %618 = vmatprep.mubr.msk.f32.mxu1 %vm343_vm10, %v662_v63 }
 0x298   :  { %v236_v62 = vadd.s32 %v235_v55, %v233_v57  ;;  %v250_v1 = vadd.s32 %v249_v60, %v247_v61 }
 0x299   :  { %v260_v3 = vpop.xlane.xlu1 %259  ;;  %v305_v7 = vpop.xlane.xlu0 %304 }
 0x29a   :  { %v324_v4 = vrot.slane %v236_v62, %v323_v56  ;;  %v261_v6 = vcvt.f32.s32 %v260_v3  ;;  %vm344_vm12 = vcmp.eq.s32.totalorder %v730_v26, %v236_v62  ;;  %v331_v8 = vrot.slane %v250_v1, %v330_v21 }
 0x29b   :  { %v306_v9 = vrot.slane %v305_v7, 4  ;;  %619 = vmatmul.mubr.msk.f32.vlgmr.msra.gmra.mxu1 %vm344_vm12, %v662_v63  ;;  %vm345_vm13 = vcmp.eq.s32.totalorder %v730_v26, %v250_v1 }
 0x29c   :  { %v264_v10 = vadd.s32 %v263_v0, %v261_v6  ;;  %621 = vmatprep.mubr.msk.f32.mxu1 %vm345_vm13, %v662_v63  ;;  %v326_v11 = vsel %vm325_vm11, %v324_v4, %v319_v5 }
 0x29d   :  { %v307_v12 = vadd.f32 %v306_v9, %v305_v7  ;;  %v333_v15 = vsel %vm332_vm14, %v331_v8, %v326_v11 }
 0x29e   :  { %v338_v13 = vrot.slane %v264_v10, %v337_v2  ;;  %vm346_vm0 = vcmp.eq.s32.totalorder %v730_v26, %v264_v10 }
 0x29f   :  { %v308_v14 = vrot.slane %v307_v12, 2  ;;  %622 = vmatmul.mubr.msk.f32.gmra.mxu1 %vm346_vm0, %v662_v63 }
 0x2a0   :  { %v340_v16 = vsel %vm339_vm15, %v338_v13, %v333_v15 }
 0x2a1   :  { %v309_v17 = vadd.f32 %v308_v14, %v307_v12  ;;  %342 = vst.msk [vmem:[#allocation2] sm:$0x1] %vm341_vm1, %v340_v16 }
 0x2a3   :  { %v310_v18 = vrot.slane %v309_v17, 1 }
 0x2a5   :  { %v311_v19 = vadd.f32 %v310_v18, %v309_v17 }
 0x2a7   :  { %624 = vpush %v311_v19 }
 0x2d8   :  { %s625_s3 = spop %624 }
 0x2d9   :  { %v313_v20 = vstv %s625_s3 }
 0x2da   :  { %315 = vst [vmem:[%s854_s6] sm:$0x1] %v313_v20 }
 0x2db   :  { %651 = shalt.err (!%p648_p4)
}
 0x2dc   :  { %487 = dma.vmem_to_hbm [thread:$0]  %s485_s24, 16, %s853_s5, [#allocation3]  }
 0x35b   :  { %v620_v26 = vpop.f32.mrf.mxu1 }
 0x35d   :  { %v437_v22 = vpop.f32.mrf.mxu1 }
 0x35e   :  { %v528_v23 = vpack.c.bf16 %v620_v26, %v437_v22 }
 0x35f   :  { %v623_v24 = vpop.f32.mrf.mxu1 }
 0x360   :  { %529 = vst [vmem:[%s852_s4] sm:$0xff] %v528_v23  }
 0x361   :  { %v447_v25 = vpop.f32.mrf.mxu1 }
 0x362   :  { %v533_v27 = vpack.c.bf16 %v623_v24, %v447_v25 }
 0x364   :  { %535 = vst [vmem:[%s852_s4 + $0x8] sm:$0xff] %v533_v27  }
 0x365   :  { %660 = dma.done.wait [#allocation3], 16  }
 0x366   :  { %661 = vsyncadd [#allocation3], 4294967280 }
 0x367   :  { %497 = vsyncpa [#allocation3], 1 }

// kernel: vqgan_forward.9
= control target key start
LH: loop header
LB: loop body
LE: loop exit
PB: predicated region body
PF: predicated region fallthrough
CT: control target
= control target key end

     0   :  { %s2125_s12 = smov 0   ;;  %s2447_s0 = inlined_call_operand.vmem [shape: bf16[2,64,128], index: 0, kind: input, shape index: {}]   ;;  %s2448_s1 = inlined_call_operand.vmem [shape: bf16[9,128,128], index: 1, kind: input, shape index: {}]   ;;  %s2449_s2 = inlined_call_operand.vmem [shape: f32[1,128], index: 2, kind: input, shape index: {}]   ;;  %s2450_s3 = inlined_call_operand.vmem [shape: bf16[2,32,128], index: 3, kind: output, shape index: {}]  }
   0x1 LB: > { %s1482_s13 = sadd.s32 4294967295, %s2103_s12   ;;  %p1486_p0 = scmp.ge.s32.totalorder %s2103_s12, 1  ;;  %s2103_s12 = sphi %s2125_s12, %s13_s12  }
   0x2   : > { %p137_p1 = scmp.lt.s32.totalorder %s2103_s12, 3 }
   0x4   : > { %p138_p2 = pnand %p1486_p0, %p137_p1 }
   0x5   : > { %p161_p3 = scmp.lt.s32.totalorder (!%p138_p2), %s1482_s13, 1 }
   0x6   : > { %141 = sbr.rel (%p138_p2) target bundleno = 378 (0x17a), region = 32 }
   0xb   : > { %v2009_v0 = vld [vmem:[%s2448_s1 + $0x78] sm:$0xff]   ;;  %v2011_v2 = vld [vmem:[%s2448_s1 + $0x70] sm:$0xff]   ;;  %v2013_v4 = vld [vmem:[%s2448_s1 + $0x68] sm:$0xff]   ;;  %s2452_s13 = smov (!%p161_p3, %s1482_s13), 1  ;;  %vm223_vm0 = vsmask.f32 7424 }
   0xc   : > { %v2010_v1 = vld [vmem:[%s2448_s1 + $0x38] sm:$0xff]   ;;  %1821 = vmatprep.subr.bf16.mxu0 %v2009_v0  ;;  %v2012_v3 = vld [vmem:[%s2448_s1 + $0x30] sm:$0xff]   ;;  %v2014_v5 = vld [vmem:[%s2448_s1 + $0x28] sm:$0xff]   ;;  %s1714_s30 = sshll.u32 %s2452_s13, 5  ;;  %vm463_vm1 = vcmask 1046528   ;;  %s1715_s18 = sshll.u32 %s2452_s13, 4 }
   0xd   : > { %1841 = vmatprep.subr.bf16.mxu1 %v2010_v1  ;;  %1822 = vmatpush3.bf16.msra.mxu0 %v2009_v0  ;;  %v2015_v6 = vld [vmem:[%s2448_s1 + $0x60] sm:$0xff]   ;;  %v2017_v8 = vld [vmem:[%s2448_s1 + $0x58] sm:$0xff]   ;;  %s2169_s10 = scalar_lea.vmem %s2447_s0, %s1714_s30  ;;  %v2019_v10 = vld [vmem:[%s2448_s1 + $0x50] sm:$0xff]   ;;  %s170_s21 = scalar_lea.vmem %s2450_s3, %s1715_s18 }
   0xe   : > { %1842 = vmatpush3.bf16.msra.mxu1 %v2010_v1  ;;  %1823 = vmatprep.subr.bf16.mxu0 %v2011_v2  ;;  %v2016_v7 = vld [vmem:[%s2448_s1 + $0x20] sm:$0xff]   ;;  %v2018_v9 = vld [vmem:[%s2448_s1 + $0x18] sm:$0xff]   ;;  %v174_v13 = vld [vmem:[%s2169_s10 + $0x8] sm:$0xf] }
   0xf   : > { %1843 = vmatprep.subr.bf16.mxu1 %v2012_v3  ;;  %v172_v11 = vld [vmem:[%s2169_s10] sm:$0xf]  ;;  %v173_v12 = vld [vmem:[%s2169_s10 + $0x4] sm:$0xf]  ;;  %v2020_v14 = vld [vmem:[%s2448_s1 + $0x10] sm:$0xff]  }
  0x10   : > { %v2181_v15 = vld [vmem:[%s2169_s10 + $0xc] sm:$0xf]  ;;  %v1507_v16 = vcombine.low %v172_v11, %v173_v12  ;;  %v2187_v18 = vld [vmem:[%s2169_s10 + $0x10] ss:$0 sps:$4 sm:$0x11]   ;;  %v2023_v29 = vld [vmem:[%s2448_s1 + $0x40] sm:$0xff]   ;;  %v1567_v39 = vcombine.low %v173_v12, %v174_v13 }
  0x11   : > { %1824 = vmatpush3.bf16.msra.mxu0 %v2011_v2  ;;  %v2184_v17 = vcombine.low %v174_v13, %v2181_v15  ;;  %v2021_v21 = vld [vmem:[%s2448_s1 + $0x48] sm:$0xff]   ;;  %v240_v28 = vshll.u32 %v2187_v18, 16  ;;  %v2024_v30 = vld [vmem:[%s2448_s1] sm:$0xff]   ;;  %v2028_v34 = vld [vmem:[%s2448_s1 + $0xb8] sm:$0xff]   ;;  %v467_v1 = vrot.slane %v2187_v18, 1 }
  0x12   : > { %1844 = vmatpush3.bf16.msra.mxu1 %v2012_v3  ;;  %1825 = vmatprep.subr.bf16.mxu0 %v2013_v4  ;;  %v225_v19 = vshrl.u32 %v1507_v16, 16  ;;  %v227_v20 = vshll.u32 %v1507_v16, 16  ;;  %v2022_v23 = vld [vmem:[%s2448_s1 + $0x8] sm:$0xff]   ;;  %v2029_v35 = vld [vmem:[%s2448_s1 + $0xf8] sm:$0xff]   ;;  %v2030_v37 = vld [vmem:[%s2448_s1 + $0xb0] sm:$0xff]  }
  0x13   : > { %1845 = vmatprep.subr.bf16.mxu1 %v2014_v5  ;;  %1857 = vmatprep.mubr.bf16.mxu1 %v1507_v16  ;;  %v232_v22 = vshll.u32 %v2184_v17, 16  ;;  %v236_v27 = vshrl.u32 %v2184_v17, 16  ;;  %v242_v33 = vrot.slane %v240_v28, 1  ;;  %v2031_v38 = vld [vmem:[%s2448_s1 + $0xf0] sm:$0xff]   ;;  %v442_v40 = vld [vmem:[%s2169_s10] sm:$0xe] }
  0x14   : > { %v229_v24 = vrot.slane %v227_v20, 1  ;;  %v2032_v41 = vld [vmem:[%s2448_s1 + $0xa8] sm:$0xff]   ;;  %v1542_v42 = vcombine.low %v442_v40, %v173_v12  ;;  %v465_v43 = vrot.slane %v2184_v17, 1  ;;  %v2034_v46 = vld [vmem:[%s2448_s1 + $0xa0] sm:$0xff]   ;;  %v2036_v49 = vld [vmem:[%s2448_s1 + $0x98] sm:$0xff]  }
  0x15   : > { %1826 = vmatpush3.bf16.msra.mxu0 %v2013_v4  ;;  %v234_v25 = vrot.slane %v232_v22, 1  ;;  %v2033_v44 = vld [vmem:[%s2448_s1 + $0xe8] sm:$0xff]   ;;  %v2035_v48 = vld [vmem:[%s2448_s1 + $0xe0] sm:$0xff]   ;;  %v2037_v50 = vld [vmem:[%s2448_s1 + $0xd8] sm:$0xff]  }
  0x16   : > { %1846 = vmatpush3.bf16.msra.mxu1 %v2014_v5  ;;  %1827 = vmatprep.subr.bf16.mxu0 %v2015_v6  ;;  %v230_v26 = vor.u32 %v229_v24, %v225_v19  ;;  %v464_v45 = vrot.slane %v1542_v42, 1  ;;  %v2038_v51 = vld [vmem:[%s2448_s1 + $0x90] sm:$0xff]   ;;  %v2040_v53 = vld [vmem:[%s2448_s1 + $0x88] sm:$0xff]   ;;  %v697_v55 = vld [vmem:[%s2169_s10 + $0x4] sm:$0xf]  ;;  %v468_v11 = vsel %vm463_vm1, %v465_v43, %v467_v1 }
  0x17   : > { %1847 = vmatprep.subr.bf16.mxu1 %v2016_v7  ;;  %v238_v32 = vor.u32 %v236_v27, %v234_v25  ;;  %v2039_v52 = vld [vmem:[%s2448_s1 + $0xd0] sm:$0xff]   ;;  %v2041_v54 = vld [vmem:[%s2448_s1 + $0xc8] sm:$0xff]   ;;  %v2042_v62 = vld [vmem:[%s2448_s1 + $0x80] sm:$0xff]  }
  0x18   : > { %v235_v31 = vsel %vm223_vm0, %v230_v26, %v234_v25  ;;  %v466_v47 = vsel %vm463_vm1, %v464_v45, %v465_v43  ;;  %v2254_v56 = vld [vmem:[%s2169_s10 + $0x8] sm:$0xf]  ;;  %v2257_v57 = vld [vmem:[%s2169_s10 + $0xc] sm:$0xf]  ;;  %v2260_v58 = vld [vmem:[%s2169_s10 + $0x10] sm:$0xf] }
  0x19   : > { %1828 = vmatpush3.bf16.msra.mxu0 %v2015_v6  ;;  %1837 = vmatprep.mubr.bf16.mxu0 %v235_v31  ;;  %v243_v36 = vsel %vm223_vm0, %v238_v32, %v242_v33  ;;  %v1593_v59 = vcombine.low %v697_v55, %v2254_v56  ;;  %v2265_v60 = vcombine.low %v2257_v57, %v2260_v58  ;;  %v855_v63 = vld [vmem:[%s2169_s10 + $0x4] sm:$0xe]  ;;  %v2045_v2 = vld [vmem:[%s2448_s1 + $0x138] sm:$0xff]   ;;  %v2049_v16 = vld [vmem:[%s2448_s1 + $0x130] sm:$0xff]  }
  0x1a   : > { %1848 = vmatpush3.bf16.msra.mxu1 %v2016_v7  ;;  %1829 = vmatprep.subr.bf16.mxu0 %v2017_v8  ;;  %v2043_v0 = vld [vmem:[%s2448_s1 + $0xc0] sm:$0xff]   ;;  %v1620_v6 = vcombine.low %v855_v63, %v2254_v56  ;;  %v572_v7 = vld [vmem:[%s2169_s10 + $0x10] sm:$0xf]  ;;  %v2051_v19 = vld [vmem:[%s2448_s1 + $0x128] sm:$0xff]  }
  0x1b   : > { %1849 = vmatprep.subr.bf16.mxu1 %v2018_v9  ;;  %v735_v61 = vshll.u32 %v1593_v59, 16  ;;  %v733_v3 = vshrl.u32 %v1593_v59, 16  ;;  %v740_v5 = vshll.u32 %v2265_v60, 16  ;;  %v1568_v12 = vcombine.low %v2181_v15, %v572_v7  ;;  %v2052_v20 = vld [vmem:[%s2448_s1 + $0x168] sm:$0xff]   ;;  %v2054_v22 = vld [vmem:[%s2448_s1 + $0x160] sm:$0xff]   ;;  %v2056_v24 = vld [vmem:[%s2448_s1 + $0x158] sm:$0xff]  }
  0x1c   : > { %v876_v13 = vrot.slane %v1620_v6, 1  ;;  %v2057_v25 = vld [vmem:[%s2448_s1 + $0x110] sm:$0xff]   ;;  %v1109_v26 = vld [vmem:[%s2169_s10 + $0x8] sm:$0xf]  ;;  %v2324_v28 = vld [vmem:[%s2169_s10 + $0xc] sm:$0xf] }
  0x1d   : > { %1830 = vmatpush3.bf16.msra.mxu0 %v2017_v8  ;;  %v737_v4 = vrot.slane %v735_v61, 1  ;;  %v2048_v8 = vld [vmem:[%s2448_s1 + $0x178] sm:$0xff]   ;;  %v2065_v27 = vld [vmem:[%s2169_s10 + $0x14] ss:$0 sps:$4 sm:$0x11]   ;;  %v2059_v31 = vld [vmem:[%s2448_s1 + $0x108] sm:$0xff]  }
  0x1e   : > { %1850 = vmatpush3.bf16.msra.mxu1 %v2018_v9  ;;  %1831 = vmatprep.subr.bf16.mxu0 %v2019_v10  ;;  %v2060_v32 = vld [vmem:[%s2448_s1 + $0x148] sm:$0xff]   ;;  %v748_v33 = vshll.u32 %v2065_v27, 16  ;;  %v879_v45 = vrot.slane %v2065_v27, 1  ;;  %v2076_v61 = vld [vmem:[%s2448_s1 + $0x1d8] sm:$0xff]   ;;  %v2078_v63 = vld [vmem:[%s2448_s1 + $0x1d0] sm:$0xff]  }
  0x1f   : > { %1851 = vmatprep.subr.bf16.mxu1 %v2020_v14  ;;  %v738_v9 = vor.u32 %v737_v4, %v733_v3  ;;  %v2071_v55 = vld [vmem:[%s2448_s1 + $0x1a8] sm:$0xff]   ;;  %v2088_v1 = vld [vmem:[%s2169_s10 + $0x18] ss:$0 sps:$4 sm:$0x11]   ;;  %v2081_v4 = vld [vmem:[%s2448_s1 + $0x180] sm:$0xff]  }
  0x20   : > { %v2072_v59 = vld [vmem:[%s2448_s1 + $0x1e8] sm:$0xff]   ;;  %v1160_v6 = vshll.u32 %v2088_v1, 16  ;;  %v2082_v7 = vld [vmem:[%s2448_s1 + $0x1c0] sm:$0xff]  }
  0x21   : > { %1832 = vmatpush3.bf16.msra.mxu0 %v2019_v10  ;;  %v2284_v10 = vrot.slane %v740_v5, 1  ;;  %v1267_v3 = vld [vmem:[%s2169_s10 + $0x8] sm:$0xe] }
  0x22   : > { %1852 = vmatpush3.bf16.msra.mxu1 %v2020_v14  ;;  %1833 = vmatprep.subr.bf16.mxu0 %v2021_v21  ;;  %v877_v14 = vrot.slane %v2265_v60, 1 }
  0x23   : > { %1853 = vmatprep.subr.bf16.mxu1 %v2022_v23  ;;  %v743_v18 = vsel %vm223_vm0, %v738_v9, %v2284_v10  ;;  %v984_v9 = vld [vmem:[%s2169_s10 + $0x14] sm:$0xf] }
  0x24   : > { %v878_v15 = vsel %vm463_vm1, %v876_v13, %v877_v14 }
  0x25   : > { %1834 = vmatpush3.bf16.msra.mxu0 %v2021_v21  ;;  %v2053_v21 = vld [vmem:[%s2448_s1 + $0x120] sm:$0xff]  }
  0x26   : > { %1854 = vmatpush3.bf16.msra.mxu1 %v2022_v23  ;;  %1835 = vmatprep.subr.bf16.mxu0 %v2023_v29  ;;  %v2055_v23 = vld [vmem:[%s2448_s1 + $0x118] sm:$0xff]  }
  0x27   : > { %1855 = vmatprep.subr.bf16.mxu1 %v2024_v30 }
  0x29   : > { %1836 = vmatpush3.bf16.msra.mxu0 %v2023_v29  ;;  %v2058_v29 = vld [vmem:[%s2448_s1 + $0x150] sm:$0xff]  }
  0x2a   : > { %1856 = vmatpush3.bf16.msra.mxu1 %v2024_v30  ;;  %1861 = vmatprep.subr.bf16.mxu0 %v2028_v34  ;;  %v1671_v30 = vcombine.low %v1109_v26, %v2324_v28 }
  0x2b   : > { %1881 = vmatprep.subr.bf16.mxu1 %v2029_v35 }
  0x2c   : > { %1838 = vmatmul.mubr.bf16.vlgmr.msra.gmra.mxu0 %v243_v36  ;;  %v1147_v36 = vshll.u32 %v1671_v30, 16 }
  0x2d   : > { %1858 = vmatmul.mubr.bf16.vlgmr.msra.gmra.mxu1 %v2184_v17  ;;  %1862 = vmatpush3.bf16.msra.mxu0 %v2028_v34  ;;  %v2050_v17 = vld [vmem:[%s2448_s1 + $0x170] sm:$0xff]   ;;  %v744_v34 = vshrl.u32 %v2265_v60, 16  ;;  %v2075_v60 = vld [vmem:[%s2448_s1 + $0x198] sm:$0xff]  }
  0x2e   : > { %1882 = vmatpush3.bf16.msra.mxu1 %v2029_v35  ;;  %1863 = vmatprep.subr.bf16.mxu0 %v2030_v37  ;;  %v2338_v35 = vld [vmem:[%s2169_s10 + $0x10] sm:$0xff]   ;;  %v1149_v42 = vrot.slane %v1147_v36, 1 }
  0x2f   : > { %1883 = vmatprep.subr.bf16.mxu1 %v2031_v38  ;;  %1897 = vmatprep.mubr.bf16.mxu1 %v1567_v39  ;;  %v750_v39 = vrot.slane %v748_v33, 1  ;;  %v746_v40 = vor.u32 %v744_v34, %v2284_v10  ;;  %v1152_v43 = vshll.u32 %v2338_v35, 16  ;;  %v1156_v5 = vshrl.u32 %v2338_v35, 16  ;;  %v2085_v10 = vld [vmem:[%s2448_s1 + $0x238] sm:$0xff]  }
  0x30   : > { %1877 = vmatprep.mubr.bf16.mxu0 %v466_v47 }
  0x31   : > { %1864 = vmatpush3.bf16.msra.mxu0 %v2030_v37  ;;  %v2061_v37 = vld [vmem:[%s2448_s1 + $0x100] sm:$0xff]   ;;  %v751_v47 = vsel %vm223_vm0, %v746_v40, %v750_v39 }
  0x32   : > { %1884 = vmatpush3.bf16.msra.mxu1 %v2031_v38  ;;  %1865 = vmatprep.subr.bf16.mxu0 %v2032_v41  ;;  %v2062_v38 = vld [vmem:[%s2448_s1 + $0x140] sm:$0xff]  }
  0x33   : > { %1885 = vmatprep.subr.bf16.mxu1 %v2033_v44 }
  0x35   : > { %1866 = vmatpush3.bf16.msra.mxu0 %v2032_v41  ;;  %v1145_v41 = vshrl.u32 %v1671_v30, 16 }
  0x36   : > { %1886 = vmatpush3.bf16.msra.mxu1 %v2033_v44  ;;  %1867 = vmatprep.subr.bf16.mxu0 %v2034_v46  ;;  %v2066_v44 = vld [vmem:[%s2448_s1 + $0x1b8] sm:$0xff]  }
  0x37   : > { %1887 = vmatprep.subr.bf16.mxu1 %v2035_v48 }
  0x39   : > { %1868 = vmatpush3.bf16.msra.mxu0 %v2034_v46  ;;  %v2068_v46 = vld [vmem:[%s2448_s1 + $0x1f8] sm:$0xff]  }
  0x3a   : > { %1888 = vmatpush3.bf16.msra.mxu1 %v2035_v48  ;;  %1869 = vmatprep.subr.bf16.mxu0 %v2036_v49  ;;  %v1150_v48 = vor.u32 %v1149_v42, %v1145_v41 }
  0x3b   : > { %1889 = vmatprep.subr.bf16.mxu1 %v2037_v50 }
  0x3d   : > { %1870 = vmatpush3.bf16.msra.mxu0 %v2036_v49  ;;  %v1154_v49 = vrot.slane %v1152_v43, 1 }
  0x3e   : > { %1890 = vmatpush3.bf16.msra.mxu1 %v2037_v50  ;;  %1871 = vmatprep.subr.bf16.mxu0 %v2038_v51  ;;  %v880_v50 = vsel %vm463_vm1, %v877_v14, %v879_v45  ;;  %v1289_v14 = vrot.slane %v2338_v35, 1 }
  0x3f   : > { %1891 = vmatprep.subr.bf16.mxu1 %v2039_v52 }
  0x41   : > { %1872 = vmatpush3.bf16.msra.mxu0 %v2038_v51  ;;  %v2069_v51 = vld [vmem:[%s2448_s1 + $0x1b0] sm:$0xff]  }
  0x42   : > { %1892 = vmatpush3.bf16.msra.mxu1 %v2039_v52  ;;  %1873 = vmatprep.subr.bf16.mxu0 %v2040_v53  ;;  %v2070_v52 = vld [vmem:[%s2448_s1 + $0x1f0] sm:$0xff]  }
  0x43   : > { %1893 = vmatprep.subr.bf16.mxu1 %v2041_v54 }
  0x45   : > { %1874 = vmatpush3.bf16.msra.mxu0 %v2040_v53  ;;  %v1645_v53 = vcombine.low %v2254_v56, %v2257_v57  ;;  %v2073_v56 = vld [vmem:[%s2448_s1 + $0x1a0] sm:$0xff]  }
  0x46   : > { %1894 = vmatpush3.bf16.msra.mxu1 %v2041_v54  ;;  %1875 = vmatprep.subr.bf16.mxu0 %v2042_v62  ;;  %v1155_v54 = vsel %vm223_vm0, %v1150_v48, %v1154_v49  ;;  %v2074_v57 = vld [vmem:[%s2448_s1 + $0x1e0] sm:$0xff]  }
  0x47   : > { %1895 = vmatprep.subr.bf16.mxu1 %v2043_v0 }
  0x49   : > { %1876 = vmatpush3.bf16.msra.mxu0 %v2042_v62  ;;  %v2077_v62 = vld [vmem:[%s2448_s1 + $0x190] sm:$0xff]  }
  0x4a   : > { %1896 = vmatpush3.bf16.msra.mxu1 %v2043_v0  ;;  %1901 = vmatprep.subr.bf16.mxu0 %v2045_v2  ;;  %v2079_v0 = vld [vmem:[%s2448_s1 + $0x188] sm:$0xff]  }
  0x4b   : > { %1921 = vmatprep.subr.bf16.mxu1 %v2048_v8 }
  0x4c   : > { %1878 = vmatmul.mubr.bf16.vlgmr.msra.gmra.mxu0 %v468_v11  ;;  %v1158_v11 = vor.u32 %v1156_v5, %v1154_v49 }
  0x4d   : > { %1902 = vmatpush3.bf16.msra.mxu0 %v2045_v2  ;;  %1898 = vmatmul.mubr.bf16.vlgmr.msra.gmra.mxu1 %v1568_v12  ;;  %v2080_v2 = vld [vmem:[%s2448_s1 + $0x1c8] sm:$0xff]   ;;  %v1162_v12 = vrot.slane %v1160_v6, 1 }
  0x4e   : > { %1922 = vmatpush3.bf16.msra.mxu1 %v2048_v8  ;;  %1903 = vmatprep.subr.bf16.mxu0 %v2049_v16  ;;  %v1698_v8 = vcombine.low %v1267_v3, %v2324_v28 }
  0x4f   : > { %1923 = vmatprep.subr.bf16.mxu1 %v2050_v17  ;;  %1917 = vmatprep.mubr.bf16.mxu0 %v743_v18  ;;  %v2089_v18 = vld [vmem:[%s2448_s1 + $0x230] sm:$0xff]  }
  0x50   : > { %1937 = vmatprep.mubr.bf16.mxu1 %v878_v15  ;;  %v1288_v13 = vrot.slane %v1698_v8, 1 }
  0x51   : > { %1904 = vmatpush3.bf16.msra.mxu0 %v2049_v16  ;;  %v1646_v16 = vcombine.low %v2260_v58, %v984_v9  ;;  %v2091_v58 = vld [vmem:[%s2448_s1 + $0x220] sm:$0xff]  }
  0x52   : > { %1924 = vmatpush3.bf16.msra.mxu1 %v2050_v17  ;;  %1905 = vmatprep.subr.bf16.mxu0 %v2051_v19  ;;  %v1163_v17 = vsel %vm223_vm0, %v1158_v11, %v1162_v12  ;;  %v1290_v15 = vsel %vm463_vm1, %v1288_v13, %v1289_v14 }
  0x53   : > { %1925 = vmatprep.subr.bf16.mxu1 %v2052_v20 }
  0x55   : > { %1906 = vmatpush3.bf16.msra.mxu0 %v2051_v19  ;;  %v2090_v19 = vld [vmem:[%s2448_s1 + $0x228] sm:$0xff]  }
  0x56   : > { %1926 = vmatpush3.bf16.msra.mxu1 %v2052_v20  ;;  %1907 = vmatprep.subr.bf16.mxu0 %v2053_v21  ;;  %v2092_v20 = vld [vmem:[%s2448_s1 + $0x218] sm:$0xff]  }
  0x57   : > { %1927 = vmatprep.subr.bf16.mxu1 %v2054_v22 }
  0x59   : > { %1908 = vmatpush3.bf16.msra.mxu0 %v2053_v21  ;;  %v2093_v21 = vld [vmem:[%s2448_s1 + $0x210] sm:$0xff]  }
  0x5a   : > { %1928 = vmatpush3.bf16.msra.mxu1 %v2054_v22  ;;  %1909 = vmatprep.subr.bf16.mxu0 %v2055_v23  ;;  %v2094_v22 = vld [vmem:[%s2448_s1 + $0x208] sm:$0xff]  }
  0x5b   : > { %1929 = vmatprep.subr.bf16.mxu1 %v2056_v24 }
  0x5d   : > { %1910 = vmatpush3.bf16.msra.mxu0 %v2055_v23  ;;  %v2095_v23 = vld [vmem:[%s2448_s1 + $0x200] sm:$0xff]  }
  0x5e   : > { %1930 = vmatpush3.bf16.msra.mxu1 %v2056_v24  ;;  %1911 = vmatprep.subr.bf16.mxu0 %v2057_v25  ;;  %v1291_v24 = vrot.slane %v2088_v1, 1 }
  0x5f   : > { %1931 = vmatprep.subr.bf16.mxu1 %v2058_v29 }
  0x61   : > { %1912 = vmatpush3.bf16.msra.mxu0 %v2057_v25  ;;  %v1292_v25 = vsel %vm463_vm1, %v1289_v14, %v1291_v24  ;;  %v1707_v24 = vld [vmem:[%s2449_s2] ss:$0 sm:$0xff] }
  0x62   : > { %1932 = vmatpush3.bf16.msra.mxu1 %v2058_v29  ;;  %1913 = vmatprep.subr.bf16.mxu0 %v2059_v31 }
  0x63   : > { %1933 = vmatprep.subr.bf16.mxu1 %v2060_v32 }
  0x65   : > { %1914 = vmatpush3.bf16.msra.mxu0 %v2059_v31 }
  0x66   : > { %1934 = vmatpush3.bf16.msra.mxu1 %v2060_v32  ;;  %1915 = vmatprep.subr.bf16.mxu0 %v2061_v37 }
  0x67   : > { %1935 = vmatprep.subr.bf16.mxu1 %v2062_v38 }
  0x69   : > { %1916 = vmatpush3.bf16.msra.mxu0 %v2061_v37 }
  0x6a   : > { %1936 = vmatpush3.bf16.msra.mxu1 %v2062_v38  ;;  %1941 = vmatprep.subr.bf16.mxu0 %v2066_v44 }
  0x6b   : > { %1961 = vmatprep.subr.bf16.mxu1 %v2068_v46 }
  0x6c   : > { %1918 = vmatmul.mubr.bf16.vlgmr.msra.gmra.mxu0 %v751_v47 }
  0x6d   : > { %1942 = vmatpush3.bf16.msra.mxu0 %v2066_v44  ;;  %1938 = vmatmul.mubr.bf16.vlgmr.msra.gmra.mxu1 %v880_v50 }
  0x6e   : > { %1962 = vmatpush3.bf16.msra.mxu1 %v2068_v46  ;;  %1943 = vmatprep.subr.bf16.mxu0 %v2069_v51 }
  0x6f   : > { %1963 = vmatprep.subr.bf16.mxu1 %v2070_v52  ;;  %1957 = vmatprep.mubr.bf16.mxu0 %v1645_v53 }
  0x70   : > { %1977 = vmatprep.mubr.bf16.mxu1 %v1155_v54 }
  0x71   : > { %1944 = vmatpush3.bf16.msra.mxu0 %v2069_v51 }
  0x72   : > { %1964 = vmatpush3.bf16.msra.mxu1 %v2070_v52  ;;  %1945 = vmatprep.subr.bf16.mxu0 %v2071_v55 }
  0x73   : > { %1965 = vmatprep.subr.bf16.mxu1 %v2072_v59 }
  0x75   : > { %1946 = vmatpush3.bf16.msra.mxu0 %v2071_v55 }
  0x76   : > { %1966 = vmatpush3.bf16.msra.mxu1 %v2072_v59  ;;  %1947 = vmatprep.subr.bf16.mxu0 %v2073_v56 }
  0x77   : > { %1967 = vmatprep.subr.bf16.mxu1 %v2074_v57 }
  0x79   : > { %1948 = vmatpush3.bf16.msra.mxu0 %v2073_v56 }
  0x7a   : > { %1968 = vmatpush3.bf16.msra.mxu1 %v2074_v57  ;;  %1949 = vmatprep.subr.bf16.mxu0 %v2075_v60 }
  0x7b   : > { %1969 = vmatprep.subr.bf16.mxu1 %v2076_v61 }
  0x7d   : > { %1950 = vmatpush3.bf16.msra.mxu0 %v2075_v60 }
  0x7e   : > { %1970 = vmatpush3.bf16.msra.mxu1 %v2076_v61  ;;  %1951 = vmatprep.subr.bf16.mxu0 %v2077_v62 }
  0x7f   : > { %1971 = vmatprep.subr.bf16.mxu1 %v2078_v63 }
  0x81   : > { %1952 = vmatpush3.bf16.msra.mxu0 %v2077_v62 }
  0x82   : > { %1972 = vmatpush3.bf16.msra.mxu1 %v2078_v63  ;;  %1953 = vmatprep.subr.bf16.mxu0 %v2079_v0 }
  0x83   : > { %1973 = vmatprep.subr.bf16.mxu1 %v2080_v2 }
  0x85   : > { %1954 = vmatpush3.bf16.msra.mxu0 %v2079_v0 }
  0x86   : > { %1974 = vmatpush3.bf16.msra.mxu1 %v2080_v2  ;;  %1955 = vmatprep.subr.bf16.mxu0 %v2081_v4 }
  0x87   : > { %1975 = vmatprep.subr.bf16.mxu1 %v2082_v7 }
  0x89   : > { %1956 = vmatpush3.bf16.msra.mxu0 %v2081_v4 }
  0x8a   : > { %1976 = vmatpush3.bf16.msra.mxu1 %v2082_v7  ;;  %1981 = vmatprep.subr.bf16.mxu0 %v2085_v10 }
  0x8c   : > { %1958 = vmatmul.mubr.bf16.vlgmr.msra.gmra.mxu0 %v1646_v16 }
  0x8d   : > { %1982 = vmatpush3.bf16.msra.mxu0 %v2085_v10  ;;  %1978 = vmatmul.mubr.bf16.vlgmr.msra.gmra.mxu1 %v1163_v17 }
  0x8e   : > { %1983 = vmatprep.subr.bf16.mxu0 %v2089_v18  ;;  %1997 = vmatprep.mubr.bf16.mxu0 %v1290_v15 }
  0x91   : > { %1984 = vmatpush3.bf16.msra.mxu0 %v2089_v18 }
  0x92   : > { %1985 = vmatprep.subr.bf16.mxu0 %v2090_v19 }
  0x95   : > { %1986 = vmatpush3.bf16.msra.mxu0 %v2090_v19 }
  0x96   : > { %1987 = vmatprep.subr.bf16.mxu0 %v2091_v58 }
  0x99   : > { %1988 = vmatpush3.bf16.msra.mxu0 %v2091_v58 }
  0x9a   : > { %1989 = vmatprep.subr.bf16.mxu0 %v2092_v20 }
  0x9d   : > { %1990 = vmatpush3.bf16.msra.mxu0 %v2092_v20 }
  0x9e   : > { %1991 = vmatprep.subr.bf16.mxu0 %v2093_v21 }
  0xa1   : > { %1992 = vmatpush3.bf16.msra.mxu0 %v2093_v21 }
  0xa2   : > { %1993 = vmatprep.subr.bf16.mxu0 %v2094_v22 }
  0xa5   : > { %1994 = vmatpush3.bf16.msra.mxu0 %v2094_v22 }
  0xa6   : > { %1995 = vmatprep.subr.bf16.mxu0 %v2095_v23 }
  0xa9   : > { %1996 = vmatpush3.bf16.msra.mxu0 %v2095_v23 }
  0xac   : > { %1998 = vmatmul.mubr.bf16.vlgmr.msra.gmra.mxu0 %v1292_v25 }
  0xec   : > { %v1839_v26 = vpop.f32.mrf.mxu0 }
  0xed   : > { %v1859_v27 = vpop.f32.mrf.mxu1 }
  0xee   : > { %v328_v28 = vpop.f32.mrf.mxu0  ;;  %v436_v47 = vadd.f32 %v1859_v27, %v1839_v26 }
  0xef   : > { %v427_v29 = vpop.f32.mrf.mxu1 }
  0xf0   : > { %v1840_v30 = vpop.f32.mrf.mxu0  ;;  %v428_v50 = vadd.f32 %v427_v29, %v328_v28 }
  0xf1   : > { %v1860_v31 = vpop.f32.mrf.mxu1 }
  0xf2   : > { %v331_v32 = vpop.f32.mrf.mxu0  ;;  %v439_v51 = vadd.f32 %v1860_v31, %v1840_v30 }
  0xf3   : > { %v430_v34 = vpop.f32.mrf.mxu1 }
  0xf4   : > { %v431_v54 = vadd.f32 %v430_v34, %v331_v32 }
 0x10c   : > { %v1879_v33 = vpop.f32.mrf.mxu0 }
 0x10d   : > { %v1899_v36 = vpop.f32.mrf.mxu1  ;;  %v570_v52 = vadd.f32 %v1879_v33, %v436_v47 }
 0x10e   : > { %v553_v35 = vpop.f32.mrf.mxu0 }
 0x10f   : > { %v678_v38 = vpop.f32.mrf.mxu1  ;;  %v568_v55 = vadd.f32 %v553_v35, %v428_v50  ;;  %v695_v57 = vadd.f32 %v1899_v36, %v570_v52 }
 0x110   : > { %v1880_v37 = vpop.f32.mrf.mxu0 }
 0x111   : > { %v1900_v40 = vpop.f32.mrf.mxu1  ;;  %v571_v59 = vadd.f32 %v1880_v37, %v439_v51  ;;  %v693_v63 = vadd.f32 %v678_v38, %v568_v55 }
 0x112   : > { %v556_v39 = vpop.f32.mrf.mxu0 }
 0x113   : > { %v681_v42 = vpop.f32.mrf.mxu1  ;;  %v569_v60 = vadd.f32 %v556_v39, %v431_v54  ;;  %v696_v0 = vadd.f32 %v1900_v40, %v571_v59 }
 0x115   : > { %v694_v2 = vadd.f32 %v681_v42, %v569_v60 }
 0x12c   : > { %v1919_v41 = vpop.f32.mrf.mxu0 }
 0x12d   : > { %v1939_v44 = vpop.f32.mrf.mxu1  ;;  %v853_v1 = vadd.f32 %v1919_v41, %v695_v57 }
 0x12e   : > { %v836_v43 = vpop.f32.mrf.mxu0 }
 0x12f   : > { %v965_v46 = vpop.f32.mrf.mxu1  ;;  %v851_v3 = vadd.f32 %v836_v43, %v693_v63  ;;  %v982_v7 = vadd.f32 %v1939_v44, %v853_v1 }
 0x130   : > { %v1920_v45 = vpop.f32.mrf.mxu0 }
 0x131   : > { %v1940_v49 = vpop.f32.mrf.mxu1  ;;  %v854_v4 = vadd.f32 %v1920_v45, %v696_v0  ;;  %v980_v9 = vadd.f32 %v965_v46, %v851_v3 }
 0x132   : > { %v839_v48 = vpop.f32.mrf.mxu0 }
 0x133   : > { %v968_v56 = vpop.f32.mrf.mxu1  ;;  %v852_v8 = vadd.f32 %v839_v48, %v694_v2  ;;  %v983_v10 = vadd.f32 %v1940_v49, %v854_v4 }
 0x135   : > { %v981_v14 = vadd.f32 %v968_v56, %v852_v8 }
 0x14c   : > { %v1959_v53 = vpop.f32.mrf.mxu0 }
 0x14d   : > { %v1979_v62 = vpop.f32.mrf.mxu1  ;;  %v1107_v11 = vadd.f32 %v1959_v53, %v982_v7 }
 0x14e   : > { %v1090_v61 = vpop.f32.mrf.mxu0 }
 0x14f   : > { %v1248_v6 = vpop.f32.mrf.mxu1  ;;  %v1105_v16 = vadd.f32 %v1090_v61, %v980_v9  ;;  %v1265_v15 = vadd.f32 %v1979_v62, %v1107_v11 }
 0x150   : > { %v1960_v5 = vpop.f32.mrf.mxu0 }
 0x151   : > { %v1980_v13 = vpop.f32.mrf.mxu1  ;;  %v1108_v17 = vadd.f32 %v1960_v5, %v983_v10  ;;  %v1263_v21 = vadd.f32 %v1248_v6, %v1105_v16 }
 0x152   : > { %v1093_v12 = vpop.f32.mrf.mxu0 }
 0x153   : > { %v1106_v19 = vadd.f32 %v1093_v12, %v981_v14  ;;  %v1251_v58 = vpop.f32.mrf.mxu1  ;;  %v1266_v22 = vadd.f32 %v1980_v13, %v1108_v17 }
 0x155   : > { %v1264_v26 = vadd.f32 %v1251_v58, %v1106_v19 }
 0x16c   : > { %v1999_v18 = vpop.f32.mrf.mxu0 }
 0x16d   : > { %v1394_v23 = vadd.f32 %v1999_v18, %v1265_v15 }
 0x16e   : > { %v1377_v20 = vpop.f32.mrf.mxu0 }
 0x16f   : > { %v1392_v27 = vadd.f32 %v1377_v20, %v1263_v21  ;;  %v1405_v30 = vadd.f32 %v1707_v24, %v1394_v23 }
 0x170   : > { %v2000_v25 = vpop.f32.mrf.mxu0 }
 0x171   : > { %v1395_v28 = vadd.f32 %v2000_v25, %v1266_v22  ;;  %v1403_v33 = vadd.f32 %v1707_v24, %v1392_v27 }
 0x172   : > { %v1380_v29 = vpop.f32.mrf.mxu0 }
 0x173   : > { %v1406_v31 = vadd.f32 %v1707_v24, %v1395_v28  ;;  %v1393_v32 = vadd.f32 %v1380_v29, %v1264_v26 }
 0x175   : > { %v1728_v34 = vpack.c.bf16 %v1406_v31, %v1405_v30  ;;  %v1404_v35 = vadd.f32 %v1707_v24, %v1393_v32 }
 0x177   : > { %1730 = vst [vmem:[%s170_s21 + $0x8] sm:$0xff] %v1728_v34   ;;  %v1723_v36 = vpack.c.bf16 %v1404_v35, %v1403_v33 }
 0x179   : > { %1724 = vst [vmem:[%s170_s21] sm:$0xff] %v1723_v36  }
 0x17a PF: > { %s13_s12 = sadd.s32 1, %s2103_s12  }
 0x17b   : > { %p10_p4 = scmp.ge.s32.totalorder %s13_s12, 4  }
 0x17d   :  { %12 = sbr.rel (!%p10_p4) target bundleno = 1 (0x1), region = 70 }

// kernel: vqgan_forward.11
= control target key start
LH: loop header
LB: loop body
LE: loop exit
PB: predicated region body
PF: predicated region fallthrough
CT: control target
= control target key end

     0   :  { %s2173_s12 = smov 0   ;;  %s2495_s0 = inlined_call_operand.vmem [shape: bf16[2,64,128], index: 0, kind: input, shape index: {}]   ;;  %s2496_s1 = inlined_call_operand.vmem [shape: bf16[9,128,128], index: 1, kind: input, shape index: {}]   ;;  %s2497_s2 = inlined_call_operand.vmem [shape: f32[1,128], index: 2, kind: input, shape index: {}]   ;;  %s2498_s3 = inlined_call_operand.vmem [shape: bf16[2,32,128], index: 3, kind: output, shape index: {}]  }
   0x1 LB: > { %s1510_s13 = sadd.s32 4294967295, %s2151_s12   ;;  %p1514_p0 = scmp.ge.s32.totalorder %s2151_s12, 1  ;;  %s2151_s12 = sphi %s2173_s12, %s13_s12  }
   0x2   : > { %p137_p1 = scmp.lt.s32.totalorder %s2151_s12, 3 }
   0x4   : > { %p138_p2 = pnand %p1514_p0, %p137_p1 }
   0x5   : > { %p161_p3 = scmp.lt.s32.totalorder (!%p138_p2), %s1510_s13, 1 }
   0x6   : > { %141 = sbr.rel (%p138_p2) target bundleno = 412 (0x19c), region = 32 }
   0xb   : > { %v2041_v0 = vld [vmem:[%s2496_s1 + $0x78] sm:$0xff]   ;;  %v2043_v2 = vld [vmem:[%s2496_s1 + $0x70] sm:$0xff]   ;;  %v2045_v4 = vld [vmem:[%s2496_s1 + $0x68] sm:$0xff]   ;;  %s2500_s13 = smov (!%p161_p3, %s1510_s13), 1  ;;  %vm223_vm0 = vsmask.f32 7424 }
   0xc   : > { %v2042_v1 = vld [vmem:[%s2496_s1 + $0x38] sm:$0xff]   ;;  %1853 = vmatprep.subr.bf16.mxu0 %v2041_v0  ;;  %v2044_v3 = vld [vmem:[%s2496_s1 + $0x30] sm:$0xff]   ;;  %v2046_v5 = vld [vmem:[%s2496_s1 + $0x28] sm:$0xff]   ;;  %s1746_s30 = sshll.u32 %s2500_s13, 5  ;;  %vm463_vm1 = vcmask 1046528   ;;  %s1747_s18 = sshll.u32 %s2500_s13, 4 }
   0xd   : > { %1873 = vmatprep.subr.bf16.mxu1 %v2042_v1  ;;  %1854 = vmatpush3.bf16.msra.mxu0 %v2041_v0  ;;  %v2047_v6 = vld [vmem:[%s2496_s1 + $0x60] sm:$0xff]   ;;  %v2049_v8 = vld [vmem:[%s2496_s1 + $0x58] sm:$0xff]   ;;  %s2217_s10 = scalar_lea.vmem %s2495_s0, %s1746_s30  ;;  %v2051_v10 = vld [vmem:[%s2496_s1 + $0x50] sm:$0xff]   ;;  %s170_s21 = scalar_lea.vmem %s2498_s3, %s1747_s18 }
   0xe   : > { %1874 = vmatpush3.bf16.msra.mxu1 %v2042_v1  ;;  %1855 = vmatprep.subr.bf16.mxu0 %v2043_v2  ;;  %v2048_v7 = vld [vmem:[%s2496_s1 + $0x20] sm:$0xff]   ;;  %v2050_v9 = vld [vmem:[%s2496_s1 + $0x18] sm:$0xff]   ;;  %v174_v13 = vld [vmem:[%s2217_s10 + $0x8] sm:$0xf] }
   0xf   : > { %1875 = vmatprep.subr.bf16.mxu1 %v2044_v3  ;;  %v172_v11 = vld [vmem:[%s2217_s10] sm:$0xf]  ;;  %v173_v12 = vld [vmem:[%s2217_s10 + $0x4] sm:$0xf]  ;;  %v2052_v14 = vld [vmem:[%s2496_s1 + $0x10] sm:$0xff]  }
  0x10   : > { %v2229_v15 = vld [vmem:[%s2217_s10 + $0xc] sm:$0xf]  ;;  %v1535_v16 = vcombine.low %v172_v11, %v173_v12  ;;  %v2235_v18 = vld [vmem:[%s2217_s10 + $0x10] ss:$0 sps:$4 sm:$0x11]   ;;  %v2055_v29 = vld [vmem:[%s2496_s1 + $0x40] sm:$0xff]   ;;  %v1595_v39 = vcombine.low %v173_v12, %v174_v13 }
  0x11   : > { %1856 = vmatpush3.bf16.msra.mxu0 %v2043_v2  ;;  %v2232_v17 = vcombine.low %v174_v13, %v2229_v15  ;;  %v2053_v21 = vld [vmem:[%s2496_s1 + $0x48] sm:$0xff]   ;;  %v240_v28 = vshll.u32 %v2235_v18, 16  ;;  %v2056_v30 = vld [vmem:[%s2496_s1] sm:$0xff]   ;;  %v2060_v34 = vld [vmem:[%s2496_s1 + $0xb8] sm:$0xff]   ;;  %v467_v1 = vrot.slane %v2235_v18, 1 }
  0x12   : > { %1876 = vmatpush3.bf16.msra.mxu1 %v2044_v3  ;;  %1857 = vmatprep.subr.bf16.mxu0 %v2045_v4  ;;  %v225_v19 = vshrl.u32 %v1535_v16, 16  ;;  %v227_v20 = vshll.u32 %v1535_v16, 16  ;;  %v2054_v23 = vld [vmem:[%s2496_s1 + $0x8] sm:$0xff]   ;;  %v2061_v35 = vld [vmem:[%s2496_s1 + $0xf8] sm:$0xff]   ;;  %v2062_v37 = vld [vmem:[%s2496_s1 + $0xb0] sm:$0xff]  }
  0x13   : > { %1877 = vmatprep.subr.bf16.mxu1 %v2046_v5  ;;  %1889 = vmatprep.mubr.bf16.mxu1 %v1535_v16  ;;  %v232_v22 = vshll.u32 %v2232_v17, 16  ;;  %v236_v27 = vshrl.u32 %v2232_v17, 16  ;;  %v242_v33 = vrot.slane %v240_v28, 1  ;;  %v2063_v38 = vld [vmem:[%s2496_s1 + $0xf0] sm:$0xff]   ;;  %v442_v40 = vld [vmem:[%s2217_s10] sm:$0xe] }
  0x14   : > { %v229_v24 = vrot.slane %v227_v20, 1  ;;  %v2064_v41 = vld [vmem:[%s2496_s1 + $0xa8] sm:$0xff]   ;;  %v1570_v42 = vcombine.low %v442_v40, %v173_v12  ;;  %v465_v43 = vrot.slane %v2232_v17, 1  ;;  %v2066_v46 = vld [vmem:[%s2496_s1 + $0xa0] sm:$0xff]   ;;  %v2068_v49 = vld [vmem:[%s2496_s1 + $0x98] sm:$0xff]  }
  0x15   : > { %1858 = vmatpush3.bf16.msra.mxu0 %v2045_v4  ;;  %v234_v25 = vrot.slane %v232_v22, 1  ;;  %v2065_v44 = vld [vmem:[%s2496_s1 + $0xe8] sm:$0xff]   ;;  %v2067_v48 = vld [vmem:[%s2496_s1 + $0xe0] sm:$0xff]   ;;  %v2069_v50 = vld [vmem:[%s2496_s1 + $0xd8] sm:$0xff]  }
  0x16   : > { %1878 = vmatpush3.bf16.msra.mxu1 %v2046_v5  ;;  %1859 = vmatprep.subr.bf16.mxu0 %v2047_v6  ;;  %v230_v26 = vor.u32 %v229_v24, %v225_v19  ;;  %v464_v45 = vrot.slane %v1570_v42, 1  ;;  %v2070_v51 = vld [vmem:[%s2496_s1 + $0x90] sm:$0xff]   ;;  %v2072_v53 = vld [vmem:[%s2496_s1 + $0x88] sm:$0xff]   ;;  %v697_v55 = vld [vmem:[%s2217_s10 + $0x4] sm:$0xf]  ;;  %v468_v11 = vsel %vm463_vm1, %v465_v43, %v467_v1 }
  0x17   : > { %1879 = vmatprep.subr.bf16.mxu1 %v2048_v7  ;;  %v238_v32 = vor.u32 %v236_v27, %v234_v25  ;;  %v2071_v52 = vld [vmem:[%s2496_s1 + $0xd0] sm:$0xff]   ;;  %v2073_v54 = vld [vmem:[%s2496_s1 + $0xc8] sm:$0xff]   ;;  %v2074_v62 = vld [vmem:[%s2496_s1 + $0x80] sm:$0xff]  }
  0x18   : > { %v235_v31 = vsel %vm223_vm0, %v230_v26, %v234_v25  ;;  %v466_v47 = vsel %vm463_vm1, %v464_v45, %v465_v43  ;;  %v2302_v56 = vld [vmem:[%s2217_s10 + $0x8] sm:$0xf]  ;;  %v2305_v57 = vld [vmem:[%s2217_s10 + $0xc] sm:$0xf]  ;;  %v2308_v58 = vld [vmem:[%s2217_s10 + $0x10] sm:$0xf] }
  0x19   : > { %1860 = vmatpush3.bf16.msra.mxu0 %v2047_v6  ;;  %1869 = vmatprep.mubr.bf16.mxu0 %v235_v31  ;;  %v243_v36 = vsel %vm223_vm0, %v238_v32, %v242_v33  ;;  %v1621_v59 = vcombine.low %v697_v55, %v2302_v56  ;;  %v2313_v60 = vcombine.low %v2305_v57, %v2308_v58  ;;  %v855_v63 = vld [vmem:[%s2217_s10 + $0x4] sm:$0xe]  ;;  %v2077_v2 = vld [vmem:[%s2496_s1 + $0x138] sm:$0xff]   ;;  %v2081_v16 = vld [vmem:[%s2496_s1 + $0x130] sm:$0xff]  }
  0x1a   : > { %1880 = vmatpush3.bf16.msra.mxu1 %v2048_v7  ;;  %1861 = vmatprep.subr.bf16.mxu0 %v2049_v8  ;;  %v2075_v0 = vld [vmem:[%s2496_s1 + $0xc0] sm:$0xff]   ;;  %v1648_v6 = vcombine.low %v855_v63, %v2302_v56  ;;  %v572_v7 = vld [vmem:[%s2217_s10 + $0x10] sm:$0xf]  ;;  %v2083_v19 = vld [vmem:[%s2496_s1 + $0x128] sm:$0xff]  }
  0x1b   : > { %1881 = vmatprep.subr.bf16.mxu1 %v2050_v9  ;;  %v735_v61 = vshll.u32 %v1621_v59, 16  ;;  %v733_v3 = vshrl.u32 %v1621_v59, 16  ;;  %v740_v5 = vshll.u32 %v2313_v60, 16  ;;  %v1596_v12 = vcombine.low %v2229_v15, %v572_v7  ;;  %v2084_v20 = vld [vmem:[%s2496_s1 + $0x168] sm:$0xff]   ;;  %v2086_v22 = vld [vmem:[%s2496_s1 + $0x160] sm:$0xff]   ;;  %v2088_v24 = vld [vmem:[%s2496_s1 + $0x158] sm:$0xff]  }
  0x1c   : > { %v876_v13 = vrot.slane %v1648_v6, 1  ;;  %v2089_v25 = vld [vmem:[%s2496_s1 + $0x110] sm:$0xff]   ;;  %v1109_v26 = vld [vmem:[%s2217_s10 + $0x8] sm:$0xf]  ;;  %v2372_v28 = vld [vmem:[%s2217_s10 + $0xc] sm:$0xf] }
  0x1d   : > { %1862 = vmatpush3.bf16.msra.mxu0 %v2049_v8  ;;  %v737_v4 = vrot.slane %v735_v61, 1  ;;  %v2080_v8 = vld [vmem:[%s2496_s1 + $0x178] sm:$0xff]   ;;  %v2097_v27 = vld [vmem:[%s2217_s10 + $0x14] ss:$0 sps:$4 sm:$0x11]   ;;  %v2091_v31 = vld [vmem:[%s2496_s1 + $0x108] sm:$0xff]  }
  0x1e   : > { %1882 = vmatpush3.bf16.msra.mxu1 %v2050_v9  ;;  %1863 = vmatprep.subr.bf16.mxu0 %v2051_v10  ;;  %v2092_v32 = vld [vmem:[%s2496_s1 + $0x148] sm:$0xff]   ;;  %v748_v33 = vshll.u32 %v2097_v27, 16  ;;  %v879_v45 = vrot.slane %v2097_v27, 1  ;;  %v2108_v61 = vld [vmem:[%s2496_s1 + $0x1d8] sm:$0xff]   ;;  %v2110_v63 = vld [vmem:[%s2496_s1 + $0x1d0] sm:$0xff]  }
  0x1f   : > { %1883 = vmatprep.subr.bf16.mxu1 %v2052_v14  ;;  %v738_v9 = vor.u32 %v737_v4, %v733_v3  ;;  %v2103_v55 = vld [vmem:[%s2496_s1 + $0x1a8] sm:$0xff]   ;;  %v2120_v1 = vld [vmem:[%s2217_s10 + $0x18] ss:$0 sps:$4 sm:$0x11]   ;;  %v2113_v4 = vld [vmem:[%s2496_s1 + $0x180] sm:$0xff]  }
  0x20   : > { %v2104_v59 = vld [vmem:[%s2496_s1 + $0x1e8] sm:$0xff]   ;;  %v1160_v6 = vshll.u32 %v2120_v1, 16  ;;  %v2114_v7 = vld [vmem:[%s2496_s1 + $0x1c0] sm:$0xff]  }
  0x21   : > { %1864 = vmatpush3.bf16.msra.mxu0 %v2051_v10  ;;  %v2332_v10 = vrot.slane %v740_v5, 1  ;;  %v1267_v3 = vld [vmem:[%s2217_s10 + $0x8] sm:$0xe] }
  0x22   : > { %1884 = vmatpush3.bf16.msra.mxu1 %v2052_v14  ;;  %1865 = vmatprep.subr.bf16.mxu0 %v2053_v21  ;;  %v877_v14 = vrot.slane %v2313_v60, 1 }
  0x23   : > { %1885 = vmatprep.subr.bf16.mxu1 %v2054_v23  ;;  %v743_v18 = vsel %vm223_vm0, %v738_v9, %v2332_v10  ;;  %v984_v9 = vld [vmem:[%s2217_s10 + $0x14] sm:$0xf] }
  0x24   : > { %v878_v15 = vsel %vm463_vm1, %v876_v13, %v877_v14 }
  0x25   : > { %1866 = vmatpush3.bf16.msra.mxu0 %v2053_v21  ;;  %v2085_v21 = vld [vmem:[%s2496_s1 + $0x120] sm:$0xff]  }
  0x26   : > { %1886 = vmatpush3.bf16.msra.mxu1 %v2054_v23  ;;  %1867 = vmatprep.subr.bf16.mxu0 %v2055_v29  ;;  %v2087_v23 = vld [vmem:[%s2496_s1 + $0x118] sm:$0xff]  }
  0x27   : > { %1887 = vmatprep.subr.bf16.mxu1 %v2056_v30 }
  0x29   : > { %1868 = vmatpush3.bf16.msra.mxu0 %v2055_v29  ;;  %v2090_v29 = vld [vmem:[%s2496_s1 + $0x150] sm:$0xff]  }
  0x2a   : > { %1888 = vmatpush3.bf16.msra.mxu1 %v2056_v30  ;;  %1893 = vmatprep.subr.bf16.mxu0 %v2060_v34  ;;  %v1699_v30 = vcombine.low %v1109_v26, %v2372_v28 }
  0x2b   : > { %1913 = vmatprep.subr.bf16.mxu1 %v2061_v35 }
  0x2c   : > { %1870 = vmatmul.mubr.bf16.vlgmr.msra.gmra.mxu0 %v243_v36  ;;  %v1147_v36 = vshll.u32 %v1699_v30, 16 }
  0x2d   : > { %1890 = vmatmul.mubr.bf16.vlgmr.msra.gmra.mxu1 %v2232_v17  ;;  %1894 = vmatpush3.bf16.msra.mxu0 %v2060_v34  ;;  %v2082_v17 = vld [vmem:[%s2496_s1 + $0x170] sm:$0xff]   ;;  %v744_v34 = vshrl.u32 %v2313_v60, 16  ;;  %v2107_v60 = vld [vmem:[%s2496_s1 + $0x198] sm:$0xff]  }
  0x2e   : > { %1914 = vmatpush3.bf16.msra.mxu1 %v2061_v35  ;;  %1895 = vmatprep.subr.bf16.mxu0 %v2062_v37  ;;  %v2386_v35 = vld [vmem:[%s2217_s10 + $0x10] sm:$0xff]   ;;  %v1149_v42 = vrot.slane %v1147_v36, 1 }
  0x2f   : > { %1915 = vmatprep.subr.bf16.mxu1 %v2063_v38  ;;  %1929 = vmatprep.mubr.bf16.mxu1 %v1595_v39  ;;  %v750_v39 = vrot.slane %v748_v33, 1  ;;  %v746_v40 = vor.u32 %v744_v34, %v2332_v10  ;;  %v1152_v43 = vshll.u32 %v2386_v35, 16  ;;  %v1156_v5 = vshrl.u32 %v2386_v35, 16  ;;  %v2117_v10 = vld [vmem:[%s2496_s1 + $0x238] sm:$0xff]  }
  0x30   : > { %1909 = vmatprep.mubr.bf16.mxu0 %v466_v47 }
  0x31   : > { %1896 = vmatpush3.bf16.msra.mxu0 %v2062_v37  ;;  %v2093_v37 = vld [vmem:[%s2496_s1 + $0x100] sm:$0xff]   ;;  %v751_v47 = vsel %vm223_vm0, %v746_v40, %v750_v39 }
  0x32   : > { %1916 = vmatpush3.bf16.msra.mxu1 %v2063_v38  ;;  %1897 = vmatprep.subr.bf16.mxu0 %v2064_v41  ;;  %v2094_v38 = vld [vmem:[%s2496_s1 + $0x140] sm:$0xff]  }
  0x33   : > { %1917 = vmatprep.subr.bf16.mxu1 %v2065_v44 }
  0x35   : > { %1898 = vmatpush3.bf16.msra.mxu0 %v2064_v41  ;;  %v1145_v41 = vshrl.u32 %v1699_v30, 16 }
  0x36   : > { %1918 = vmatpush3.bf16.msra.mxu1 %v2065_v44  ;;  %1899 = vmatprep.subr.bf16.mxu0 %v2066_v46  ;;  %v2098_v44 = vld [vmem:[%s2496_s1 + $0x1b8] sm:$0xff]  }
  0x37   : > { %1919 = vmatprep.subr.bf16.mxu1 %v2067_v48 }
  0x39   : > { %1900 = vmatpush3.bf16.msra.mxu0 %v2066_v46  ;;  %v2100_v46 = vld [vmem:[%s2496_s1 + $0x1f8] sm:$0xff]  }
  0x3a   : > { %1920 = vmatpush3.bf16.msra.mxu1 %v2067_v48  ;;  %1901 = vmatprep.subr.bf16.mxu0 %v2068_v49  ;;  %v1150_v48 = vor.u32 %v1149_v42, %v1145_v41 }
  0x3b   : > { %1921 = vmatprep.subr.bf16.mxu1 %v2069_v50 }
  0x3d   : > { %1902 = vmatpush3.bf16.msra.mxu0 %v2068_v49  ;;  %v1154_v49 = vrot.slane %v1152_v43, 1 }
  0x3e   : > { %1922 = vmatpush3.bf16.msra.mxu1 %v2069_v50  ;;  %1903 = vmatprep.subr.bf16.mxu0 %v2070_v51  ;;  %v880_v50 = vsel %vm463_vm1, %v877_v14, %v879_v45  ;;  %v1289_v14 = vrot.slane %v2386_v35, 1 }
  0x3f   : > { %1923 = vmatprep.subr.bf16.mxu1 %v2071_v52 }
  0x41   : > { %1904 = vmatpush3.bf16.msra.mxu0 %v2070_v51  ;;  %v2101_v51 = vld [vmem:[%s2496_s1 + $0x1b0] sm:$0xff]  }
  0x42   : > { %1924 = vmatpush3.bf16.msra.mxu1 %v2071_v52  ;;  %1905 = vmatprep.subr.bf16.mxu0 %v2072_v53  ;;  %v2102_v52 = vld [vmem:[%s2496_s1 + $0x1f0] sm:$0xff]  }
  0x43   : > { %1925 = vmatprep.subr.bf16.mxu1 %v2073_v54 }
  0x45   : > { %1906 = vmatpush3.bf16.msra.mxu0 %v2072_v53  ;;  %v1673_v53 = vcombine.low %v2302_v56, %v2305_v57  ;;  %v2105_v56 = vld [vmem:[%s2496_s1 + $0x1a0] sm:$0xff]  }
  0x46   : > { %1926 = vmatpush3.bf16.msra.mxu1 %v2073_v54  ;;  %1907 = vmatprep.subr.bf16.mxu0 %v2074_v62  ;;  %v1155_v54 = vsel %vm223_vm0, %v1150_v48, %v1154_v49  ;;  %v2106_v57 = vld [vmem:[%s2496_s1 + $0x1e0] sm:$0xff]  }
  0x47   : > { %1927 = vmatprep.subr.bf16.mxu1 %v2075_v0 }
  0x49   : > { %1908 = vmatpush3.bf16.msra.mxu0 %v2074_v62  ;;  %v2109_v62 = vld [vmem:[%s2496_s1 + $0x190] sm:$0xff]  }
  0x4a   : > { %1928 = vmatpush3.bf16.msra.mxu1 %v2075_v0  ;;  %1933 = vmatprep.subr.bf16.mxu0 %v2077_v2  ;;  %v2111_v0 = vld [vmem:[%s2496_s1 + $0x188] sm:$0xff]  }
  0x4b   : > { %1953 = vmatprep.subr.bf16.mxu1 %v2080_v8 }
  0x4c   : > { %1910 = vmatmul.mubr.bf16.vlgmr.msra.gmra.mxu0 %v468_v11  ;;  %v1158_v11 = vor.u32 %v1156_v5, %v1154_v49 }
  0x4d   : > { %1934 = vmatpush3.bf16.msra.mxu0 %v2077_v2  ;;  %1930 = vmatmul.mubr.bf16.vlgmr.msra.gmra.mxu1 %v1596_v12  ;;  %v2112_v2 = vld [vmem:[%s2496_s1 + $0x1c8] sm:$0xff]   ;;  %v1162_v12 = vrot.slane %v1160_v6, 1 }
  0x4e   : > { %1954 = vmatpush3.bf16.msra.mxu1 %v2080_v8  ;;  %1935 = vmatprep.subr.bf16.mxu0 %v2081_v16  ;;  %v1726_v8 = vcombine.low %v1267_v3, %v2372_v28 }
  0x4f   : > { %1955 = vmatprep.subr.bf16.mxu1 %v2082_v17  ;;  %1949 = vmatprep.mubr.bf16.mxu0 %v743_v18  ;;  %v2121_v18 = vld [vmem:[%s2496_s1 + $0x230] sm:$0xff]  }
  0x50   : > { %1969 = vmatprep.mubr.bf16.mxu1 %v878_v15  ;;  %v1288_v13 = vrot.slane %v1726_v8, 1 }
  0x51   : > { %1936 = vmatpush3.bf16.msra.mxu0 %v2081_v16  ;;  %v1674_v16 = vcombine.low %v2308_v58, %v984_v9  ;;  %v2123_v58 = vld [vmem:[%s2496_s1 + $0x220] sm:$0xff]  }
  0x52   : > { %1956 = vmatpush3.bf16.msra.mxu1 %v2082_v17  ;;  %1937 = vmatprep.subr.bf16.mxu0 %v2083_v19  ;;  %v1163_v17 = vsel %vm223_vm0, %v1158_v11, %v1162_v12  ;;  %v1290_v15 = vsel %vm463_vm1, %v1288_v13, %v1289_v14 }
  0x53   : > { %1957 = vmatprep.subr.bf16.mxu1 %v2084_v20 }
  0x55   : > { %1938 = vmatpush3.bf16.msra.mxu0 %v2083_v19  ;;  %v2122_v19 = vld [vmem:[%s2496_s1 + $0x228] sm:$0xff]  }
  0x56   : > { %1958 = vmatpush3.bf16.msra.mxu1 %v2084_v20  ;;  %1939 = vmatprep.subr.bf16.mxu0 %v2085_v21  ;;  %v2124_v20 = vld [vmem:[%s2496_s1 + $0x218] sm:$0xff]  }
  0x57   : > { %1959 = vmatprep.subr.bf16.mxu1 %v2086_v22 }
  0x59   : > { %1940 = vmatpush3.bf16.msra.mxu0 %v2085_v21  ;;  %v2125_v21 = vld [vmem:[%s2496_s1 + $0x210] sm:$0xff]  }
  0x5a   : > { %1960 = vmatpush3.bf16.msra.mxu1 %v2086_v22  ;;  %1941 = vmatprep.subr.bf16.mxu0 %v2087_v23  ;;  %v2126_v22 = vld [vmem:[%s2496_s1 + $0x208] sm:$0xff]  }
  0x5b   : > { %1961 = vmatprep.subr.bf16.mxu1 %v2088_v24 }
  0x5d   : > { %1942 = vmatpush3.bf16.msra.mxu0 %v2087_v23  ;;  %v2127_v23 = vld [vmem:[%s2496_s1 + $0x200] sm:$0xff]  }
  0x5e   : > { %1962 = vmatpush3.bf16.msra.mxu1 %v2088_v24  ;;  %1943 = vmatprep.subr.bf16.mxu0 %v2089_v25  ;;  %v1291_v24 = vrot.slane %v2120_v1, 1 }
  0x5f   : > { %1963 = vmatprep.subr.bf16.mxu1 %v2090_v29 }
  0x61   : > { %1944 = vmatpush3.bf16.msra.mxu0 %v2089_v25  ;;  %v1292_v25 = vsel %vm463_vm1, %v1289_v14, %v1291_v24 }
  0x62   : > { %1964 = vmatpush3.bf16.msra.mxu1 %v2090_v29  ;;  %1945 = vmatprep.subr.bf16.mxu0 %v2091_v31 }
  0x63   : > { %1965 = vmatprep.subr.bf16.mxu1 %v2092_v32 }
  0x65   : > { %1946 = vmatpush3.bf16.msra.mxu0 %v2091_v31 }
  0x66   : > { %1966 = vmatpush3.bf16.msra.mxu1 %v2092_v32  ;;  %1947 = vmatprep.subr.bf16.mxu0 %v2093_v37 }
  0x67   : > { %1967 = vmatprep.subr.bf16.mxu1 %v2094_v38 }
  0x69   : > { %1948 = vmatpush3.bf16.msra.mxu0 %v2093_v37 }
  0x6a   : > { %1968 = vmatpush3.bf16.msra.mxu1 %v2094_v38  ;;  %1973 = vmatprep.subr.bf16.mxu0 %v2098_v44 }
  0x6b   : > { %1993 = vmatprep.subr.bf16.mxu1 %v2100_v46 }
  0x6c   : > { %1950 = vmatmul.mubr.bf16.vlgmr.msra.gmra.mxu0 %v751_v47 }
  0x6d   : > { %1974 = vmatpush3.bf16.msra.mxu0 %v2098_v44  ;;  %1970 = vmatmul.mubr.bf16.vlgmr.msra.gmra.mxu1 %v880_v50 }
  0x6e   : > { %1994 = vmatpush3.bf16.msra.mxu1 %v2100_v46  ;;  %1975 = vmatprep.subr.bf16.mxu0 %v2101_v51 }
  0x6f   : > { %1995 = vmatprep.subr.bf16.mxu1 %v2102_v52  ;;  %1989 = vmatprep.mubr.bf16.mxu0 %v1673_v53 }
  0x70   : > { %2009 = vmatprep.mubr.bf16.mxu1 %v1155_v54 }
  0x71   : > { %1976 = vmatpush3.bf16.msra.mxu0 %v2101_v51 }
  0x72   : > { %1996 = vmatpush3.bf16.msra.mxu1 %v2102_v52  ;;  %1977 = vmatprep.subr.bf16.mxu0 %v2103_v55 }
  0x73   : > { %1997 = vmatprep.subr.bf16.mxu1 %v2104_v59 }
  0x75   : > { %1978 = vmatpush3.bf16.msra.mxu0 %v2103_v55 }
  0x76   : > { %1998 = vmatpush3.bf16.msra.mxu1 %v2104_v59  ;;  %1979 = vmatprep.subr.bf16.mxu0 %v2105_v56 }
  0x77   : > { %1999 = vmatprep.subr.bf16.mxu1 %v2106_v57 }
  0x79   : > { %1980 = vmatpush3.bf16.msra.mxu0 %v2105_v56 }
  0x7a   : > { %2000 = vmatpush3.bf16.msra.mxu1 %v2106_v57  ;;  %1981 = vmatprep.subr.bf16.mxu0 %v2107_v60 }
  0x7b   : > { %2001 = vmatprep.subr.bf16.mxu1 %v2108_v61 }
  0x7d   : > { %1982 = vmatpush3.bf16.msra.mxu0 %v2107_v60 }
  0x7e   : > { %2002 = vmatpush3.bf16.msra.mxu1 %v2108_v61  ;;  %1983 = vmatprep.subr.bf16.mxu0 %v2109_v62 }
  0x7f   : > { %2003 = vmatprep.subr.bf16.mxu1 %v2110_v63 }
  0x81   : > { %1984 = vmatpush3.bf16.msra.mxu0 %v2109_v62 }
  0x82   : > { %2004 = vmatpush3.bf16.msra.mxu1 %v2110_v63  ;;  %1985 = vmatprep.subr.bf16.mxu0 %v2111_v0 }
  0x83   : > { %2005 = vmatprep.subr.bf16.mxu1 %v2112_v2 }
  0x85   : > { %1986 = vmatpush3.bf16.msra.mxu0 %v2111_v0 }
  0x86   : > { %2006 = vmatpush3.bf16.msra.mxu1 %v2112_v2  ;;  %1987 = vmatprep.subr.bf16.mxu0 %v2113_v4 }
  0x87   : > { %2007 = vmatprep.subr.bf16.mxu1 %v2114_v7 }
  0x89   : > { %1988 = vmatpush3.bf16.msra.mxu0 %v2113_v4 }
  0x8a   : > { %2008 = vmatpush3.bf16.msra.mxu1 %v2114_v7  ;;  %2013 = vmatprep.subr.bf16.mxu0 %v2117_v10 }
  0x8c   : > { %1990 = vmatmul.mubr.bf16.vlgmr.msra.gmra.mxu0 %v1674_v16 }
  0x8d   : > { %2014 = vmatpush3.bf16.msra.mxu0 %v2117_v10  ;;  %2010 = vmatmul.mubr.bf16.vlgmr.msra.gmra.mxu1 %v1163_v17 }
  0x8e   : > { %2015 = vmatprep.subr.bf16.mxu0 %v2121_v18  ;;  %2029 = vmatprep.mubr.bf16.mxu0 %v1290_v15 }
  0x91   : > { %2016 = vmatpush3.bf16.msra.mxu0 %v2121_v18 }
  0x92   : > { %2017 = vmatprep.subr.bf16.mxu0 %v2122_v19 }
  0x95   : > { %2018 = vmatpush3.bf16.msra.mxu0 %v2122_v19  ;;  %v1735_v19 = vld [vmem:[%s2497_s2] ss:$0 sm:$0xff] }
  0x96   : > { %2019 = vmatprep.subr.bf16.mxu0 %v2123_v58 }
  0x99   : > { %2020 = vmatpush3.bf16.msra.mxu0 %v2123_v58 }
  0x9a   : > { %2021 = vmatprep.subr.bf16.mxu0 %v2124_v20 }
  0x9d   : > { %2022 = vmatpush3.bf16.msra.mxu0 %v2124_v20 }
  0x9e   : > { %2023 = vmatprep.subr.bf16.mxu0 %v2125_v21 }
  0xa1   : > { %2024 = vmatpush3.bf16.msra.mxu0 %v2125_v21 }
  0xa2   : > { %2025 = vmatprep.subr.bf16.mxu0 %v2126_v22 }
  0xa5   : > { %2026 = vmatpush3.bf16.msra.mxu0 %v2126_v22 }
  0xa6   : > { %2027 = vmatprep.subr.bf16.mxu0 %v2127_v23 }
  0xa9   : > { %2028 = vmatpush3.bf16.msra.mxu0 %v2127_v23 }
  0xac   : > { %2030 = vmatmul.mubr.bf16.vlgmr.msra.gmra.mxu0 %v1292_v25 }
  0xec   : > { %v1871_v26 = vpop.f32.mrf.mxu0 }
  0xed   : > { %v1891_v27 = vpop.f32.mrf.mxu1 }
  0xee   : > { %v328_v28 = vpop.f32.mrf.mxu0  ;;  %v436_v47 = vadd.f32 %v1891_v27, %v1871_v26 }
  0xef   : > { %v427_v29 = vpop.f32.mrf.mxu1 }
  0xf0   : > { %v1872_v30 = vpop.f32.mrf.mxu0  ;;  %v428_v48 = vadd.f32 %v427_v29, %v328_v28 }
  0xf1   : > { %v1892_v31 = vpop.f32.mrf.mxu1 }
  0xf2   : > { %v331_v32 = vpop.f32.mrf.mxu0  ;;  %v439_v52 = vadd.f32 %v1892_v31, %v1872_v30 }
  0xf3   : > { %v430_v34 = vpop.f32.mrf.mxu1 }
  0xf4   : > { %v431_v55 = vadd.f32 %v430_v34, %v331_v32 }
 0x10c   : > { %v1911_v33 = vpop.f32.mrf.mxu0 }
 0x10d   : > { %v1931_v36 = vpop.f32.mrf.mxu1  ;;  %v570_v49 = vadd.f32 %v1911_v33, %v436_v47 }
 0x10e   : > { %v553_v35 = vpop.f32.mrf.mxu0 }
 0x10f   : > { %v678_v38 = vpop.f32.mrf.mxu1  ;;  %v568_v53 = vadd.f32 %v553_v35, %v428_v48  ;;  %v695_v59 = vadd.f32 %v1931_v36, %v570_v49 }
 0x110   : > { %v1912_v37 = vpop.f32.mrf.mxu0 }
 0x111   : > { %v1932_v40 = vpop.f32.mrf.mxu1  ;;  %v571_v56 = vadd.f32 %v1912_v37, %v439_v52  ;;  %v693_v60 = vadd.f32 %v678_v38, %v568_v53 }
 0x112   : > { %v556_v39 = vpop.f32.mrf.mxu0 }
 0x113   : > { %v681_v42 = vpop.f32.mrf.mxu1  ;;  %v569_v61 = vadd.f32 %v556_v39, %v431_v55  ;;  %v696_v1 = vadd.f32 %v1932_v40, %v571_v56 }
 0x115   : > { %v694_v3 = vadd.f32 %v681_v42, %v569_v61 }
 0x12c   : > { %v1951_v41 = vpop.f32.mrf.mxu0 }
 0x12d   : > { %v1971_v44 = vpop.f32.mrf.mxu1  ;;  %v853_v62 = vadd.f32 %v1951_v41, %v695_v59 }
 0x12e   : > { %v836_v43 = vpop.f32.mrf.mxu0 }
 0x12f   : > { %v965_v46 = vpop.f32.mrf.mxu1  ;;  %v851_v2 = vadd.f32 %v836_v43, %v693_v60  ;;  %v982_v4 = vadd.f32 %v1971_v44, %v853_v62 }
 0x130   : > { %v1952_v45 = vpop.f32.mrf.mxu0 }
 0x131   : > { %v1972_v51 = vpop.f32.mrf.mxu1  ;;  %v854_v5 = vadd.f32 %v1952_v45, %v696_v1  ;;  %v980_v8 = vadd.f32 %v965_v46, %v851_v2 }
 0x132   : > { %v839_v50 = vpop.f32.mrf.mxu0 }
 0x133   : > { %v968_v57 = vpop.f32.mrf.mxu1  ;;  %v852_v9 = vadd.f32 %v839_v50, %v694_v3  ;;  %v983_v11 = vadd.f32 %v1972_v51, %v854_v5 }
 0x135   : > { %v981_v16 = vadd.f32 %v968_v57, %v852_v9 }
 0x14c   : > { %v1991_v54 = vpop.f32.mrf.mxu0 }
 0x14d   : > { %v2011_v0 = vpop.f32.mrf.mxu1  ;;  %v1107_v10 = vadd.f32 %v1991_v54, %v982_v4 }
 0x14e   : > { %v1090_v63 = vpop.f32.mrf.mxu0 }
 0x14f   : > { %v1248_v7 = vpop.f32.mrf.mxu1  ;;  %v1105_v12 = vadd.f32 %v1090_v63, %v980_v8  ;;  %v1265_v17 = vadd.f32 %v2011_v0, %v1107_v10 }
 0x150   : > { %v1992_v6 = vpop.f32.mrf.mxu0 }
 0x151   : > { %v2012_v14 = vpop.f32.mrf.mxu1  ;;  %v1108_v18 = vadd.f32 %v1992_v6, %v983_v11  ;;  %v1263_v58 = vadd.f32 %v1248_v7, %v1105_v12 }
 0x152   : > { %v1093_v13 = vpop.f32.mrf.mxu0 }
 0x153   : > { %v1106_v20 = vadd.f32 %v1093_v13, %v981_v16  ;;  %v1251_v22 = vpop.f32.mrf.mxu1  ;;  %v1266_v24 = vadd.f32 %v2012_v14, %v1108_v18 }
 0x155   : > { %v1264_v28 = vadd.f32 %v1251_v22, %v1106_v20 }
 0x16c   : > { %v2031_v15 = vpop.f32.mrf.mxu0 }
 0x16d   : > { %v1394_v21 = vadd.f32 %v2031_v15, %v1265_v17 }
 0x16e   : > { %v1377_v23 = vpop.f32.mrf.mxu0 }
 0x16f   : > { %v1405_v25 = vadd.f32 %v1735_v19, %v1394_v21  ;;  %v1392_v26 = vadd.f32 %v1377_v23, %v1263_v58 }
 0x170   : > { %v2032_v27 = vpop.f32.mrf.mxu0 }
 0x171   : > { %v1738_v29 = vmul.f32 -1.442695, %v1405_v25  ;;  %v1403_v30 = vadd.f32 %v1735_v19, %v1392_v26  ;;  %v1395_v31 = vadd.f32 %v2032_v27, %v1266_v24 }
 0x172   : > { %v1380_v32 = vpop.f32.mrf.mxu0 }
 0x173   : > { %2129 = vpow2.f32 %v1738_v29  ;;  %v1736_v33 = vmul.f32 -1.442695, %v1403_v30  ;;  %v1406_v34 = vadd.f32 %v1735_v19, %v1395_v31  ;;  %v1393_v35 = vadd.f32 %v1380_v32, %v1264_v28 }
 0x175   : > { %2131 = vpow2.f32 %v1736_v33  ;;  %v1739_v36 = vmul.f32 -1.442695, %v1406_v34  ;;  %v1404_v37 = vadd.f32 %v1735_v19, %v1393_v35 }
 0x177   : > { %2133 = vpow2.f32 %v1739_v36  ;;  %v1737_v38 = vmul.f32 -1.442695, %v1404_v37 }
 0x179   : > { %2135 = vpow2.f32 %v1737_v38 }
 0x180   : > { %v2130_v39 = vpop.eup %2129 }
 0x181   : > { %v1421_v40 = vadd.f32 1.0, %v2130_v39 }
 0x182   : > { %v2132_v41 = vpop.eup %2131 }
 0x183   : > { %v1419_v42 = vadd.f32 1.0, %v2132_v41  ;;  %2137 = vrcp.f32 %v1421_v40 }
 0x184   : > { %v2134_v43 = vpop.eup %2133 }
 0x185   : > { %v1422_v44 = vadd.f32 1.0, %v2134_v43  ;;  %2139 = vrcp.f32 %v1419_v42 }
 0x186   : > { %v2136_v45 = vpop.eup %2135 }
 0x187   : > { %2141 = vrcp.f32 %v1422_v44  ;;  %v1420_v46 = vadd.f32 1.0, %v2136_v45 }
 0x189   : > { %2143 = vrcp.f32 %v1420_v46 }
 0x190   : > { %v2138_v47 = vpop.eup %2137 }
 0x191   : > { %v1433_v50 = vmul.f32 %v2138_v47, %v1405_v25 }
 0x192   : > { %v2140_v48 = vpop.eup %2139 }
 0x193   : > { %v1431_v53 = vmul.f32 %v2140_v48, %v1403_v30 }
 0x194   : > { %v2142_v49 = vpop.eup %2141 }
 0x195   : > { %v1434_v51 = vmul.f32 %v2142_v49, %v1406_v34 }
 0x196   : > { %v2144_v52 = vpop.eup %2143 }
 0x197   : > { %v1760_v54 = vpack.c.bf16 %v1434_v51, %v1433_v50  ;;  %v1432_v55 = vmul.f32 %v2144_v52, %v1404_v37 }
 0x199   : > { %1762 = vst [vmem:[%s170_s21 + $0x8] sm:$0xff] %v1760_v54   ;;  %v1755_v59 = vpack.c.bf16 %v1432_v55, %v1431_v53 }
 0x19b   : > { %1756 = vst [vmem:[%s170_s21] sm:$0xff] %v1755_v59  }
 0x19c PF: > { %s13_s12 = sadd.s32 1, %s2151_s12  }
 0x19d   : > { %p10_p4 = scmp.ge.s32.totalorder %s13_s12, 4  }
 0x19f   :  { %12 = sbr.rel (!%p10_p4) target bundleno = 1 (0x1), region = 70 }

// kernel: vqgan_forward.13
= control target key start
LH: loop header
LB: loop body
LE: loop exit
PB: predicated region body
PF: predicated region fallthrough
CT: control target
= control target key end

     0   :  { %s3472_s12 = smov 0   ;;  %s4115_s0 = inlined_call_operand.vmem [shape: bf16[2,176,128], index: 0, kind: input, shape index: {}]   ;;  %s4116_s1 = inlined_call_operand.vmem [shape: bf16[9,128,128], index: 1, kind: input, shape index: {}]   ;;  %s4117_s2 = inlined_call_operand.vmem [shape: f32[1,128], index: 2, kind: input, shape index: {}]   ;;  %s4118_s3 = inlined_call_operand.vmem [shape: bf16[2,128,128], index: 3, kind: output, shape index: {}]  }
   0x1 LB: > { %s2532_s13 = sadd.s32 4294967295, %s3450_s12   ;;  %p2536_p0 = scmp.ge.s32.totalorder %s3450_s12, 1  ;;  %s3450_s12 = sphi %s3472_s12, %s13_s12  }
   0x2   : > { %p137_p1 = scmp.lt.s32.totalorder %s3450_s12, 3 }
   0x4   : > { %p138_p2 = pnand %p2536_p0, %p137_p1 }
   0x6   : > { %141 = sbr.rel (%p138_p2) target bundleno = 387 (0x183), region = 32 }
   0xb   : > { %v3326_v0 = vld [vmem:[%s4116_s1 + $0x78] sm:$0xff]   ;;  %p161_p3 = scmp.lt.s32.totalorder %s2532_s13, 1  ;;  %v3328_v2 = vld [vmem:[%s4116_s1 + $0x70] sm:$0xff]   ;;  %v3330_v4 = vld [vmem:[%s4116_s1 + $0x68] sm:$0xff]   ;;  %vm265_vm0 = vsmask.f32 7424 }
   0xc   : > { %v3327_v1 = vld [vmem:[%s4116_s1 + $0x38] sm:$0xff]   ;;  %3013 = vmatprep.subr.bf16.mxu0 %v3326_v0  ;;  %v3329_v3 = vld [vmem:[%s4116_s1 + $0x30] sm:$0xff]   ;;  %v3331_v5 = vld [vmem:[%s4116_s1 + $0x28] sm:$0xff]   ;;  %vm661_vm1 = vcmask 1046528  }
   0xd   : > { %3045 = vmatprep.subr.bf16.mxu1 %v3327_v1  ;;  %3014 = vmatpush3.bf16.msra.mxu0 %v3326_v0  ;;  %s4156_s13 = smov (!%p161_p3, %s2532_s13), 1  ;;  %v3332_v6 = vld [vmem:[%s4116_s1 + $0x60] sm:$0xff]   ;;  %v3334_v8 = vld [vmem:[%s4116_s1 + $0x58] sm:$0xff]   ;;  %v3336_v10 = vld [vmem:[%s4116_s1 + $0x50] sm:$0xff]  }
   0xe   : > { %3046 = vmatpush3.bf16.msra.mxu1 %v3327_v1  ;;  %3015 = vmatprep.subr.bf16.mxu0 %v3328_v2  ;;  %v3333_v7 = vld [vmem:[%s4116_s1 + $0x20] sm:$0xff]   ;;  %s3317_s30 = smul.u32 88, %s4156_s13  ;;  %v3335_v9 = vld [vmem:[%s4116_s1 + $0x18] sm:$0xff]   ;;  %v3337_v11 = vld [vmem:[%s4116_s1 + $0x10] sm:$0xff]   ;;  %s2805_s18 = sshll.u32 %s4156_s13, 6 }
   0xf   : > { %3047 = vmatprep.subr.bf16.mxu1 %v3329_v3  ;;  %v3338_v17 = vld [vmem:[%s4116_s1 + $0x48] sm:$0xff]   ;;  %v3340_v24 = vld [vmem:[%s4116_s1 + $0x40] sm:$0xff]   ;;  %v3345_v36 = vld [vmem:[%s4116_s1 + $0xb8] sm:$0xff]   ;;  %s4082_s20 = scalar_lea.vmem %s4118_s3, %s2805_s18 }
  0x10   : > { %s3516_s10 = scalar_lea.vmem %s4115_s0, %s3317_s30  ;;  %v3339_v21 = vld [vmem:[%s4116_s1 + $0x8] sm:$0xff]   ;;  %v3341_v29 = vld [vmem:[%s4116_s1] sm:$0xff]   ;;  %v3346_v37 = vld [vmem:[%s4116_s1 + $0xf8] sm:$0xff]  }
  0x11   : > { %3016 = vmatpush3.bf16.msra.mxu0 %v3328_v2  ;;  %v172_v12 = vld [vmem:[%s3516_s10] sm:$0xf]  ;;  %v3526_v13 = vld [vmem:[%s3516_s10 + $0x4] sm:$0xf]  ;;  %v3530_v15 = vld [vmem:[%s3516_s10 + $0x8] sm:$0xff]  }
  0x12   : > { %3048 = vmatpush3.bf16.msra.mxu1 %v3329_v3  ;;  %3017 = vmatprep.subr.bf16.mxu0 %v3330_v4  ;;  %v2556_v14 = vcombine.low %v172_v12, %v3526_v13  ;;  %v3533_v16 = vld [vmem:[%s3516_s10 + $0x10] sm:$0xff]   ;;  %v274_v20 = vshll.u32 %v3530_v15, 16  ;;  %v278_v25 = vshrl.u32 %v3530_v15, 16  ;;  %v3548_v28 = vld [vmem:[%s3516_s10 + $0x18] sm:$0xff]   ;;  %v3557_v35 = vld [vmem:[%s3516_s10 + $0x20] sm:$0xff]  }
  0x13   : > { %3049 = vmatprep.subr.bf16.mxu1 %v3331_v5  ;;  %v282_v26 = vshll.u32 %v3533_v16, 16  ;;  %v286_v31 = vshrl.u32 %v3533_v16, 16  ;;  %v290_v32 = vshll.u32 %v3548_v28, 16  ;;  %v3566_v40 = vld [vmem:[%s3516_s10 + $0x28] sm:$0xff]   ;;  %v294_v42 = vshrl.u32 %v3548_v28, 16  ;;  %v3347_v44 = vld [vmem:[%s4116_s1 + $0xb0] sm:$0xff]  }
  0x14   : > { %v267_v18 = vshrl.u32 %v2556_v14, 16  ;;  %v269_v19 = vshll.u32 %v2556_v14, 16  ;;  %3061 = vmatprep.mubr.bf16.mxu1 %v2556_v14  ;;  %v276_v23 = vrot.slane %v274_v20, 1  ;;  %v298_v43 = vshll.u32 %v3557_v35, 16  ;;  %v3348_v45 = vld [vmem:[%s4116_s1 + $0xf0] sm:$0xff]   ;;  %v3351_v52 = vld [vmem:[%s4116_s1 + $0xa8] sm:$0xff]  }
  0x15   : > { %3018 = vmatpush3.bf16.msra.mxu0 %v3330_v4  ;;  %v284_v34 = vrot.slane %v282_v26, 1  ;;  %v292_v39 = vrot.slane %v290_v32, 1  ;;  %v302_v47 = vshrl.u32 %v3557_v35, 16  ;;  %v306_v48 = vshll.u32 %v3566_v40, 16  ;;  %v3582_v51 = vld [vmem:[%s3516_s10 + $0x30] sm:$0xff]   ;;  %v3352_v53 = vld [vmem:[%s4116_s1 + $0xe8] sm:$0xff]  }
  0x16   : > { %3050 = vmatpush3.bf16.msra.mxu1 %v3331_v5  ;;  %3019 = vmatprep.subr.bf16.mxu0 %v3332_v6  ;;  %v271_v22 = vrot.slane %v269_v19, 1  ;;  %v280_v33 = vor.u32 %v278_v25, %v276_v23  ;;  %v300_v50 = vrot.slane %v298_v43, 1  ;;  %v3592_v56 = vld [vmem:[%s3516_s10 + $0x38] sm:$0xff]   ;;  %v310_v58 = vshrl.u32 %v3566_v40, 16  ;;  %v3353_v60 = vld [vmem:[%s4116_s1 + $0xa0] sm:$0xff]   ;;  %v3359_v12 = vld [vmem:[%s4116_s1 + $0x90] sm:$0xff]  }
  0x17   : > { %3051 = vmatprep.subr.bf16.mxu1 %v3333_v7  ;;  %v288_v38 = vor.u32 %v286_v31, %v284_v34  ;;  %v296_v49 = vor.u32 %v294_v42, %v292_v39  ;;  %v308_v55 = vrot.slane %v306_v48, 1  ;;  %v314_v59 = vshll.u32 %v3582_v51, 16  ;;  %v3354_v61 = vld [vmem:[%s4116_s1 + $0xe0] sm:$0xff]   ;;  %v3357_v4 = vld [vmem:[%s4116_s1 + $0x98] sm:$0xff]   ;;  %v3360_v14 = vld [vmem:[%s4116_s1 + $0xd0] sm:$0xff]  }
  0x18   : > { %v272_v27 = vor.u32 %v271_v22, %v267_v18  ;;  %v285_v41 = vsel %vm265_vm0, %v280_v33, %v284_v34  ;;  %v304_v54 = vor.u32 %v302_v47, %v300_v50  ;;  %v3604_v62 = vld [vmem:[%s3516_s10 + $0x40] ss:$0 sps:$4 sm:$0x11]   ;;  %v318_v0 = vshrl.u32 %v3582_v51, 16  ;;  %v3358_v5 = vld [vmem:[%s4116_s1 + $0xd8] sm:$0xff]   ;;  %v3364_v22 = vld [vmem:[%s4116_s1 + $0xc8] sm:$0xff]  }
  0x19   : > { %3020 = vmatpush3.bf16.msra.mxu0 %v3332_v6  ;;  %v293_v46 = vsel %vm265_vm0, %v288_v38, %v292_v39  ;;  %v301_v57 = vsel %vm265_vm0, %v296_v49, %v300_v50  ;;  %v322_v1 = vshll.u32 %v3592_v56, 16  ;;  %v312_v2 = vor.u32 %v310_v58, %v308_v55  ;;  %v3365_v25 = vld [vmem:[%s4116_s1 + $0x80] sm:$0xff]   ;;  %v3371_v31 = vld [vmem:[%s4116_s1 + $0x178] sm:$0xff]   ;;  %v3372_v34 = vld [vmem:[%s4116_s1 + $0x130] sm:$0xff]  }
  0x1a   : > { %3052 = vmatpush3.bf16.msra.mxu1 %v3333_v7  ;;  %3021 = vmatprep.subr.bf16.mxu0 %v3334_v8  ;;  %v277_v30 = vsel %vm265_vm0, %v272_v27, %v276_v23  ;;  %v309_v63 = vsel %vm265_vm0, %v304_v54, %v308_v55  ;;  %v316_v3 = vrot.slane %v314_v59, 1  ;;  %v326_v6 = vshrl.u32 %v3592_v56, 16  ;;  %v3366_v26 = vld [vmem:[%s4116_s1 + $0xc0] sm:$0xff]   ;;  %v3376_v39 = vld [vmem:[%s4116_s1 + $0x128] sm:$0xff]   ;;  %v3694_v54 = vld [vmem:[%s3516_s10 + $0x10] sm:$0xff]  }
  0x1b   : > { %3053 = vmatprep.subr.bf16.mxu1 %v3335_v9  ;;  %3029 = vmatprep.mubr.bf16.mxu0 %v277_v30  ;;  %v663_v23 = vrot.slane %v3530_v15, 1  ;;  %v3370_v30 = vld [vmem:[%s4116_s1 + $0x138] sm:$0xff]   ;;  %v667_v32 = vrot.slane %v3548_v28, 1  ;;  %v669_v38 = vrot.slane %v3557_v35, 1  ;;  %v3375_v42 = vld [vmem:[%s3516_s10 + $0x20] sm:$0xff]   ;;  %v3380_v49 = vld [vmem:[%s3516_s10 + $0x28] sm:$0xff]  }
  0x1c   : > { %v320_v7 = vor.u32 %v318_v0, %v316_v3  ;;  %v3378_v43 = vld [vmem:[%s4116_s1 + $0x120] sm:$0xff]   ;;  %v673_v50 = vrot.slane %v3582_v51, 1  ;;  %v1404_v55 = vld [vmem:[%s3516_s10 + $0x8] sm:$0xe]  ;;  %v3386_v0 = vld [vmem:[%s3516_s10 + $0x38] sm:$0xff]  }
  0x1d   : > { %3022 = vmatpush3.bf16.msra.mxu0 %v3334_v8  ;;  %v324_v8 = vrot.slane %v322_v1, 1  ;;  %v3379_v47 = vld [vmem:[%s4116_s1 + $0x160] sm:$0xff]  }
  0x1e   : > { %3054 = vmatpush3.bf16.msra.mxu1 %v3335_v9  ;;  %3023 = vmatprep.subr.bf16.mxu0 %v3336_v10  ;;  %v330_v9 = vshll.u32 %v3604_v62, 16 }
  0x1f   : > { %3055 = vmatprep.subr.bf16.mxu1 %v3337_v11  ;;  %v328_v19 = vor.u32 %v326_v6, %v324_v8  ;;  %v3388_v6 = vld [vmem:[%s4116_s1 + $0x108] sm:$0xff]  }
  0x20   : > { %v332_v20 = vrot.slane %v330_v9, 1 }
  0x21   : > { %3024 = vmatpush3.bf16.msra.mxu0 %v3336_v10  ;;  %v317_v10 = vsel %vm265_vm0, %v312_v2, %v316_v3 }
  0x22   : > { %3056 = vmatpush3.bf16.msra.mxu1 %v3337_v11  ;;  %3025 = vmatprep.subr.bf16.mxu0 %v3338_v17  ;;  %v640_v11 = vld [vmem:[%s3516_s10] sm:$0xe] }
  0x23   : > { %3057 = vmatprep.subr.bf16.mxu1 %v3339_v21  ;;  %v2597_v18 = vcombine.low %v640_v11, %v3526_v13 }
  0x25   : > { %3026 = vmatpush3.bf16.msra.mxu0 %v3338_v17  ;;  %v325_v17 = vsel %vm265_vm0, %v320_v7, %v324_v8  ;;  %v662_v13 = vrot.slane %v2597_v18, 1  ;;  %v3389_v7 = vld [vmem:[%s4116_s1 + $0x148] sm:$0xff]   ;;  %v1179_v8 = vshrl.u32 %v3694_v54, 16 }
  0x26   : > { %3058 = vmatpush3.bf16.msra.mxu1 %v3339_v21  ;;  %3027 = vmatprep.subr.bf16.mxu0 %v3340_v24  ;;  %v3363_v21 = vld [vmem:[%s4116_s1 + $0x88] sm:$0xff]  }
  0x27   : > { %3059 = vmatprep.subr.bf16.mxu1 %v3341_v29  ;;  %v664_v27 = vsel %vm661_vm1, %v662_v13, %v663_v23 }
  0x29   : > { %3028 = vmatpush3.bf16.msra.mxu0 %v3340_v24  ;;  %v333_v24 = vsel %vm265_vm0, %v328_v19, %v332_v20  ;;  %v3390_v19 = vld [vmem:[%s4116_s1 + $0x100] sm:$0xff]  }
  0x2a   : > { %3060 = vmatpush3.bf16.msra.mxu1 %v3341_v29  ;;  %3077 = vmatprep.subr.bf16.mxu0 %v3345_v36  ;;  %v665_v29 = vrot.slane %v3533_v16, 1  ;;  %v3391_v20 = vld [vmem:[%s4116_s1 + $0x140] sm:$0xff]  }
  0x2b   : > { %3109 = vmatprep.subr.bf16.mxu1 %v3346_v37 }
  0x2c   : > { %3030 = vmatmul.mubr.bf16.vlgmr.msra.gmra.mxu0 %v285_v41  ;;  %v666_v33 = vsel %vm661_vm1, %v663_v23, %v665_v29  ;;  %v3377_v41 = vld [vmem:[%s4116_s1 + $0x168] sm:$0xff]  }
  0x2d   : > { %3062 = vmatmul.mubr.bf16.vlgmr.msra.gmra.mxu1 %v3530_v15  ;;  %3078 = vmatpush3.bf16.msra.mxu0 %v3345_v36  ;;  %v3368_v15 = vld [vmem:[%s3516_s10 + $0x8] sm:$0xff]   ;;  %v3373_v36 = vld [vmem:[%s4116_s1 + $0x170] sm:$0xff]  }
  0x2e   : > { %3110 = vmatpush3.bf16.msra.mxu1 %v3346_v37  ;;  %3079 = vmatprep.subr.bf16.mxu0 %v3347_v44  ;;  %v668_v37 = vsel %vm661_vm1, %v665_v29, %v667_v32  ;;  %v3737_v23 = vld [vmem:[%s3516_s10 + $0x28] sm:$0xff]   ;;  %v3397_v29 = vld [vmem:[%s4116_s1 + $0x1f8] sm:$0xff]  }
  0x2f   : > { %3111 = vmatprep.subr.bf16.mxu1 %v3348_v45  ;;  %3033 = vmatprep.mubr.bf16.mxu0 %v293_v46  ;;  %v1091_v46 = vld [vmem:[%s3516_s10 + $0xc] sm:$0xf] }
  0x30   : > { %3065 = vmatprep.mubr.bf16.mxu1 %v3533_v16  ;;  %v3369_v16 = vld [vmem:[%s3516_s10 + $0x10] sm:$0xff]  }
  0x31   : > { %3080 = vmatpush3.bf16.msra.mxu0 %v3347_v44  ;;  %v670_v44 = vsel %vm661_vm1, %v667_v32, %v669_v38 }
  0x32   : > { %3112 = vmatpush3.bf16.msra.mxu1 %v3348_v45  ;;  %3081 = vmatprep.subr.bf16.mxu0 %v3351_v52  ;;  %v1090_v45 = vld [vmem:[%s3516_s10 + $0x8] sm:$0xf] }
  0x33   : > { %3113 = vmatprep.subr.bf16.mxu1 %v3352_v53 }
  0x34   : > { %3034 = vmatmul.mubr.bf16.gmra.mxu0 %v301_v57  ;;  %v3381_v57 = vld [vmem:[%s3516_s10 + $0x30] sm:$0xff]  }
  0x35   : > { %3066 = vmatmul.mubr.bf16.gmra.mxu1 %v3548_v28  ;;  %3082 = vmatpush3.bf16.msra.mxu0 %v3351_v52  ;;  %v3374_v28 = vld [vmem:[%s3516_s10 + $0x18] sm:$0xff]  }
  0x36   : > { %3114 = vmatpush3.bf16.msra.mxu1 %v3352_v53  ;;  %3083 = vmatprep.subr.bf16.mxu0 %v3353_v60  ;;  %v3382_v52 = vld [vmem:[%s4116_s1 + $0x118] sm:$0xff]  }
  0x37   : > { %3115 = vmatprep.subr.bf16.mxu1 %v3354_v61  ;;  %3037 = vmatprep.mubr.bf16.mxu0 %v309_v63  ;;  %v3383_v53 = vld [vmem:[%s4116_s1 + $0x158] sm:$0xff]   ;;  %v2687_v63 = vcombine.low %v1404_v55, %v1091_v46  ;;  %v3782_v55 = vld [vmem:[%s3516_s10 + $0x40] sm:$0xff]  }
  0x38   : > { %3069 = vmatprep.mubr.bf16.mxu1 %v3557_v35  ;;  %v671_v35 = vrot.slane %v3566_v40, 1 }
  0x39   : > { %3084 = vmatpush3.bf16.msra.mxu0 %v3353_v60  ;;  %v3384_v60 = vld [vmem:[%s4116_s1 + $0x110] sm:$0xff]   ;;  %v1425_v9 = vrot.slane %v2687_v63, 1 }
  0x3a   : > { %3116 = vmatpush3.bf16.msra.mxu1 %v3354_v61  ;;  %3085 = vmatprep.subr.bf16.mxu0 %v3357_v4  ;;  %v672_v48 = vsel %vm661_vm1, %v669_v38, %v671_v35  ;;  %v674_v59 = vsel %vm661_vm1, %v671_v35, %v673_v50  ;;  %v3385_v61 = vld [vmem:[%s4116_s1 + $0x150] sm:$0xff]  }
  0x3b   : > { %3117 = vmatprep.subr.bf16.mxu1 %v3358_v5  ;;  %v3399_v38 = vld [vmem:[%s4116_s1 + $0x1f0] sm:$0xff]  }
  0x3c   : > { %3038 = vmatmul.mubr.bf16.gmra.mxu0 %v317_v10  ;;  %v3387_v10 = vld [vmem:[%s3516_s10 + $0x40] sm:$0xff]  }
  0x3d   : > { %3070 = vmatmul.mubr.bf16.gmra.mxu1 %v3566_v40  ;;  %3086 = vmatpush3.bf16.msra.mxu0 %v3357_v4  ;;  %v2654_v40 = vcombine.low %v1090_v45, %v1091_v46  ;;  %v677_v4 = vrot.slane %v3604_v62, 1  ;;  %v3722_v62 = vld [vmem:[%s3516_s10 + $0x20] sm:$0xff]   ;;  %v1432_v46 = vrot.slane %v3737_v23, 1 }
  0x3e   : > { %3118 = vmatpush3.bf16.msra.mxu1 %v3358_v5  ;;  %3087 = vmatprep.subr.bf16.mxu0 %v3359_v12  ;;  %v3711_v5 = vld [vmem:[%s3516_s10 + $0x18] sm:$0xff]   ;;  %v1191_v13 = vshll.u32 %v3722_v62, 16 }
  0x3f   : > { %3119 = vmatprep.subr.bf16.mxu1 %v3360_v14  ;;  %3041 = vmatprep.mubr.bf16.mxu0 %v325_v17  ;;  %v1170_v58 = vshll.u32 %v2654_v40, 16  ;;  %v1168_v2 = vshrl.u32 %v2654_v40, 16  ;;  %v1426_v17 = vrot.slane %v3694_v54, 1  ;;  %v1183_v18 = vshll.u32 %v3711_v5, 16 }
  0x40   : > { %3073 = vmatprep.mubr.bf16.mxu1 %v3582_v51  ;;  %v675_v51 = vrot.slane %v3592_v56, 1  ;;  %v1193_v32 = vrot.slane %v1191_v13, 1 }
  0x41   : > { %3088 = vmatpush3.bf16.msra.mxu0 %v3359_v12  ;;  %v1172_v3 = vrot.slane %v1170_v58, 1  ;;  %v1853_v58 = vld [vmem:[%s3516_s10 + $0x10] sm:$0xf] }
  0x42   : > { %3120 = vmatpush3.bf16.msra.mxu1 %v3360_v14  ;;  %3089 = vmatprep.subr.bf16.mxu0 %v3363_v21  ;;  %v676_v1 = vsel %vm661_vm1, %v673_v50, %v675_v51  ;;  %v678_v14 = vsel %vm661_vm1, %v675_v51, %v677_v4  ;;  %v3786_v51 = vld [vmem:[%s3516_s10 + $0x48] ss:$0 sps:$4 sm:$0x11]  }
  0x43   : > { %3121 = vmatprep.subr.bf16.mxu1 %v3364_v22  ;;  %v1173_v12 = vor.u32 %v1172_v3, %v1168_v2 }
  0x44   : > { %3042 = vmatmul.mubr.bf16.gmra.mxu0 %v333_v24 }
  0x45   : > { %3074 = vmatmul.mubr.bf16.gmra.mxu1 %v3592_v56  ;;  %3090 = vmatpush3.bf16.msra.mxu0 %v3363_v21  ;;  %v1175_v56 = vshll.u32 %v3694_v54, 16 }
  0x46   : > { %3122 = vmatpush3.bf16.msra.mxu1 %v3364_v22  ;;  %3091 = vmatprep.subr.bf16.mxu0 %v3365_v25  ;;  %v1187_v22 = vshrl.u32 %v3711_v5, 16 }
  0x47   : > { %3123 = vmatprep.subr.bf16.mxu1 %v3366_v26  ;;  %3093 = vmatprep.mubr.bf16.mxu0 %v664_v27  ;;  %v1177_v11 = vrot.slane %v1175_v56, 1  ;;  %v1428_v27 = vrot.slane %v3711_v5, 1  ;;  %v1223_v56 = vshll.u32 %v3782_v55, 16 }
  0x48   : > { %3125 = vmatprep.mubr.bf16.mxu1 %v3368_v15  ;;  %v3396_v15 = vld [vmem:[%s4116_s1 + $0x1b8] sm:$0xff]  }
  0x49   : > { %3092 = vmatpush3.bf16.msra.mxu0 %v3365_v25  ;;  %v1178_v21 = vsel %vm265_vm0, %v1173_v12, %v1177_v11  ;;  %v1181_v24 = vor.u32 %v1179_v8, %v1177_v11  ;;  %v1427_v25 = vsel %vm661_vm1, %v1425_v9, %v1426_v17  ;;  %v1231_v8 = vshll.u32 %v3786_v51, 16  ;;  %v3410_v12 = vld [vmem:[%s4116_s1 + $0x190] sm:$0xff]  }
  0x4a   : > { %3124 = vmatpush3.bf16.msra.mxu1 %v3366_v26  ;;  %3141 = vmatprep.subr.bf16.mxu0 %v3370_v30  ;;  %v1185_v26 = vrot.slane %v1183_v18, 1  ;;  %v1438_v11 = vrot.slane %v3782_v55, 1 }
  0x4b   : > { %3173 = vmatprep.subr.bf16.mxu1 %v3371_v31 }
  0x4c   : > { %3094 = vmatmul.mubr.bf16.vlgmr.msra.gmra.mxu0 %v666_v33  ;;  %v1199_v33 = vshll.u32 %v3737_v23, 16 }
  0x4d   : > { %3126 = vmatmul.mubr.bf16.vlgmr.msra.gmra.mxu1 %v3369_v16  ;;  %3142 = vmatpush3.bf16.msra.mxu0 %v3370_v30  ;;  %v3398_v30 = vld [vmem:[%s4116_s1 + $0x1b0] sm:$0xff]  }
  0x4e   : > { %3174 = vmatpush3.bf16.msra.mxu1 %v3371_v31  ;;  %3143 = vmatprep.subr.bf16.mxu0 %v3372_v34  ;;  %v1189_v31 = vor.u32 %v1187_v22, %v1185_v26  ;;  %v3752_v16 = vld [vmem:[%s3516_s10 + $0x30] sm:$0xff]   ;;  %v1440_v22 = vrot.slane %v3786_v51, 1 }
  0x4f   : > { %3175 = vmatprep.subr.bf16.mxu1 %v3373_v36  ;;  %3097 = vmatprep.mubr.bf16.mxu0 %v668_v37  ;;  %v1195_v37 = vshrl.u32 %v3722_v62, 16  ;;  %v1207_v35 = vshll.u32 %v3752_v16, 16  ;;  %v1211_v40 = vshrl.u32 %v3752_v16, 16 }
  0x50   : > { %3129 = vmatprep.mubr.bf16.mxu1 %v3374_v28  ;;  %v1429_v28 = vsel %vm661_vm1, %v1426_v17, %v1428_v27  ;;  %v3816_v17 = vld [vmem:[%s3516_s10 + $0x18] sm:$0xff]  }
  0x51   : > { %3144 = vmatpush3.bf16.msra.mxu0 %v3372_v34  ;;  %v1186_v34 = vsel %vm265_vm0, %v1181_v24, %v1185_v26  ;;  %v1197_v45 = vor.u32 %v1195_v37, %v1193_v32  ;;  %v1209_v54 = vrot.slane %v1207_v35, 1  ;;  %v3414_v24 = vld [vmem:[%s4116_s1 + $0x188] sm:$0xff]   ;;  %v1942_v37 = vshrl.u32 %v3816_v17, 16 }
  0x52   : > { %3176 = vmatpush3.bf16.msra.mxu1 %v3373_v36  ;;  %3145 = vmatprep.subr.bf16.mxu0 %v3376_v39  ;;  %v1430_v36 = vrot.slane %v3722_v62, 1 }
  0x53   : > { %3177 = vmatprep.subr.bf16.mxu1 %v3377_v41  ;;  %v1213_v2 = vor.u32 %v1211_v40, %v1209_v54  ;;  %v3860_v40 = vld [vmem:[%s3516_s10 + $0x38] sm:$0xff]  }
  0x54   : > { %3098 = vmatmul.mubr.bf16.gmra.mxu0 %v670_v44  ;;  %v1431_v44 = vsel %vm661_vm1, %v1428_v27, %v1430_v36 }
  0x55   : > { %3130 = vmatmul.mubr.bf16.gmra.mxu1 %v3375_v42  ;;  %3146 = vmatpush3.bf16.msra.mxu0 %v3376_v39  ;;  %v3762_v39 = vld [vmem:[%s3516_s10 + $0x38] sm:$0xff]   ;;  %v1201_v42 = vrot.slane %v1199_v33, 1 }
  0x56   : > { %3178 = vmatpush3.bf16.msra.mxu1 %v3377_v41  ;;  %3147 = vmatprep.subr.bf16.mxu0 %v3378_v43  ;;  %v1194_v41 = vsel %vm265_vm0, %v1189_v31, %v1193_v32  ;;  %v1215_v50 = vshll.u32 %v3762_v39, 16  ;;  %v1436_v5 = vrot.slane %v3762_v39, 1 }
  0x57   : > { %3179 = vmatprep.subr.bf16.mxu1 %v3379_v47  ;;  %3101 = vmatprep.mubr.bf16.mxu0 %v672_v48  ;;  %v3403_v48 = vld [vmem:[%s4116_s1 + $0x1e8] sm:$0xff]  }
  0x58   : > { %3133 = vmatprep.mubr.bf16.mxu1 %v3380_v49  ;;  %v1434_v49 = vrot.slane %v3752_v16, 1  ;;  %v1217_v3 = vrot.slane %v1215_v50, 1  ;;  %v3837_v16 = vld [vmem:[%s3516_s10 + $0x28] sm:$0xff]  }
  0x59   : > { %3148 = vmatpush3.bf16.msra.mxu0 %v3378_v43  ;;  %v1203_v43 = vshrl.u32 %v3737_v23, 16  ;;  %v1439_v23 = vsel %vm661_vm1, %v1436_v5, %v1438_v11 }
  0x5a   : > { %3180 = vmatpush3.bf16.msra.mxu1 %v3379_v47  ;;  %3149 = vmatprep.subr.bf16.mxu0 %v3382_v52  ;;  %v3402_v47 = vld [vmem:[%s4116_s1 + $0x1a8] sm:$0xff]   ;;  %v1218_v62 = vsel %vm265_vm0, %v1213_v2, %v1217_v3 }
  0x5b   : > { %3181 = vmatprep.subr.bf16.mxu1 %v3383_v53 }
  0x5c   : > { %3102 = vmatmul.mubr.bf16.gmra.mxu0 %v674_v59  ;;  %v1433_v59 = vsel %vm661_vm1, %v1430_v36, %v1432_v46  ;;  %v3416_v36 = vld [vmem:[%s4116_s1 + $0x180] sm:$0xff]  }
  0x5d   : > { %3134 = vmatmul.mubr.bf16.gmra.mxu1 %v3381_v57  ;;  %3150 = vmatpush3.bf16.msra.mxu0 %v3382_v52  ;;  %v3404_v52 = vld [vmem:[%s4116_s1 + $0x1a0] sm:$0xff]   ;;  %v1202_v57 = vsel %vm265_vm0, %v1197_v45, %v1201_v42  ;;  %v3423_v45 = vld [vmem:[%s4116_s1 + $0x238] sm:$0xff]  }
  0x5e   : > { %3182 = vmatpush3.bf16.msra.mxu1 %v3383_v53  ;;  %3151 = vmatprep.subr.bf16.mxu0 %v3384_v60  ;;  %v1205_v53 = vor.u32 %v1203_v43, %v1201_v42  ;;  %v1954_v43 = vshll.u32 %v3837_v16, 16 }
  0x5f   : > { %3183 = vmatprep.subr.bf16.mxu1 %v3385_v61  ;;  %3105 = vmatprep.mubr.bf16.mxu0 %v676_v1  ;;  %v1435_v1 = vsel %vm661_vm1, %v1432_v46, %v1434_v49  ;;  %v3856_v46 = vld [vmem:[%s3516_s10 + $0x30] sm:$0xff]  }
  0x60   : > { %3137 = vmatprep.mubr.bf16.mxu1 %v3386_v0  ;;  %v1210_v63 = vsel %vm265_vm0, %v1205_v53, %v1209_v54  ;;  %v1219_v0 = vshrl.u32 %v3762_v39, 16  ;;  %v3418_v39 = vld [vmem:[%s3516_s10 + $0x10] sm:$0xff]   ;;  %v1958_v53 = vshrl.u32 %v3837_v16, 16  ;;  %v1962_v54 = vshll.u32 %v3856_v46, 16 }
  0x61   : > { %3152 = vmatpush3.bf16.msra.mxu0 %v3384_v60  ;;  %v3791_v60 = vld [vmem:[%s3516_s10 + $0x14] sm:$0xf]  ;;  %v1966_v51 = vshrl.u32 %v3856_v46, 16 }
  0x62   : > { %3184 = vmatpush3.bf16.msra.mxu1 %v3385_v61  ;;  %3153 = vmatprep.subr.bf16.mxu0 %v3388_v6  ;;  %v3405_v61 = vld [vmem:[%s4116_s1 + $0x1e0] sm:$0xff]   ;;  %v2744_v4 = vcombine.low %v1853_v58, %v3791_v60  ;;  %v1221_v9 = vor.u32 %v1219_v0, %v1217_v3  ;;  %v1970_v58 = vshll.u32 %v3860_v40, 16  ;;  %v3880_v3 = vld [vmem:[%s3516_s10 + $0x48] sm:$0xff]  }
  0x63   : > { %3185 = vmatprep.subr.bf16.mxu1 %v3389_v7  ;;  %v3876_v0 = vld [vmem:[%s3516_s10 + $0x40] sm:$0xff]  }
  0x64   : > { %3106 = vmatmul.mubr.bf16.gmra.mxu0 %v678_v14  ;;  %v1227_v14 = vshrl.u32 %v3782_v55, 16  ;;  %v1933_v18 = vshll.u32 %v2744_v4, 16  ;;  %v1931_v26 = vshrl.u32 %v2744_v4, 16  ;;  %v3425_v55 = vld [vmem:[%s3516_s10 + $0x20] sm:$0xff]   ;;  %v1972_v2 = vrot.slane %v1970_v58, 1 }
  0x65   : > { %3138 = vmatmul.mubr.bf16.gmra.mxu1 %v3387_v10  ;;  %3154 = vmatpush3.bf16.msra.mxu0 %v3388_v6  ;;  %v3408_v6 = vld [vmem:[%s4116_s1 + $0x198] sm:$0xff]   ;;  %v1225_v10 = vrot.slane %v1223_v56, 1  ;;  %v3427_v56 = vld [vmem:[%s3516_s10 + $0x28] sm:$0xff]  }
  0x66   : > { %3186 = vmatpush3.bf16.msra.mxu1 %v3389_v7  ;;  %3155 = vmatprep.subr.bf16.mxu0 %v3390_v19  ;;  %v3409_v7 = vld [vmem:[%s4116_s1 + $0x1d8] sm:$0xff]   ;;  %v1935_v27 = vrot.slane %v1933_v18, 1  ;;  %v3896_v18 = vld [vmem:[%s3516_s10 + $0x50] ss:$0 sps:$4 sm:$0x11]  }
  0x67   : > { %3187 = vmatprep.subr.bf16.mxu1 %v3391_v20  ;;  %3157 = vmatprep.mubr.bf16.mxu0 %v1178_v21  ;;  %v1233_v21 = vrot.slane %v1231_v8, 1  ;;  %v1226_v13 = vsel %vm265_vm0, %v1221_v9, %v1225_v10  ;;  %v3431_v8 = vld [vmem:[%s3516_s10 + $0x30] sm:$0xff]  }
  0x68   : > { %3189 = vmatprep.mubr.bf16.mxu1 %v1427_v25  ;;  %v1229_v25 = vor.u32 %v1227_v14, %v1225_v10  ;;  %v1936_v32 = vor.u32 %v1935_v27, %v1931_v26  ;;  %v1982_v10 = vshrl.u32 %v3876_v0, 16  ;;  %v3435_v14 = vld [vmem:[%s4116_s1 + $0x218] sm:$0xff]   ;;  %v3437_v26 = vld [vmem:[%s3516_s10 + $0x40] sm:$0xff]  }
  0x69   : > { %3156 = vmatpush3.bf16.msra.mxu0 %v3390_v19  ;;  %v1437_v19 = vsel %vm661_vm1, %v1434_v49, %v1436_v5  ;;  %v1956_v49 = vrot.slane %v1954_v43, 1  ;;  %v3430_v5 = vld [vmem:[%s4116_s1 + $0x220] sm:$0xff]   ;;  %v2193_v43 = vrot.slane %v3837_v16, 1  ;;  %v2203_v16 = vrot.slane %v3896_v18, 1 }
  0x6a   : > { %3188 = vmatpush3.bf16.msra.mxu1 %v3391_v20  ;;  %3205 = vmatprep.subr.bf16.mxu0 %v3396_v15  ;;  %v3411_v20 = vld [vmem:[%s4116_s1 + $0x1d0] sm:$0xff]   ;;  %v1234_v31 = vsel %vm265_vm0, %v1229_v25, %v1233_v21  ;;  %v1994_v25 = vshll.u32 %v3896_v18, 16 }
  0x6b   : > { %3237 = vmatprep.subr.bf16.mxu1 %v3397_v29 }
  0x6c   : > { %3158 = vmatmul.mubr.bf16.vlgmr.msra.gmra.mxu0 %v1186_v34  ;;  %v1441_v34 = vsel %vm661_vm1, %v1438_v11, %v1440_v22  ;;  %v1986_v11 = vshll.u32 %v3880_v3, 16  ;;  %v2167_v22 = vld [vmem:[%s3516_s10 + $0x10] sm:$0xe] }
  0x6d   : > { %3190 = vmatmul.mubr.bf16.vlgmr.msra.gmra.mxu1 %v1429_v28  ;;  %3206 = vmatpush3.bf16.msra.mxu0 %v3396_v15  ;;  %v1938_v15 = vshll.u32 %v3816_v17, 16  ;;  %v2777_v27 = vcombine.low %v2167_v22, %v3791_v60  ;;  %v2195_v60 = vrot.slane %v3856_v46, 1 }
  0x6e   : > { %3238 = vmatpush3.bf16.msra.mxu1 %v3397_v29  ;;  %3207 = vmatprep.subr.bf16.mxu0 %v3398_v30  ;;  %v3830_v29 = vld [vmem:[%s3516_s10 + $0x20] sm:$0xff]   ;;  %v1988_v21 = vrot.slane %v1986_v11, 1 }
  0x6f   : > { %3239 = vmatprep.subr.bf16.mxu1 %v3399_v38  ;;  %3161 = vmatprep.mubr.bf16.mxu0 %v1194_v41  ;;  %v1940_v33 = vrot.slane %v1938_v15, 1  ;;  %v1946_v28 = vshll.u32 %v3830_v29, 16  ;;  %v1950_v42 = vshrl.u32 %v3830_v29, 16 }
  0x70   : > { %3193 = vmatprep.mubr.bf16.mxu1 %v1431_v44 }
  0x71   : > { %3208 = vmatpush3.bf16.msra.mxu0 %v3398_v30  ;;  %v3415_v30 = vld [vmem:[%s4116_s1 + $0x1c8] sm:$0xff]   ;;  %v1941_v41 = vsel %vm265_vm0, %v1936_v32, %v1940_v33  ;;  %v1944_v35 = vor.u32 %v1942_v37, %v1940_v33  ;;  %v1948_v44 = vrot.slane %v1946_v28, 1  ;;  %v2197_v37 = vrot.slane %v3860_v40, 1 }
  0x72   : > { %3240 = vmatpush3.bf16.msra.mxu1 %v3399_v38  ;;  %3209 = vmatprep.subr.bf16.mxu0 %v3402_v47  ;;  %v3417_v38 = vld [vmem:[%s4116_s1 + $0x1c0] sm:$0xff]   ;;  %v3441_v32 = vld [vmem:[%s4116_s1 + $0x208] sm:$0xff]  }
  0x73   : > { %3241 = vmatprep.subr.bf16.mxu1 %v3403_v48  ;;  %v1949_v50 = vsel %vm265_vm0, %v1944_v35, %v1948_v44  ;;  %v3439_v33 = vld [vmem:[%s3516_s10 + $0x48] sm:$0xff]   ;;  %v2201_v35 = vrot.slane %v3880_v3, 1 }
  0x74   : > { %3162 = vmatmul.mubr.bf16.gmra.mxu0 %v1202_v57 }
  0x75   : > { %3194 = vmatmul.mubr.bf16.gmra.mxu1 %v1433_v59  ;;  %3210 = vmatpush3.bf16.msra.mxu0 %v3402_v47  ;;  %v3421_v47 = vld [vmem:[%s3516_s10 + $0x18] sm:$0xff]   ;;  %v1960_v59 = vor.u32 %v1958_v53, %v1956_v49 }
  0x76   : > { %3242 = vmatpush3.bf16.msra.mxu1 %v3403_v48  ;;  %3211 = vmatprep.subr.bf16.mxu0 %v3404_v52  ;;  %v1952_v48 = vor.u32 %v1950_v42, %v1948_v44  ;;  %v2199_v42 = vrot.slane %v3876_v0, 1 }
  0x77   : > { %3243 = vmatprep.subr.bf16.mxu1 %v3405_v61  ;;  %3165 = vmatprep.mubr.bf16.mxu0 %v1210_v63  ;;  %v3429_v63 = vld [vmem:[%s4116_s1 + $0x228] sm:$0xff]  }
  0x78   : > { %3197 = vmatprep.mubr.bf16.mxu1 %v1435_v1  ;;  %v1957_v57 = vsel %vm265_vm0, %v1952_v48, %v1956_v49  ;;  %v2204_v48 = vsel %vm661_vm1, %v2201_v35, %v2203_v16 }
  0x79   : > { %3212 = vmatpush3.bf16.msra.mxu0 %v3404_v52  ;;  %v3424_v52 = vld [vmem:[%s4116_s1 + $0x230] sm:$0xff]  }
  0x7a   : > { %3244 = vmatpush3.bf16.msra.mxu1 %v3405_v61  ;;  %3213 = vmatprep.subr.bf16.mxu0 %v3408_v6  ;;  %v1964_v61 = vrot.slane %v1962_v54, 1 }
  0x7b   : > { %3245 = vmatprep.subr.bf16.mxu1 %v3409_v7 }
  0x7c   : > { %3166 = vmatmul.mubr.bf16.gmra.mxu0 %v1218_v62  ;;  %v1968_v1 = vor.u32 %v1966_v51, %v1964_v61  ;;  %v1965_v4 = vsel %vm265_vm0, %v1960_v59, %v1964_v61 }
  0x7d   : > { %3198 = vmatmul.mubr.bf16.gmra.mxu1 %v1437_v19  ;;  %3214 = vmatpush3.bf16.msra.mxu0 %v3408_v6  ;;  %v1974_v6 = vshrl.u32 %v3860_v40, 16  ;;  %v3433_v19 = vld [vmem:[%s3516_s10 + $0x38] sm:$0xff]  }
  0x7e   : > { %3246 = vmatpush3.bf16.msra.mxu1 %v3409_v7  ;;  %3215 = vmatprep.subr.bf16.mxu0 %v3410_v12  ;;  %v1978_v7 = vshll.u32 %v3876_v0, 16  ;;  %v1973_v9 = vsel %vm265_vm0, %v1968_v1, %v1972_v2 }
  0x7f   : > { %3247 = vmatprep.subr.bf16.mxu1 %v3411_v20  ;;  %3169 = vmatprep.mubr.bf16.mxu0 %v1226_v13  ;;  %v1976_v62 = vor.u32 %v1974_v6, %v1972_v2 }
  0x80   : > { %3201 = vmatprep.mubr.bf16.mxu1 %v1439_v23  ;;  %v3436_v23 = vld [vmem:[%s4116_s1 + $0x210] sm:$0xff]  }
  0x81   : > { %3216 = vmatpush3.bf16.msra.mxu0 %v3410_v12  ;;  %v1980_v12 = vrot.slane %v1978_v7, 1 }
  0x82   : > { %3248 = vmatpush3.bf16.msra.mxu1 %v3411_v20  ;;  %3217 = vmatprep.subr.bf16.mxu0 %v3414_v24 }
  0x83   : > { %3249 = vmatprep.subr.bf16.mxu1 %v3415_v30  ;;  %v1984_v20 = vor.u32 %v1982_v10, %v1980_v12  ;;  %v1981_v13 = vsel %vm265_vm0, %v1976_v62, %v1980_v12 }
  0x84   : > { %3170 = vmatmul.mubr.bf16.gmra.mxu0 %v1234_v31  ;;  %v1996_v31 = vrot.slane %v1994_v25, 1 }
  0x85   : > { %3202 = vmatmul.mubr.bf16.gmra.mxu1 %v1441_v34  ;;  %3218 = vmatpush3.bf16.msra.mxu0 %v3414_v24  ;;  %v1990_v24 = vshrl.u32 %v3880_v3, 16  ;;  %v1989_v15 = vsel %vm265_vm0, %v1984_v20, %v1988_v21  ;;  %v2188_v34 = vrot.slane %v2777_v27, 1 }
  0x86   : > { %3250 = vmatpush3.bf16.msra.mxu1 %v3415_v30  ;;  %3219 = vmatprep.subr.bf16.mxu0 %v3416_v36 }
  0x87   : > { %3251 = vmatprep.subr.bf16.mxu1 %v3417_v38  ;;  %3221 = vmatprep.mubr.bf16.mxu0 %v3418_v39  ;;  %v1992_v30 = vor.u32 %v1990_v24, %v1988_v21 }
  0x88   : > { %3253 = vmatprep.mubr.bf16.mxu1 %v1941_v41  ;;  %v2191_v41 = vrot.slane %v3830_v29, 1  ;;  %v2202_v29 = vsel %vm661_vm1, %v2199_v42, %v2201_v35 }
  0x89   : > { %3220 = vmatpush3.bf16.msra.mxu0 %v3416_v36  ;;  %v2189_v36 = vrot.slane %v3816_v17, 1  ;;  %v1997_v28 = vsel %vm265_vm0, %v1992_v30, %v1996_v31  ;;  %v2198_v17 = vsel %vm661_vm1, %v2195_v60, %v2197_v37 }
  0x8a   : > { %3252 = vmatpush3.bf16.msra.mxu1 %v3417_v38  ;;  %3269 = vmatprep.subr.bf16.mxu0 %v3423_v45  ;;  %v3442_v38 = vld [vmem:[%s4116_s1 + $0x200] sm:$0xff]   ;;  %v2194_v46 = vsel %vm661_vm1, %v2191_v41, %v2193_v43 }
  0x8b   : > { %3301 = vmatprep.subr.bf16.mxu1 %v3423_v45  ;;  %v2190_v39 = vsel %vm661_vm1, %v2188_v34, %v2189_v36  ;;  %v2192_v44 = vsel %vm661_vm1, %v2189_v36, %v2191_v41 }
  0x8c   : > { %3222 = vmatmul.mubr.bf16.vlgmr.msra.gmra.mxu0 %v3421_v47  ;;  %v2196_v47 = vsel %vm661_vm1, %v2193_v43, %v2195_v60 }
  0x8d   : > { %3254 = vmatmul.mubr.bf16.vlgmr.msra.gmra.mxu1 %v1949_v50  ;;  %3270 = vmatpush3.bf16.msra.mxu0 %v3423_v45 }
  0x8e   : > { %3309 = vmatpush3.bf16.msra.mxu1 %v3423_v45  ;;  %3271 = vmatprep.subr.bf16.mxu0 %v3424_v52  ;;  %v2200_v45 = vsel %vm661_vm1, %v2197_v37, %v2199_v42 }
  0x8f   : > { %3302 = vmatprep.subr.bf16.mxu1 %v3424_v52  ;;  %3225 = vmatprep.mubr.bf16.mxu0 %v3425_v55 }
  0x90   : > { %3257 = vmatprep.mubr.bf16.mxu1 %v1957_v57 }
  0x91   : > { %3272 = vmatpush3.bf16.msra.mxu0 %v3424_v52 }
  0x92   : > { %3310 = vmatpush3.bf16.msra.mxu1 %v3424_v52  ;;  %3273 = vmatprep.subr.bf16.mxu0 %v3429_v63 }
  0x93   : > { %3303 = vmatprep.subr.bf16.mxu1 %v3429_v63 }
  0x94   : > { %3226 = vmatmul.mubr.bf16.gmra.mxu0 %v3427_v56 }
  0x95   : > { %3258 = vmatmul.mubr.bf16.gmra.mxu1 %v1965_v4  ;;  %3274 = vmatpush3.bf16.msra.mxu0 %v3429_v63 }
  0x96   : > { %3311 = vmatpush3.bf16.msra.mxu1 %v3429_v63  ;;  %3275 = vmatprep.subr.bf16.mxu0 %v3430_v5 }
  0x97   : > { %3304 = vmatprep.subr.bf16.mxu1 %v3430_v5  ;;  %3229 = vmatprep.mubr.bf16.mxu0 %v3431_v8 }
  0x98   : > { %3261 = vmatprep.mubr.bf16.mxu1 %v1973_v9 }
  0x99   : > { %3276 = vmatpush3.bf16.msra.mxu0 %v3430_v5 }
  0x9a   : > { %3312 = vmatpush3.bf16.msra.mxu1 %v3430_v5  ;;  %3277 = vmatprep.subr.bf16.mxu0 %v3435_v14 }
  0x9b   : > { %3305 = vmatprep.subr.bf16.mxu1 %v3435_v14 }
  0x9c   : > { %3230 = vmatmul.mubr.bf16.gmra.mxu0 %v3433_v19 }
  0x9d   : > { %3262 = vmatmul.mubr.bf16.gmra.mxu1 %v1981_v13  ;;  %3278 = vmatpush3.bf16.msra.mxu0 %v3435_v14 }
  0x9e   : > { %3313 = vmatpush3.bf16.msra.mxu1 %v3435_v14  ;;  %3279 = vmatprep.subr.bf16.mxu0 %v3436_v23 }
  0x9f   : > { %3306 = vmatprep.subr.bf16.mxu1 %v3436_v23  ;;  %3233 = vmatprep.mubr.bf16.mxu0 %v3437_v26 }
  0xa0   : > { %3265 = vmatprep.mubr.bf16.mxu1 %v1989_v15 }
  0xa1   : > { %3280 = vmatpush3.bf16.msra.mxu0 %v3436_v23 }
  0xa2   : > { %3314 = vmatpush3.bf16.msra.mxu1 %v3436_v23  ;;  %3281 = vmatprep.subr.bf16.mxu0 %v3441_v32 }
  0xa3   : > { %3307 = vmatprep.subr.bf16.mxu1 %v3441_v32 }
  0xa4   : > { %3234 = vmatmul.mubr.bf16.gmra.mxu0 %v3439_v33 }
  0xa5   : > { %3266 = vmatmul.mubr.bf16.gmra.mxu1 %v1997_v28  ;;  %3282 = vmatpush3.bf16.msra.mxu0 %v3441_v32 }
  0xa6   : > { %3315 = vmatpush3.bf16.msra.mxu1 %v3441_v32  ;;  %3283 = vmatprep.subr.bf16.mxu0 %v3442_v38 }
  0xa7   : > { %3308 = vmatprep.subr.bf16.mxu1 %v3442_v38  ;;  %3285 = vmatprep.mubr.bf16.mxu0 %v2190_v39 }
  0xa8   : > { %3293 = vmatprep.mubr.bf16.mxu1 %v2198_v17 }
  0xa9   : > { %3284 = vmatpush3.bf16.msra.mxu0 %v3442_v38 }
  0xaa   : > { %3316 = vmatpush3.bf16.msra.mxu1 %v3442_v38 }
  0xac   : > { %3286 = vmatmul.mubr.bf16.vlgmr.msra.gmra.mxu0 %v2192_v44 }
  0xad   : > { %3294 = vmatmul.mubr.bf16.vlgmr.msra.gmra.mxu1 %v2200_v45  ;;  %3289 = vmatprep.mubr.bf16.mxu0 %v2194_v46 }
  0xae   : > { %3297 = vmatprep.mubr.bf16.mxu1 %v2202_v29 }
  0xb4   : > { %3290 = vmatmul.mubr.bf16.gmra.mxu0 %v2196_v47 }
  0xb5   : > { %3298 = vmatmul.mubr.bf16.gmra.mxu1 %v2204_v48 }
  0xec   : > { %v3031_v49 = vpop.f32.mrf.mxu0 }
  0xed   : > { %v3063_v40 = vpop.f32.mrf.mxu1 }
  0xee   : > { %v586_v50 = vadd.f32 %v3063_v40, %v3031_v49  ;;  %v424_v52 = vpop.f32.mrf.mxu0 }
  0xef   : > { %v577_v53 = vpop.f32.mrf.mxu1 }
  0xf0   : > { %v578_v54 = vadd.f32 %v577_v53, %v424_v52  ;;  %v3032_v55 = vpop.f32.mrf.mxu0 }
  0xf1   : > { %v3064_v57 = vpop.f32.mrf.mxu1 }
  0xf2   : > { %v589_v51 = vadd.f32 %v3064_v57, %v3032_v55  ;;  %v427_v58 = vpop.f32.mrf.mxu0 }
  0xf3   : > { %v580_v59 = vpop.f32.mrf.mxu1 }
  0xf4   : > { %v581_v61 = vadd.f32 %v580_v59, %v427_v58  ;;  %v3035_v63 = vpop.f32.mrf.mxu0 }
  0xf5   : > { %v3067_v0 = vpop.f32.mrf.mxu1 }
  0xf6   : > { %v602_v56 = vadd.f32 %v3067_v0, %v3035_v63  ;;  %v440_v1 = vpop.f32.mrf.mxu0 }
  0xf7   : > { %v593_v2 = vpop.f32.mrf.mxu1 }
  0xf8   : > { %v594_v3 = vadd.f32 %v593_v2, %v440_v1  ;;  %v3036_v4 = vpop.f32.mrf.mxu0 }
  0xf9   : > { %v3068_v5 = vpop.f32.mrf.mxu1 }
  0xfa   : > { %v605_v6 = vadd.f32 %v3068_v5, %v3036_v4  ;;  %v443_v7 = vpop.f32.mrf.mxu0 }
  0xfb   : > { %v596_v8 = vpop.f32.mrf.mxu1 }
  0xfc   : > { %v597_v9 = vadd.f32 %v596_v8, %v443_v7  ;;  %v3039_v10 = vpop.f32.mrf.mxu0 }
  0xfd   : > { %v3071_v11 = vpop.f32.mrf.mxu1 }
  0xfe   : > { %v618_v62 = vadd.f32 %v3071_v11, %v3039_v10  ;;  %v456_v12 = vpop.f32.mrf.mxu0 }
  0xff   : > { %v609_v14 = vpop.f32.mrf.mxu1 }
 0x100   : > { %v610_v18 = vadd.f32 %v609_v14, %v456_v12  ;;  %v3040_v19 = vpop.f32.mrf.mxu0 }
 0x101   : > { %v3072_v20 = vpop.f32.mrf.mxu1 }
 0x102   : > { %v621_v21 = vadd.f32 %v3072_v20, %v3040_v19  ;;  %v459_v22 = vpop.f32.mrf.mxu0 }
 0x103   : > { %v612_v13 = vpop.f32.mrf.mxu1 }
 0x104   : > { %v613_v23 = vadd.f32 %v612_v13, %v459_v22  ;;  %v3043_v24 = vpop.f32.mrf.mxu0 }
 0x105   : > { %v3075_v25 = vpop.f32.mrf.mxu1 }
 0x106   : > { %v634_v26 = vadd.f32 %v3075_v25, %v3043_v24  ;;  %v472_v27 = vpop.f32.mrf.mxu0 }
 0x107   : > { %v625_v15 = vpop.f32.mrf.mxu1 }
 0x108   : > { %v626_v30 = vadd.f32 %v625_v15, %v472_v27  ;;  %v3044_v31 = vpop.f32.mrf.mxu0 }
 0x109   : > { %v3076_v32 = vpop.f32.mrf.mxu1 }
 0x10a   : > { %v637_v33 = vadd.f32 %v3076_v32, %v3044_v31  ;;  %v475_v34 = vpop.f32.mrf.mxu0 }
 0x10b   : > { %v628_v36 = vpop.f32.mrf.mxu1 }
 0x10c   : > { %v629_v60 = vadd.f32 %v628_v36, %v475_v34  ;;  %v3095_v37 = vpop.f32.mrf.mxu0 }
 0x10d   : > { %v834_v28 = vadd.f32 %v3095_v37, %v586_v50  ;;  %v3127_v38 = vpop.f32.mrf.mxu1 }
 0x10e   : > { %v769_v39 = vpop.f32.mrf.mxu0 }
 0x10f   : > { %v3933_v17 = vadd.f32 %v3127_v38, %v834_v28  ;;  %v832_v41 = vadd.f32 %v769_v39, %v578_v54  ;;  %v1011_v42 = vpop.f32.mrf.mxu1 }
 0x110   : > { %v3096_v43 = vpop.f32.mrf.mxu0 }
 0x111   : > { %v3935_v35 = vadd.f32 %v1011_v42, %v832_v41  ;;  %v835_v44 = vadd.f32 %v3096_v43, %v589_v51  ;;  %v3128_v45 = vpop.f32.mrf.mxu1 }
 0x112   : > { %v772_v46 = vpop.f32.mrf.mxu0 }
 0x113   : > { %v3937_v29 = vadd.f32 %v3128_v45, %v835_v44  ;;  %v833_v16 = vadd.f32 %v772_v46, %v581_v61  ;;  %v1014_v47 = vpop.f32.mrf.mxu1 }
 0x114   : > { %v3099_v48 = vpop.f32.mrf.mxu0 }
 0x115   : > { %v3939_v49 = vadd.f32 %v1014_v47, %v833_v16  ;;  %v838_v40 = vadd.f32 %v3099_v48, %v602_v56  ;;  %v3131_v50 = vpop.f32.mrf.mxu1 }
 0x116   : > { %v785_v52 = vpop.f32.mrf.mxu0 }
 0x117   : > { %v3941_v53 = vadd.f32 %v3131_v50, %v838_v40  ;;  %v836_v54 = vadd.f32 %v785_v52, %v594_v3  ;;  %v1027_v55 = vpop.f32.mrf.mxu1 }
 0x118   : > { %v3100_v57 = vpop.f32.mrf.mxu0 }
 0x119   : > { %v3943_v58 = vadd.f32 %v1027_v55, %v836_v54  ;;  %v839_v51 = vadd.f32 %v3100_v57, %v605_v6  ;;  %v3132_v59 = vpop.f32.mrf.mxu1 }
 0x11a   : > { %v788_v63 = vpop.f32.mrf.mxu0 }
 0x11b   : > { %v3945_v0 = vadd.f32 %v3132_v59, %v839_v51  ;;  %v837_v61 = vadd.f32 %v788_v63, %v597_v9  ;;  %v1030_v1 = vpop.f32.mrf.mxu1 }
 0x11c   : > { %v3103_v2 = vpop.f32.mrf.mxu0 }
 0x11d   : > { %v3947_v4 = vadd.f32 %v1030_v1, %v837_v61  ;;  %v842_v56 = vadd.f32 %v3103_v2, %v618_v62  ;;  %v3135_v5 = vpop.f32.mrf.mxu1 }
 0x11e   : > { %v801_v7 = vpop.f32.mrf.mxu0 }
 0x11f   : > { %v3949_v8 = vadd.f32 %v3135_v5, %v842_v56  ;;  %v840_v3 = vadd.f32 %v801_v7, %v610_v18  ;;  %v1043_v10 = vpop.f32.mrf.mxu1 }
 0x120   : > { %v3104_v11 = vpop.f32.mrf.mxu0 }
 0x121   : > { %v3951_v12 = vadd.f32 %v1043_v10, %v840_v3  ;;  %v843_v6 = vadd.f32 %v3104_v11, %v621_v21  ;;  %v3136_v14 = vpop.f32.mrf.mxu1 }
 0x122   : > { %v804_v19 = vpop.f32.mrf.mxu0 }
 0x123   : > { %v3953_v20 = vadd.f32 %v3136_v14, %v843_v6  ;;  %v841_v9 = vadd.f32 %v804_v19, %v613_v23  ;;  %v1046_v22 = vpop.f32.mrf.mxu1 }
 0x124   : > { %v3107_v13 = vpop.f32.mrf.mxu0 }
 0x125   : > { %v3955_v24 = vadd.f32 %v1046_v22, %v841_v9  ;;  %v846_v62 = vadd.f32 %v3107_v13, %v634_v26  ;;  %v3139_v25 = vpop.f32.mrf.mxu1 }
 0x126   : > { %v817_v27 = vpop.f32.mrf.mxu0 }
 0x127   : > { %v3957_v15 = vadd.f32 %v3139_v25, %v846_v62  ;;  %v844_v18 = vadd.f32 %v817_v27, %v626_v30  ;;  %v1059_v31 = vpop.f32.mrf.mxu1 }
 0x128   : > { %v3108_v32 = vpop.f32.mrf.mxu0 }
 0x129   : > { %v3959_v34 = vadd.f32 %v1059_v31, %v844_v18  ;;  %v847_v21 = vadd.f32 %v3108_v32, %v637_v33  ;;  %v3140_v36 = vpop.f32.mrf.mxu1 }
 0x12a   : > { %v820_v37 = vpop.f32.mrf.mxu0 }
 0x12b   : > { %v3961_v28 = vadd.f32 %v3140_v36, %v847_v21  ;;  %v845_v23 = vadd.f32 %v820_v37, %v629_v60  ;;  %v1062_v38 = vpop.f32.mrf.mxu1 }
 0x12c   : > { %v3159_v39 = vpop.f32.mrf.mxu0 }
 0x12d   : > { %v3963_v41 = vadd.f32 %v1062_v38, %v845_v23  ;;  %v3965_v26 = vpop.f32.mrf.mxu1 }
 0x12e   : > { %v1325_v42 = vpop.f32.mrf.mxu0 }
 0x12f   : > { %v3967_v43 = vpop.f32.mrf.mxu1 }
 0x130   : > { %v3160_v30 = vpop.f32.mrf.mxu0 }
 0x131   : > { %v3969_v44 = vpop.f32.mrf.mxu1 }
 0x132   : > { %v1328_v45 = vpop.f32.mrf.mxu0 }
 0x133   : > { %v3971_v46 = vpop.f32.mrf.mxu1 }
 0x134   : > { %v3163_v33 = vpop.f32.mrf.mxu0 }
 0x135   : > { %v3973_v16 = vpop.f32.mrf.mxu1 }
 0x136   : > { %v1341_v47 = vpop.f32.mrf.mxu0 }
 0x137   : > { %v1548_v60 = vpop.f32.mrf.mxu1 }
 0x138   : > { %v3164_v48 = vpop.f32.mrf.mxu0 }
 0x139   : > { %v3975_v40 = vpop.f32.mrf.mxu1 }
 0x13a   : > { %v1344_v50 = vpop.f32.mrf.mxu0 }
 0x13b   : > { %v3977_v52 = vpop.f32.mrf.mxu1 }
 0x13c   : > { %v3167_v54 = vpop.f32.mrf.mxu0 }
 0x13d   : > { %v3199_v55 = vpop.f32.mrf.mxu1 }
 0x13e   : > { %v1357_v57 = vpop.f32.mrf.mxu0 }
 0x13f   : > { %v1564_v51 = vpop.f32.mrf.mxu1 }
 0x140   : > { %v3168_v59 = vpop.f32.mrf.mxu0 }
 0x141   : > { %v3979_v63 = vpop.f32.mrf.mxu1 }
 0x142   : > { %v1360_v61 = vpop.f32.mrf.mxu0 }
 0x143   : > { %v3981_v1 = vpop.f32.mrf.mxu1 }
 0x144   : > { %4119 = vst [vmem:[#allocation2_spill] sm:$0xff] %v3981_v1  ;;  %v3171_v2 = vpop.f32.mrf.mxu0 }
 0x145   : > { %v3983_v56 = vpop.f32.mrf.mxu1 }
 0x146   : > { %4120 = vst [vmem:[#allocation3_spill] sm:$0xff] %v3983_v56  ;;  %v1373_v5 = vpop.f32.mrf.mxu0  ;;  %v1396_v56 = vadd.f32 %v1357_v57, %v3951_v12  ;;  %v1395_v12 = vadd.f32 %v3164_v48, %v3945_v0 }
 0x147   : > { %v3985_v7 = vpop.f32.mrf.mxu1 }
 0x148   : > { %4121 = vst [vmem:[#allocation4_spill] sm:$0xff] %v3985_v7  ;;  %v3172_v3 = vpop.f32.mrf.mxu0 }
 0x149   : > { %v3987_v10 = vpop.f32.mrf.mxu1 }
 0x14a   : > { %4122 = vst [vmem:[#allocation5_spill] sm:$0xff] %v3987_v10  ;;  %v1376_v11 = vpop.f32.mrf.mxu0 }
 0x14b   : > { %v3989_v6 = vpop.f32.mrf.mxu1 }
 0x14c   : > { %4123 = vst [vmem:[#allocation6_spill] sm:$0xff] %v3989_v6  ;;  %v3223_v14 = vpop.f32.mrf.mxu0 }
 0x14d   : > { %v3991_v19 = vpop.f32.mrf.mxu1 }
 0x14e   : > { %4124 = vst [vmem:[#allocation7_spill] sm:$0xff] %v3991_v19  ;;  %v1774_v9 = vpop.f32.mrf.mxu0 }
 0x14f   : > { %v3993_v22 = vpop.f32.mrf.mxu1 }
 0x150   : > { %4125 = vst [vmem:[#allocation8_spill] sm:$0xff] %v3993_v22  ;;  %v3224_v13 = vpop.f32.mrf.mxu0 }
 0x151   : > { %v3995_v62 = vpop.f32.mrf.mxu1 }
 0x152   : > { %4126 = vst [vmem:[#allocation9_spill] sm:$0xff] %v3995_v62  ;;  %v1777_v25 = vpop.f32.mrf.mxu0 }
 0x153   : > { %v3997_v27 = vpop.f32.mrf.mxu1 }
 0x154   : > { %4127 = vst [vmem:[#allocation10_spill] sm:$0xff] %v3997_v27  ;;  %v3227_v18 = vpop.f32.mrf.mxu0 }
 0x155   : > { %v3999_v31 = vpop.f32.mrf.mxu1 }
 0x156   : > { %4128 = vst [vmem:[#allocation11_spill] sm:$0xff] %v3999_v31  ;;  %v4001_v32 = vpop.f32.mrf.mxu0 }
 0x157   : > { %4129 = vst [vmem:[#allocation12_spill] sm:$0xff] %v4001_v32  ;;  %v4003_v21 = vpop.f32.mrf.mxu1  ;;  %v1390_v32 = vadd.f32 %v3159_v39, %v3933_v17 }
 0x158   : > { %4130 = vst [vmem:[#allocation13_spill] sm:$0xff] %v4003_v21  ;;  %v4005_v36 = vpop.f32.mrf.mxu0  ;;  %v1388_v21 = vadd.f32 %v1325_v42, %v3935_v35 }
 0x159   : > { %4131 = vst [vmem:[#allocation14_spill] sm:$0xff] %v4005_v36  ;;  %v4007_v37 = vpop.f32.mrf.mxu1  ;;  %v1391_v36 = vadd.f32 %v3160_v30, %v3937_v29  ;;  %v1597_v17 = vadd.f32 %v3965_v26, %v1390_v32  ;;  %v1393_v30 = vadd.f32 %v1344_v50, %v3947_v4 }
 0x15a   : > { %4132 = vst [vmem:[#allocation15_spill] sm:$0xff] %v4007_v37  ;;  %v4009_v23 = vpop.f32.mrf.mxu0  ;;  %v1389_v37 = vadd.f32 %v1328_v45, %v3939_v49  ;;  %v1595_v35 = vadd.f32 %v3967_v43, %v1388_v21  ;;  %v1399_v49 = vadd.f32 %v3168_v59, %v3953_v20  ;;  %v1603_v45 = vadd.f32 %v1564_v51, %v1396_v56 }
 0x15b   : > { %4133 = vst [vmem:[#allocation16_spill] sm:$0xff] %v4009_v23  ;;  %v4011_v38 = vpop.f32.mrf.mxu1  ;;  %v1394_v23 = vadd.f32 %v3163_v33, %v3941_v53  ;;  %v1598_v29 = vadd.f32 %v3969_v44, %v1391_v36  ;;  %v1397_v43 = vadd.f32 %v1360_v61, %v3955_v24  ;;  %v1402_v20 = vadd.f32 %v3171_v2, %v3957_v15  ;;  %v4145_v21 = vld [vmem:[#allocation10_spill] sm:$0xff] }
 0x15c   : > { %4134 = vst [vmem:[#allocation17_spill] sm:$0xff] %v4011_v38  ;;  %v3231_v22 = vpop.f32.mrf.mxu0  ;;  %v1392_v38 = vadd.f32 %v1341_v47, %v3943_v58  ;;  %v1596_v58 = vadd.f32 %v3971_v46, %v1389_v37  ;;  %v1400_v33 = vadd.f32 %v1373_v5, %v3959_v34  ;;  %v1403_v46 = vadd.f32 %v3172_v3, %v3961_v28  ;;  %v4137_v28 = vld [vmem:[#allocation2_spill] sm:$0xff]  ;;  %v4140_v3 = vld [vmem:[#allocation5_spill] sm:$0xff] }
 0x15d   : > { %v3263_v62 = vpop.f32.mrf.mxu1  ;;  %v1601_v39 = vadd.f32 %v3973_v16, %v1394_v23  ;;  %v1839_v47 = vadd.f32 %v3223_v14, %v1597_v17  ;;  %v1606_v0 = vadd.f32 %v3979_v63, %v1399_v49  ;;  %v1837_v48 = vadd.f32 %v1774_v9, %v1595_v35  ;;  %v4138_v63 = vld [vmem:[#allocation3_spill] sm:$0xff]  ;;  %v4142_v9 = vld [vmem:[#allocation6_spill] sm:$0xff] }
 0x15e   : > { %v1806_v6 = vpop.f32.mrf.mxu0  ;;  %v1840_v24 = vadd.f32 %v3224_v13, %v1598_v29  ;;  %v1600_v34 = vadd.f32 %v3977_v52, %v1393_v30  ;;  %v1604_v51 = vadd.f32 %v4137_v28, %v1397_v43  ;;  %v1609_v56 = vadd.f32 %v4138_v63, %v1402_v20  ;;  %v4141_v14 = vld [vmem:[#allocation7_spill] sm:$0xff]  ;;  %v4143_v13 = vld [vmem:[#allocation8_spill] sm:$0xff] }
 0x15f   : > { %v4013_v19 = vpop.f32.mrf.mxu1  ;;  %v1843_v57 = vadd.f32 %v3227_v18, %v1601_v39  ;;  %v1845_v59 = vadd.f32 %v1806_v6, %v1603_v45  ;;  %v4144_v6 = vld [vmem:[#allocation9_spill] sm:$0xff]  ;;  %v4146_v37 = vld [vmem:[#allocation11_spill] sm:$0xff]  ;;  %v4147_v35 = vld [vmem:[#allocation12_spill] sm:$0xff] }
 0x160   : > { %4135 = vst [vmem:[#allocation18_spill] sm:$0xff] %v4013_v19  ;;  %v3232_v27 = vpop.f32.mrf.mxu0  ;;  %v1398_v19 = vadd.f32 %v3167_v54, %v3949_v8  ;;  %v1599_v8 = vadd.f32 %v1548_v60, %v1392_v38  ;;  %v1401_v60 = vadd.f32 %v1376_v11, %v3963_v41  ;;  %v1602_v54 = vadd.f32 %v3975_v40, %v1395_v12  ;;  %v4139_v41 = vld [vmem:[#allocation4_spill] sm:$0xff] }
 0x161   : > { %v4015_v10 = vpop.f32.mrf.mxu1  ;;  %v1848_v61 = vadd.f32 %v3232_v27, %v1606_v0  ;;  %v1607_v5 = vadd.f32 %v4139_v41, %v1400_v33  ;;  %v1610_v11 = vadd.f32 %v4140_v3, %v1403_v46  ;;  %v2153_v40 = vadd.f32 %v4141_v14, %v1839_v47  ;;  %v4152_v14 = vld [vmem:[#allocation13_spill] sm:$0xff] }
 0x162   : > { %4136 = vst [vmem:[#allocation19_spill] sm:$0xff] %v4015_v10  ;;  %v1809_v31 = vpop.f32.mrf.mxu0  ;;  %v1605_v26 = vadd.f32 %v3199_v55, %v1398_v19  ;;  %v1838_v55 = vadd.f32 %v1777_v25, %v1596_v58  ;;  %v2151_v25 = vadd.f32 %v4143_v13, %v1837_v48  ;;  %v2154_v27 = vadd.f32 %v4144_v6, %v1840_v24  ;;  %v4151_v47 = vld [vmem:[#allocation16_spill] sm:$0xff] }
 0x163   : > { %v4023_v7 = vpop.f32.mrf.mxu1  ;;  %v1846_v52 = vadd.f32 %v1809_v31, %v1604_v51  ;;  %v2157_v23 = vadd.f32 %v4146_v37, %v1843_v57  ;;  %v1841_v29 = vadd.f32 %v4147_v35, %v1599_v8  ;;  %v1842_v8 = vadd.f32 %v4151_v47, %v1600_v34  ;;  %v4154_v6 = vld [vmem:[#allocation17_spill] sm:$0xff] }
 0x164   : > { %v3235_v10 = vpop.f32.mrf.mxu0  ;;  %v1847_v4 = vadd.f32 %v3231_v22, %v1605_v26  ;;  %v1608_v22 = vadd.f32 %v4142_v9, %v1401_v60  ;;  %v2152_v36 = vadd.f32 %v4145_v21, %v1838_v55  ;;  %v4150_v26 = vld [vmem:[#allocation14_spill] sm:$0xff] }
 0x165   : > { %v4027_v1 = vpop.f32.mrf.mxu1  ;;  %v1844_v45 = vadd.f32 %v4150_v26, %v1602_v54  ;;  %v1851_v43 = vadd.f32 %v3235_v10, %v1609_v56  ;;  %v2160_v0 = vadd.f32 %v4023_v7, %v1846_v52 }
 0x166   : > { %v4033_v53 = vpop.f32.mrf.mxu0  ;;  %v2161_v18 = vadd.f32 %v3263_v62, %v1847_v4  ;;  %v4069_v62 = vld [vmem:[%s4117_s2] ss:$0 sm:$0xff] }
 0x167   : > { %v4038_v42 = vpop.f32.mrf.mxu1  ;;  %v4148_v49 = vld [vmem:[#allocation18_spill] sm:$0xff]  ;;  %v1849_v24 = vadd.f32 %v4033_v53, %v1607_v5  ;;  %v2165_v53 = vadd.f32 %v4027_v1, %v1851_v43 }
 0x168   : > { %v3236_v44 = vpop.f32.mrf.mxu0  ;;  %v2159_v58 = vadd.f32 %v4148_v49, %v1845_v59 }
 0x169   : > { %v4045_v16 = vpop.f32.mrf.mxu1  ;;  %v4149_v39 = vld [vmem:[#allocation19_spill] sm:$0xff]  ;;  %v1852_v10 = vadd.f32 %v3236_v44, %v1610_v11 }
 0x16a   : > { %v1825_v50 = vpop.f32.mrf.mxu0  ;;  %v2162_v12 = vadd.f32 %v4149_v39, %v1848_v61 }
 0x16b   : > { %v4050_v15 = vpop.f32.mrf.mxu1  ;;  %v1850_v56 = vadd.f32 %v1825_v50, %v1608_v22  ;;  %v2166_v50 = vadd.f32 %v4045_v16, %v1852_v10 }
 0x16c   : > { %v3287_v2 = vpop.f32.mrf.mxu0 }
 0x16d   : > { %v3295_v19 = vpop.f32.mrf.mxu1  ;;  %v2360_v38 = vadd.f32 %v3287_v2, %v2153_v40  ;;  %v2155_v40 = vadd.f32 %v4152_v14, %v1841_v29 }
 0x16e   : > { %v2295_v32 = vpop.f32.mrf.mxu0  ;;  %v2368_v31 = vadd.f32 %v3295_v19, %v2161_v18  ;;  %v4153_v19 = vld [vmem:[#allocation15_spill] sm:$0xff]  ;;  %v2163_v18 = vadd.f32 %v4038_v42, %v1849_v24 }
 0x16f   : > { %v2327_v17 = vpop.f32.mrf.mxu1  ;;  %v2358_v20 = vadd.f32 %v2295_v32, %v2151_v25  ;;  %v2383_v55 = vadd.f32 %v4069_v62, %v2360_v38  ;;  %v2158_v9 = vadd.f32 %v4153_v19, %v1844_v45  ;;  %v2164_v38 = vadd.f32 %v4050_v15, %v1850_v56 }
 0x170   : > { %v3288_v30 = vpop.f32.mrf.mxu0  ;;  %v2366_v60 = vadd.f32 %v2327_v17, %v2159_v58  ;;  %v2391_v51 = vadd.f32 %v4069_v62, %v2368_v31 }
 0x171   : > { %v2361_v33 = vadd.f32 %v3288_v30, %v2154_v27  ;;  %v3296_v46 = vpop.f32.mrf.mxu1  ;;  %v2381_v61 = vadd.f32 %v4069_v62, %v2358_v20  ;;  %v2156_v27 = vadd.f32 %v4154_v6, %v1842_v8 }
 0x172   : > { %v2369_v48 = vadd.f32 %v3296_v46, %v2162_v12  ;;  %v2298_v4 = vpop.f32.mrf.mxu0  ;;  %v2389_v41 = vadd.f32 %v4069_v62, %v2366_v60 }
 0x173   : > { %v2384_v57 = vadd.f32 %v4069_v62, %v2361_v33  ;;  %v2359_v28 = vadd.f32 %v2298_v4, %v2152_v36  ;;  %v2330_v54 = vpop.f32.mrf.mxu1 }
 0x174   : > { %v2392_v7 = vadd.f32 %v4069_v62, %v2369_v48  ;;  %v2367_v34 = vadd.f32 %v2330_v54, %v2160_v0  ;;  %v3291_v59 = vpop.f32.mrf.mxu0 }
 0x175   : > { %v2830_v2 = vpack.c.bf16 %v2384_v57, %v2383_v55  ;;  %v2382_v44 = vadd.f32 %v4069_v62, %v2359_v28  ;;  %v3299_v63 = vpop.f32.mrf.mxu1  ;;  %v2364_v13 = vadd.f32 %v3291_v59, %v2157_v23 }
 0x176   : > { %v2850_v5 = vpack.c.bf16 %v2392_v7, %v2391_v51  ;;  %v2390_v3 = vadd.f32 %v4069_v62, %v2367_v34  ;;  %v2311_v11 = vpop.f32.mrf.mxu0  ;;  %v2372_v52 = vadd.f32 %v3299_v63, %v2165_v53 }
 0x177   : > { %2862 = vst [vmem:[%s4082_s20 + $0x8] sm:$0xff] %v2830_v2   ;;  %v2825_v1 = vpack.c.bf16 %v2382_v44, %v2381_v61  ;;  %v2343_v25 = vpop.f32.mrf.mxu1  ;;  %v2362_v21 = vadd.f32 %v2311_v11, %v2155_v40  ;;  %v2387_v42 = vadd.f32 %v4069_v62, %v2364_v13 }
 0x178   : > { %2866 = vst [vmem:[%s4082_s20 + $0x28] sm:$0xff] %v2850_v5   ;;  %v2845_v22 = vpack.c.bf16 %v2390_v3, %v2389_v41  ;;  %v3292_v32 = vpop.f32.mrf.mxu0  ;;  %v2370_v17 = vadd.f32 %v2343_v25, %v2163_v18  ;;  %v2395_v58 = vadd.f32 %v4069_v62, %v2372_v52 }
 0x179   : > { %2826 = vst [vmem:[%s4082_s20] sm:$0xff] %v2825_v1   ;;  %v2365_v36 = vadd.f32 %v3292_v32, %v2158_v9  ;;  %v3300_v37 = vpop.f32.mrf.mxu1  ;;  %v2385_v15 = vadd.f32 %v4069_v62, %v2362_v21 }
 0x17a   : > { %2865 = vst [vmem:[%s4082_s20 + $0x20] sm:$0xff] %v2845_v22   ;;  %v2373_v23 = vadd.f32 %v3300_v37, %v2166_v50  ;;  %v2314_v35 = vpop.f32.mrf.mxu0  ;;  %v2393_v26 = vadd.f32 %v4069_v62, %v2370_v17 }
 0x17b   : > { %v2388_v16 = vadd.f32 %v4069_v62, %v2365_v36  ;;  %v2363_v29 = vadd.f32 %v2314_v35, %v2156_v27  ;;  %v2346_v49 = vpop.f32.mrf.mxu1 }
 0x17c   : > { %v2396_v39 = vadd.f32 %v4069_v62, %v2373_v23  ;;  %v2371_v12 = vadd.f32 %v2346_v49, %v2164_v38 }
 0x17d   : > { %v2840_v31 = vpack.c.bf16 %v2388_v16, %v2387_v42  ;;  %v2386_v30 = vadd.f32 %v4069_v62, %v2363_v29 }
 0x17e   : > { %v2860_v45 = vpack.c.bf16 %v2396_v39, %v2395_v58  ;;  %v2394_v43 = vadd.f32 %v4069_v62, %v2371_v12 }
 0x17f   : > { %2864 = vst [vmem:[%s4082_s20 + $0x18] sm:$0xff] %v2840_v31   ;;  %v2835_v20 = vpack.c.bf16 %v2386_v30, %v2385_v15 }
 0x180   : > { %2868 = vst [vmem:[%s4082_s20 + $0x38] sm:$0xff] %v2860_v45   ;;  %v2855_v33 = vpack.c.bf16 %v2394_v43, %v2393_v26 }
 0x181   : > { %2863 = vst [vmem:[%s4082_s20 + $0x10] sm:$0xff] %v2835_v20  }
 0x182   : > { %2867 = vst [vmem:[%s4082_s20 + $0x30] sm:$0xff] %v2855_v33  }
 0x183 PF: > { %s13_s12 = sadd.s32 1, %s3450_s12  }
 0x184   : > { %p10_p4 = scmp.ge.s32.totalorder %s13_s12, 4  }
 0x186   :  { %12 = sbr.rel (!%p10_p4) target bundleno = 1 (0x1), region = 70 }

</bundles_post_ra>
